<compile_context>
chip_gen: v7x
topology: tpu7x:2x2x1
jax: 0.10.0
libtpu: 0.0.40
codegen_flags: <defaults>
</compile_context>

<pallas_src>
import functools
import math

import jax
import jax.numpy as jnp
from jax import lax
from jax.experimental import pallas as pl
from jax.experimental.pallas import tpu as pltpu

D_IN, D_H1, D_MODEL = 40, 80, 160
N_HEAD, D_HEAD = 2, 80
D_HEAD_PAD = 128                       # one full lane tile per head
D_QKV_PAD = N_HEAD * D_HEAD_PAD        # 256 padded lanes per q/k/v
D_FF = 256
D_C1, D_C2, D_OUT = 512, 512, 600
D_OUT_PAD = 640                        # 5 x 128 lanes -> unmasked output stores
LN_EPS = 1e-5


def _layer_norm(x, w_row, b_row):
    # Single-pass statistics: var = E[x^2] - mean^2 (biased, matches PyTorch).
    mean = jnp.mean(x, axis=-1, keepdims=True)
    meansq = jnp.mean(x * x, axis=-1, keepdims=True)
    var = meansq - mean * mean
    return (x - mean) * lax.rsqrt(var + LN_EPS) * w_row + b_row


def _classifier_kernel(
    x_ref,                                  # (tile_b*S, 40)
    w1, b1, w2, b2,                         # encoder MLP front-end
    wqkv, bqkv,                             # fused, head-padded QKV (160, 768)
    opw, opb,                               # head-padded out_proj (256, 160), (1, 160)
    ln1w, ln1b, ln2w, ln2b,                 # layer norms
    f1w, f1b, f2w, f2b,                     # transformer FFN
    c1w, c1b, c2w, c2b, c3w, c3b,           # classifier head (c3 lane-padded to 640)
    o_ref,                                  # (tile_b, 640)
    *, tile_b, S,
):
    f32 = jnp.float32
    x = x_ref[...]

    # ---- encoder MLP front-end ----
    h = jnp.maximum(jnp.dot(x, w1[...], preferred_element_type=f32) + b1[...], 0.0)
    h = jnp.dot(h, w2[...], preferred_element_type=f32) + b2[...]        # (R, 160)

    # ---- self-attention: fused QKV, each head owns one 128-lane tile ----
    # 1/sqrt(80) already folded into the q columns of wqkv/bqkv on the host.
    qkv = jnp.dot(h, wqkv[...], preferred_element_type=f32) + bqkv[...]  # (R, 768)
    q3 = qkv[:, 0:D_QKV_PAD].reshape(tile_b, S, D_QKV_PAD)               # 256-lane
    k3 = qkv[:, D_QKV_PAD:2 * D_QKV_PAD].reshape(tile_b, S, D_QKV_PAD)   # aligned
    v3 = qkv[:, 2 * D_QKV_PAD:3 * D_QKV_PAD].reshape(tile_b, S, D_QKV_PAD)

    head_outs = []
    for hd in range(N_HEAD):                        # static, tiny (N_HEAD = 2)
        lo = hd * D_HEAD_PAD                        # lane-tile aligned slice (free)
        qh = q3[:, :, lo:lo + D_HEAD_PAD]
        kh = k3[:, :, lo:lo + D_HEAD_PAD]
        vh = v3[:, :, lo:lo + D_HEAD_PAD]
        # batched over the tile_b dimension on the MXU (padded lanes are zero)
        scores = lax.dot_general(qh, kh, (((2,), (2,)), ((0,), (0,))),
                                 preferred_element_type=f32)             # (tile_b,S,S)
        scores = scores - jnp.max(scores, axis=-1, keepdims=True)
        p = jnp.exp(scores)
        p = p * pl.reciprocal(jnp.sum(p, axis=-1, keepdims=True), approx=False)
        head_outs.append(lax.dot_general(p, vh, (((2,), (1,)), ((0,), (0,))),
                                         preferred_element_type=f32))    # (tile_b,S,128)
    attn = jnp.concatenate(head_outs, axis=-1)          # concat at lane offset 128
    attn = attn.reshape(tile_b * S, D_QKV_PAD)

    attn = jnp.dot(attn, opw[...], preferred_element_type=f32) + opb[...]
    h = _layer_norm(h + attn, ln1w[...], ln1b[...])

    ff = jnp.maximum(jnp.dot(h, f1w[...], preferred_element_type=f32) + f1b[...], 0.0)
    ff = jnp.dot(ff, f2w[...], preferred_element_type=f32) + f2b[...]
    h = _layer_norm(h + ff, ln2w[...], ln2b[...])                        # (R, 160)

    # ---- sequence mean: plain sum (1/S folded into c1w on the host) ----
    mid = jnp.sum(h.reshape(tile_b, S, D_MODEL), axis=1)                 # (tile_b, 160)

    # ---- classifier head ----
    c = jnp.maximum(jnp.dot(mid, c1w[...], preferred_element_type=f32) + c1b[...], 0.0)
    c = jnp.maximum(jnp.dot(c, c2w[...], preferred_element_type=f32) + c2b[...], 0.0)
    out = jnp.dot(c, c3w[...], preferred_element_type=f32) + c3b[...]    # (tile_b, 640)

    o_ref[...] = out.astype(o_ref.dtype)


def _prepare_kernel_params(p, S):
    """Re-layout PyTorch-style params into lane-aligned kernel operands."""
    def pad_head_cols(a):
        # (rows, 160) -> (rows, 256): each 80-wide head padded to a 128-lane tile.
        heads = [jnp.pad(a[:, h * D_HEAD:(h + 1) * D_HEAD],
                         ((0, 0), (0, D_HEAD_PAD - D_HEAD)))
                 for h in range(N_HEAD)]
        return jnp.concatenate(heads, axis=1)

    ipw, ipb = p["ipw"], p["ipb"]
    scale = jnp.float32(1.0 / math.sqrt(D_HEAD))              # fold 1/sqrt(80) into q
    wq = pad_head_cols(ipw[:, 0:D_MODEL]) * scale
    wk = pad_head_cols(ipw[:, D_MODEL:2 * D_MODEL])
    wv = pad_head_cols(ipw[:, 2 * D_MODEL:3 * D_MODEL])
    bq = pad_head_cols(ipb[:, 0:D_MODEL]) * scale
    bk = pad_head_cols(ipb[:, D_MODEL:2 * D_MODEL])
    bv = pad_head_cols(ipb[:, 2 * D_MODEL:3 * D_MODEL])
    wqkv = jnp.concatenate([wq, wk, wv], axis=1)              # (160, 768)
    bqkv = jnp.concatenate([bq, bk, bv], axis=1)              # (1, 768)

    # out_proj rows follow the concatenated-head layout -> pad per head to 128.
    op_rows = [jnp.pad(p["opw"][h * D_HEAD:(h + 1) * D_HEAD, :],
                       ((0, D_HEAD_PAD - D_HEAD), (0, 0)))
               for h in range(N_HEAD)]
    opw = jnp.concatenate(op_rows, axis=0)                    # (256, 160)

    c1w = p["c1w"] * jnp.float32(1.0 / S)                     # fold sequence-mean 1/S
    c3w = jnp.pad(p["c3w"], ((0, 0), (0, D_OUT_PAD - D_OUT))) # zero cols
    c3b = jnp.pad(p["c3b"], ((0, 0), (0, D_OUT_PAD - D_OUT)))

    return [
        p["w1"], p["b1"], p["w2"], p["b2"],
        wqkv, bqkv,
        opw, p["opb"],
        p["ln1w"], p["ln1b"], p["ln2w"], p["ln2b"],
        p["f1w"], p["f1b"], p["f2w"], p["f2b"],
        c1w, p["c1b"], p["c2w"], p["c2b"],
        c3w, c3b,
    ]


def _pick_tile_b(B, S, target_rows=2048, min_rows_per_block=512):
    """Largest divisor tile_b of B with tile_b*S <= target_rows and sublane-
    aligned rows. No forced split on single-TC chips; an even block count is
    only preferred (for v7x megacore) when each block keeps >= 512 rows."""
    cap = max(1, target_rows // max(S, 1))
    divs = [d for d in range(1, B + 1) if B % d == 0 and (d * S) % 8 == 0]
    candidates = [d for d in divs if d <= cap]
    if candidates:
        tile_b = max(candidates)
    elif divs:
        tile_b = min(divs)
    else:
        # TODO(synk): prime B with unaligned rows falls back to one full-batch
        # block; for very large B*S this should use a masked last block instead.
        tile_b = B
    nb = B // tile_b
    if nb > 1 and nb % 2 == 1:
        even = [d for d in candidates
                if (B // d) % 2 == 0 and d * S >= min_rows_per_block]
        if even:
            tile_b = max(even)
    return tile_b


def _vmem_limit_bytes():
    """~3/4 of the queried VMEM capacity (96 MiB on v5e/v6e, 48 MiB on v7x);
    conservative 48 MiB fallback if the query is unavailable."""
    cap = None
    try:
        cap = getattr(pltpu.get_tpu_info(), "vmem_capacity_bytes", None)
    except Exception:
        cap = None
    if not cap:
        cap = 64 * 1024 * 1024
    return int(cap * 3 // 4)


def classifier_forward(x, params):
    B, S, _ = x.shape
    tile_b = _pick_tile_b(B, S)
    num_blocks = B // tile_b
    x2d = x.reshape(B * S, D_IN)
    flat = _prepare_kernel_params(params, S)

    in_specs = [pl.BlockSpec((tile_b * S, D_IN), lambda i: (i, 0))]
    # all weights/biases are 2-D and stay VMEM-resident across grid steps
    in_specs += [pl.BlockSpec(a.shape, lambda i: (0, 0)) for a in flat]
    out_spec = pl.BlockSpec((None, tile_b, D_OUT_PAD), lambda i: (i, 0, 0))

    flops = int(
        2 * B * S * (D_IN * D_H1 + D_H1 * D_MODEL + D_MODEL * 3 * D_QKV_PAD
                     + 2 * S * D_HEAD_PAD * N_HEAD + D_QKV_PAD * D_MODEL
                     + 2 * D_MODEL * D_FF)
        + 2 * B * (D_MODEL * D_C1 + D_C1 * D_C2 + D_C2 * D_OUT_PAD))
    transcendentals = int(B * N_HEAD * S * S + 2 * B * S)
    bytes_accessed = int(4 * (x2d.size + sum(int(a.size) for a in flat)
                              + num_blocks * tile_b * D_OUT_PAD))

    out3 = pl.pallas_call(
        functools.partial(_classifier_kernel, tile_b=tile_b, S=S),
        out_shape=jax.ShapeDtypeStruct((num_blocks, tile_b, D_OUT_PAD), jnp.float32),
        grid=(num_blocks,),
        in_specs=in_specs,
        out_specs=out_spec,
        compiler_params=pltpu.CompilerParams(
            dimension_semantics=("parallel",),
            vmem_limit_bytes=_vmem_limit_bytes()),
        cost_estimate=pl.CostEstimate(
            flops=flops,
            transcendentals=transcendentals,
            bytes_accessed=bytes_accessed),
    )(x2d, *flat)

    return out3.reshape(B, D_OUT_PAD)[:, :D_OUT]


def make_params(key):
    """Deterministic synthetic parameters. Linear weights stored as (in, out)."""
    ks = jax.random.split(key, 16)

    def w(k, shape, scale=0.05):
        return (scale * jax.random.normal(k, shape)).astype(jnp.float32)

    def brow(k, n, scale=0.02):
        return (scale * jax.random.normal(k, (1, n))).astype(jnp.float32)

    return {
        "w1": w(ks[0], (D_IN, D_H1)),      "b1": brow(ks[1], D_H1),
        "w2": w(ks[2], (D_H1, D_MODEL)),   "b2": brow(ks[3], D_MODEL),
        "ipw": w(ks[4], (D_MODEL, 3 * D_MODEL)), "ipb": brow(ks[5], 3 * D_MODEL),
        "opw": w(ks[6], (D_MODEL, D_MODEL)), "opb": brow(ks[7], D_MODEL),
        "ln1w": jnp.ones((1, D_MODEL), jnp.float32),
        "ln1b": jnp.zeros((1, D_MODEL), jnp.float32),
        "ln2w": jnp.ones((1, D_MODEL), jnp.float32),
        "ln2b": jnp.zeros((1, D_MODEL), jnp.float32),
        "f1w": w(ks[8], (D_MODEL, D_FF)),  "f1b": brow(ks[9], D_FF),
        "f2w": w(ks[10], (D_FF, D_MODEL)), "f2b": brow(ks[11], D_MODEL),
        "c1w": w(ks[12], (D_MODEL, D_C1)), "c1b": brow(ks[13], D_C1),
        "c2w": w(ks[14], (D_C1, D_C2)),    "c2b": brow(ks[15], D_C2),
        "c3w": w(jax.random.fold_in(key, 99), (D_C2, D_OUT)),
        "c3b": brow(jax.random.fold_in(key, 100), D_OUT),
    }


def reference_forward(x, p):
    """Pure-JAX reference mirroring PyTorch eval-mode semantics."""
    B, S, _ = x.shape
    h = jnp.maximum(x @ p["w1"] + p["b1"][0], 0.0)
    h = h @ p["w2"] + p["b2"][0]                                  # (B,S,160)

    qkv = h @ p["ipw"] + p["ipb"][0]
    q, k, v = jnp.split(qkv, 3, axis=-1)
    qh = q.reshape(B, S, N_HEAD, D_HEAD)
    kh = k.reshape(B, S, N_HEAD, D_HEAD)
    vh = v.reshape(B, S, N_HEAD, D_HEAD)
    scores = jnp.einsum("bqhd,bkhd->bhqk", qh, kh) / jnp.sqrt(jnp.float32(D_HEAD))
    pattn = jax.nn.softmax(scores, axis=-1)
    attn = jnp.einsum("bhqk,bkhd->bqhd", pattn, vh).reshape(B, S, D_MODEL)
    attn = attn @ p["opw"] + p["opb"][0]

    def ln(y, w, b):
        m = jnp.mean(y, axis=-1, keepdims=True)
        vv = jnp.mean((y - m) ** 2, axis=-1, keepdims=True)
        return (y - m) / jnp.sqrt(vv + LN_EPS) * w[0] + b[0]

    h = ln(h + attn, p["ln1w"], p["ln1b"])
    ff = jnp.maximum(h @ p["f1w"] + p["f1b"][0], 0.0) @ p["f2w"] + p["f2b"][0]
    h = ln(h + ff, p["ln2w"], p["ln2b"])

    mid = h.mean(axis=1)
    c = jnp.maximum(mid @ p["c1w"] + p["c1b"][0], 0.0)
    c = jnp.maximum(c @ p["c2w"] + p["c2b"][0], 0.0)
    return c @ p["c3w"] + p["c3b"][0]


if __name__ == "__main__":
    key = jax.random.PRNGKey(0)
    kx, kp = jax.random.split(key)
    B, S = 2, 8
    x = jax.random.normal(kx, (B, S, D_IN), dtype=jnp.float32)
    params = make_params(kp)

    out = classifier_forward(x, params)
    out = jax.block_until_ready(out)

    ref = reference_forward(x, params)
    assert out.shape == (B, D_OUT)
    assert jnp.allclose(out, ref, rtol=2e-3, atol=2e-3), (
        f"max abs err {jnp.max(jnp.abs(out - ref))}")
    print("KERNEL_OK")
</pallas_src>

<mosaic_0001>
module attributes {stable_mosaic.version = 11 : i64} {
  func.func @_classifier_kernel(%arg0: i32, %arg1: memref<16x40xf32, #tpu.memory_space<vmem>>, %arg2: memref<40x80xf32, #tpu.memory_space<vmem>>, %arg3: memref<1x80xf32, #tpu.memory_space<vmem>>, %arg4: memref<80x160xf32, #tpu.memory_space<vmem>>, %arg5: memref<1x160xf32, #tpu.memory_space<vmem>>, %arg6: memref<160x768xf32, #tpu.memory_space<vmem>>, %arg7: memref<1x768xf32, #tpu.memory_space<vmem>>, %arg8: memref<256x160xf32, #tpu.memory_space<vmem>>, %arg9: memref<1x160xf32, #tpu.memory_space<vmem>>, %arg10: memref<1x160xf32, #tpu.memory_space<vmem>>, %arg11: memref<1x160xf32, #tpu.memory_space<vmem>>, %arg12: memref<1x160xf32, #tpu.memory_space<vmem>>, %arg13: memref<1x160xf32, #tpu.memory_space<vmem>>, %arg14: memref<160x256xf32, #tpu.memory_space<vmem>>, %arg15: memref<1x256xf32, #tpu.memory_space<vmem>>, %arg16: memref<256x160xf32, #tpu.memory_space<vmem>>, %arg17: memref<1x160xf32, #tpu.memory_space<vmem>>, %arg18: memref<160x512xf32, #tpu.memory_space<vmem>>, %arg19: memref<1x512xf32, #tpu.memory_space<vmem>>, %arg20: memref<512x512xf32, #tpu.memory_space<vmem>>, %arg21: memref<1x512xf32, #tpu.memory_space<vmem>>, %arg22: memref<512x640xf32, #tpu.memory_space<vmem>>, %arg23: memref<1x640xf32, #tpu.memory_space<vmem>>, %arg24: memref<1x2x640xf32, #tpu.memory_space<vmem>>) attributes {dimension_semantics = [#tpu.dimension_semantics<parallel>], iteration_bounds = array<i64: 1>, scalar_prefetch = 0 : i64, scratch_operands = 0 : i64, tpu.core_type = #tpu.core_type<tc>, window_params = [{transform_indices = @transform_0, window_bounds = array<i64: 16, 40>}, {pipeline_mode = #tpu.pipeline_mode<synchronous>, transform_indices = @transform_1, window_bounds = array<i64: 40, 80>}, {pipeline_mode = #tpu.pipeline_mode<synchronous>, transform_indices = @transform_2, window_bounds = array<i64: 1, 80>}, {pipeline_mode = #tpu.pipeline_mode<synchronous>, transform_indices = @transform_3, window_bounds = array<i64: 80, 160>}, {pipeline_mode = #tpu.pipeline_mode<synchronous>, transform_indices = @transform_4, window_bounds = array<i64: 1, 160>}, {pipeline_mode = #tpu.pipeline_mode<synchronous>, transform_indices = @transform_5, window_bounds = array<i64: 160, 768>}, {pipeline_mode = #tpu.pipeline_mode<synchronous>, transform_indices = @transform_6, window_bounds = array<i64: 1, 768>}, {pipeline_mode = #tpu.pipeline_mode<synchronous>, transform_indices = @transform_7, window_bounds = array<i64: 256, 160>}, {pipeline_mode = #tpu.pipeline_mode<synchronous>, transform_indices = @transform_8, window_bounds = array<i64: 1, 160>}, {pipeline_mode = #tpu.pipeline_mode<synchronous>, transform_indices = @transform_9, window_bounds = array<i64: 1, 160>}, {pipeline_mode = #tpu.pipeline_mode<synchronous>, transform_indices = @transform_10, window_bounds = array<i64: 1, 160>}, {pipeline_mode = #tpu.pipeline_mode<synchronous>, transform_indices = @transform_11, window_bounds = array<i64: 1, 160>}, {pipeline_mode = #tpu.pipeline_mode<synchronous>, transform_indices = @transform_12, window_bounds = array<i64: 1, 160>}, {pipeline_mode = #tpu.pipeline_mode<synchronous>, transform_indices = @transform_13, window_bounds = array<i64: 160, 256>}, {pipeline_mode = #tpu.pipeline_mode<synchronous>, transform_indices = @transform_14, window_bounds = array<i64: 1, 256>}, {pipeline_mode = #tpu.pipeline_mode<synchronous>, transform_indices = @transform_15, window_bounds = array<i64: 256, 160>}, {pipeline_mode = #tpu.pipeline_mode<synchronous>, transform_indices = @transform_16, window_bounds = array<i64: 1, 160>}, {pipeline_mode = #tpu.pipeline_mode<synchronous>, transform_indices = @transform_17, window_bounds = array<i64: 160, 512>}, {pipeline_mode = #tpu.pipeline_mode<synchronous>, transform_indices = @transform_18, window_bounds = array<i64: 1, 512>}, {pipeline_mode = #tpu.pipeline_mode<synchronous>, transform_indices = @transform_19, window_bounds = array<i64: 512, 512>}, {pipeline_mode = #tpu.pipeline_mode<synchronous>, transform_indices = @transform_20, window_bounds = array<i64: 1, 512>}, {pipeline_mode = #tpu.pipeline_mode<synchronous>, transform_indices = @transform_21, window_bounds = array<i64: 512, 640>}, {pipeline_mode = #tpu.pipeline_mode<synchronous>, transform_indices = @transform_22, window_bounds = array<i64: 1, 640>}, {transform_indices = @transform_23, window_bounds = array<i64: 1, 2, 640>}]} {
    %c0 = arith.constant 0 : index
    %c0_0 = arith.constant 0 : index
    %0 = vector.load %arg1[%c0, %c0_0] : memref<16x40xf32, #tpu.memory_space<vmem>>, vector<16x40xf32>
    %c0_1 = arith.constant 0 : index
    %c0_2 = arith.constant 0 : index
    %1 = vector.load %arg2[%c0_1, %c0_2] : memref<40x80xf32, #tpu.memory_space<vmem>>, vector<40x80xf32>
    %cst = arith.constant dense<0.000000e+00> : vector<16x80xf32>
    %2 = tpu.matmul %0, %1, %cst {dimension_numbers = #tpu.dot_dimension_numbers<[1], [0], [0], [1], [0, 0, 1, 1], [], []>} : vector<16x40xf32>, vector<40x80xf32>, vector<16x80xf32> -> vector<16x80xf32>
    %c0_3 = arith.constant 0 : index
    %c0_4 = arith.constant 0 : index
    %3 = vector.load %arg3[%c0_3, %c0_4] : memref<1x80xf32, #tpu.memory_space<vmem>>, vector<1x80xf32>
    %4 = vector.broadcast %3 : vector<1x80xf32> to vector<16x80xf32>
    %5 = arith.addf %2, %4 : vector<16x80xf32>
    %cst_5 = arith.constant 0.000000e+00 : f32
    %6 = vector.broadcast %cst_5 : f32 to vector<16x80xf32>
    %7 = arith.maximumf %5, %6 : vector<16x80xf32>
    %c0_6 = arith.constant 0 : index
    %c0_7 = arith.constant 0 : index
    %8 = vector.load %arg4[%c0_6, %c0_7] : memref<80x160xf32, #tpu.memory_space<vmem>>, vector<80x160xf32>
    %cst_8 = arith.constant dense<0.000000e+00> : vector<16x160xf32>
    %9 = tpu.matmul %7, %8, %cst_8 {dimension_numbers = #tpu.dot_dimension_numbers<[1], [0], [0], [1], [0, 0, 1, 1], [], []>} : vector<16x80xf32>, vector<80x160xf32>, vector<16x160xf32> -> vector<16x160xf32>
    %c0_9 = arith.constant 0 : index
    %c0_10 = arith.constant 0 : index
    %10 = vector.load %arg5[%c0_9, %c0_10] : memref<1x160xf32, #tpu.memory_space<vmem>>, vector<1x160xf32>
    %11 = vector.broadcast %10 : vector<1x160xf32> to vector<16x160xf32>
    %12 = arith.addf %9, %11 : vector<16x160xf32>
    %c0_11 = arith.constant 0 : index
    %c0_12 = arith.constant 0 : index
    %13 = vector.load %arg6[%c0_11, %c0_12] : memref<160x768xf32, #tpu.memory_space<vmem>>, vector<160x768xf32>
    %cst_13 = arith.constant dense<0.000000e+00> : vector<16x768xf32>
    %14 = tpu.matmul %12, %13, %cst_13 {dimension_numbers = #tpu.dot_dimension_numbers<[1], [0], [0], [1], [0, 0, 1, 1], [], []>} : vector<16x160xf32>, vector<160x768xf32>, vector<16x768xf32> -> vector<16x768xf32>
    %c0_14 = arith.constant 0 : index
    %c0_15 = arith.constant 0 : index
    %15 = vector.load %arg7[%c0_14, %c0_15] : memref<1x768xf32, #tpu.memory_space<vmem>>, vector<1x768xf32>
    %16 = vector.broadcast %15 : vector<1x768xf32> to vector<16x768xf32>
    %17 = arith.addf %14, %16 : vector<16x768xf32>
    %18 = vector.extract_strided_slice %17 {offsets = [0, 0], sizes = [16, 256], strides = [1, 1]} : vector<16x768xf32> to vector<16x256xf32>
    %19 = vector.shape_cast %18 : vector<16x256xf32> to vector<2x8x256xf32>
    %20 = vector.extract_strided_slice %17 {offsets = [0, 256], sizes = [16, 256], strides = [1, 1]} : vector<16x768xf32> to vector<16x256xf32>
    %21 = vector.shape_cast %20 : vector<16x256xf32> to vector<2x8x256xf32>
    %22 = vector.extract_strided_slice %17 {offsets = [0, 512], sizes = [16, 256], strides = [1, 1]} : vector<16x768xf32> to vector<16x256xf32>
    %23 = vector.shape_cast %22 : vector<16x256xf32> to vector<2x8x256xf32>
    %24 = vector.extract_strided_slice %19 {offsets = [0, 0, 0], sizes = [2, 8, 128], strides = [1, 1, 1]} : vector<2x8x256xf32> to vector<2x8x128xf32>
    %25 = vector.extract_strided_slice %21 {offsets = [0, 0, 0], sizes = [2, 8, 128], strides = [1, 1, 1]} : vector<2x8x256xf32> to vector<2x8x128xf32>
    %26 = vector.extract_strided_slice %23 {offsets = [0, 0, 0], sizes = [2, 8, 128], strides = [1, 1, 1]} : vector<2x8x256xf32> to vector<2x8x128xf32>
    %cst_16 = arith.constant dense<0.000000e+00> : vector<2x8x8xf32>
    %27 = tpu.matmul %24, %25, %cst_16 {dimension_numbers = #tpu.dot_dimension_numbers<[2], [2], [1], [1], [0, 0, 0, 1, 1, 1], [0], [0]>} : vector<2x8x128xf32>, vector<2x8x128xf32>, vector<2x8x8xf32> -> vector<2x8x8xf32>
    %cst_17 = arith.constant dense<0xFF800000> : vector<2x8xf32>
    %28 = vector.multi_reduction <maximumf>, %27, %cst_17 [2] : vector<2x8x8xf32> to vector<2x8xf32>
    %29 = vector.shape_cast %28 : vector<2x8xf32> to vector<2x8x1xf32>
    %30 = vector.broadcast %29 : vector<2x8x1xf32> to vector<2x8x8xf32>
    %31 = arith.subf %27, %30 : vector<2x8x8xf32>
    %32 = math.exp %31 : vector<2x8x8xf32>
    %cst_18 = arith.constant dense<0.000000e+00> : vector<2x8xf32>
    %33 = vector.multi_reduction <add>, %32, %cst_18 [2] : vector<2x8x8xf32> to vector<2x8xf32>
    %34 = vector.shape_cast %33 : vector<2x8xf32> to vector<2x8x1xf32>
    %35 = tpu.reciprocal %34 : vector<2x8x1xf32> -> vector<2x8x1xf32>
    %36 = vector.broadcast %35 : vector<2x8x1xf32> to vector<2x8x8xf32>
    %37 = arith.mulf %32, %36 : vector<2x8x8xf32>
    %cst_19 = arith.constant dense<0.000000e+00> : vector<2x8x128xf32>
    %38 = tpu.matmul %37, %26, %cst_19 {dimension_numbers = #tpu.dot_dimension_numbers<[2], [1], [1], [2], [0, 0, 0, 1, 1, 2], [0], [0]>} : vector<2x8x8xf32>, vector<2x8x128xf32>, vector<2x8x128xf32> -> vector<2x8x128xf32>
    %39 = vector.extract_strided_slice %19 {offsets = [0, 0, 128], sizes = [2, 8, 128], strides = [1, 1, 1]} : vector<2x8x256xf32> to vector<2x8x128xf32>
    %40 = vector.extract_strided_slice %21 {offsets = [0, 0, 128], sizes = [2, 8, 128], strides = [1, 1, 1]} : vector<2x8x256xf32> to vector<2x8x128xf32>
    %41 = vector.extract_strided_slice %23 {offsets = [0, 0, 128], sizes = [2, 8, 128], strides = [1, 1, 1]} : vector<2x8x256xf32> to vector<2x8x128xf32>
    %cst_20 = arith.constant dense<0.000000e+00> : vector<2x8x8xf32>
    %42 = tpu.matmul %39, %40, %cst_20 {dimension_numbers = #tpu.dot_dimension_numbers<[2], [2], [1], [1], [0, 0, 0, 1, 1, 1], [0], [0]>} : vector<2x8x128xf32>, vector<2x8x128xf32>, vector<2x8x8xf32> -> vector<2x8x8xf32>
    %cst_21 = arith.constant dense<0xFF800000> : vector<2x8xf32>
    %43 = vector.multi_reduction <maximumf>, %42, %cst_21 [2] : vector<2x8x8xf32> to vector<2x8xf32>
    %44 = vector.shape_cast %43 : vector<2x8xf32> to vector<2x8x1xf32>
    %45 = vector.broadcast %44 : vector<2x8x1xf32> to vector<2x8x8xf32>
    %46 = arith.subf %42, %45 : vector<2x8x8xf32>
    %47 = math.exp %46 : vector<2x8x8xf32>
    %cst_22 = arith.constant dense<0.000000e+00> : vector<2x8xf32>
    %48 = vector.multi_reduction <add>, %47, %cst_22 [2] : vector<2x8x8xf32> to vector<2x8xf32>
    %49 = vector.shape_cast %48 : vector<2x8xf32> to vector<2x8x1xf32>
    %50 = tpu.reciprocal %49 : vector<2x8x1xf32> -> vector<2x8x1xf32>
    %51 = vector.broadcast %50 : vector<2x8x1xf32> to vector<2x8x8xf32>
    %52 = arith.mulf %47, %51 : vector<2x8x8xf32>
    %cst_23 = arith.constant dense<0.000000e+00> : vector<2x8x128xf32>
    %53 = tpu.matmul %52, %41, %cst_23 {dimension_numbers = #tpu.dot_dimension_numbers<[2], [1], [1], [2], [0, 0, 0, 1, 1, 2], [0], [0]>} : vector<2x8x8xf32>, vector<2x8x128xf32>, vector<2x8x128xf32> -> vector<2x8x128xf32>
    %54 = tpu.concatenate %38, %53 in 2 : vector<2x8x128xf32>, vector<2x8x128xf32> -> vector<2x8x256xf32>
    %55 = vector.shape_cast %54 : vector<2x8x256xf32> to vector<16x256xf32>
    %c0_24 = arith.constant 0 : index
    %c0_25 = arith.constant 0 : index
    %56 = vector.load %arg8[%c0_24, %c0_25] : memref<256x160xf32, #tpu.memory_space<vmem>>, vector<256x160xf32>
    %cst_26 = arith.constant dense<0.000000e+00> : vector<16x160xf32>
    %57 = tpu.matmul %55, %56, %cst_26 {dimension_numbers = #tpu.dot_dimension_numbers<[1], [0], [0], [1], [0, 0, 1, 1], [], []>} : vector<16x256xf32>, vector<256x160xf32>, vector<16x160xf32> -> vector<16x160xf32>
    %c0_27 = arith.constant 0 : index
    %c0_28 = arith.constant 0 : index
    %58 = vector.load %arg9[%c0_27, %c0_28] : memref<1x160xf32, #tpu.memory_space<vmem>>, vector<1x160xf32>
    %59 = vector.broadcast %58 : vector<1x160xf32> to vector<16x160xf32>
    %60 = arith.addf %57, %59 : vector<16x160xf32>
    %61 = arith.addf %12, %60 : vector<16x160xf32>
    %c0_29 = arith.constant 0 : index
    %c0_30 = arith.constant 0 : index
    %62 = vector.load %arg10[%c0_29, %c0_30] : memref<1x160xf32, #tpu.memory_space<vmem>>, vector<1x160xf32>
    %c0_31 = arith.constant 0 : index
    %c0_32 = arith.constant 0 : index
    %63 = vector.load %arg11[%c0_31, %c0_32] : memref<1x160xf32, #tpu.memory_space<vmem>>, vector<1x160xf32>
    %cst_33 = arith.constant dense<0.000000e+00> : vector<16xf32>
    %64 = vector.multi_reduction <add>, %61, %cst_33 [1] : vector<16x160xf32> to vector<16xf32>
    %65 = vector.shape_cast %64 : vector<16xf32> to vector<16x1xf32>
    %cst_34 = arith.constant 1.600000e+02 : f32
    %66 = vector.broadcast %cst_34 : f32 to vector<16x1xf32>
    %67 = arith.divf %65, %66 : vector<16x1xf32>
    %68 = arith.mulf %61, %61 : vector<16x160xf32>
    %cst_35 = arith.constant dense<0.000000e+00> : vector<16xf32>
    %69 = vector.multi_reduction <add>, %68, %cst_35 [1] : vector<16x160xf32> to vector<16xf32>
    %70 = vector.shape_cast %69 : vector<16xf32> to vector<16x1xf32>
    %cst_36 = arith.constant 1.600000e+02 : f32
    %71 = vector.broadcast %cst_36 : f32 to vector<16x1xf32>
    %72 = arith.divf %70, %71 : vector<16x1xf32>
    %73 = arith.mulf %67, %67 : vector<16x1xf32>
    %74 = arith.subf %72, %73 : vector<16x1xf32>
    %75 = vector.broadcast %67 : vector<16x1xf32> to vector<16x160xf32>
    %76 = arith.subf %61, %75 : vector<16x160xf32>
    %cst_37 = arith.constant 9.99999974E-6 : f32
    %77 = vector.broadcast %cst_37 : f32 to vector<16x1xf32>
    %78 = arith.addf %74, %77 : vector<16x1xf32>
    %79 = math.rsqrt %78 : vector<16x1xf32>
    %80 = vector.broadcast %79 : vector<16x1xf32> to vector<16x160xf32>
    %81 = arith.mulf %76, %80 : vector<16x160xf32>
    %82 = vector.broadcast %62 : vector<1x160xf32> to vector<16x160xf32>
    %83 = arith.mulf %81, %82 : vector<16x160xf32>
    %84 = vector.broadcast %63 : vector<1x160xf32> to vector<16x160xf32>
    %85 = arith.addf %83, %84 : vector<16x160xf32>
    %c0_38 = arith.constant 0 : index
    %c0_39 = arith.constant 0 : index
    %86 = vector.load %arg14[%c0_38, %c0_39] : memref<160x256xf32, #tpu.memory_space<vmem>>, vector<160x256xf32>
    %cst_40 = arith.constant dense<0.000000e+00> : vector<16x256xf32>
    %87 = tpu.matmul %85, %86, %cst_40 {dimension_numbers = #tpu.dot_dimension_numbers<[1], [0], [0], [1], [0, 0, 1, 1], [], []>} : vector<16x160xf32>, vector<160x256xf32>, vector<16x256xf32> -> vector<16x256xf32>
    %c0_41 = arith.constant 0 : index
    %c0_42 = arith.constant 0 : index
    %88 = vector.load %arg15[%c0_41, %c0_42] : memref<1x256xf32, #tpu.memory_space<vmem>>, vector<1x256xf32>
    %89 = vector.broadcast %88 : vector<1x256xf32> to vector<16x256xf32>
    %90 = arith.addf %87, %89 : vector<16x256xf32>
    %cst_43 = arith.constant 0.000000e+00 : f32
    %91 = vector.broadcast %cst_43 : f32 to vector<16x256xf32>
    %92 = arith.maximumf %90, %91 : vector<16x256xf32>
    %c0_44 = arith.constant 0 : index
    %c0_45 = arith.constant 0 : index
    %93 = vector.load %arg16[%c0_44, %c0_45] : memref<256x160xf32, #tpu.memory_space<vmem>>, vector<256x160xf32>
    %cst_46 = arith.constant dense<0.000000e+00> : vector<16x160xf32>
    %94 = tpu.matmul %92, %93, %cst_46 {dimension_numbers = #tpu.dot_dimension_numbers<[1], [0], [0], [1], [0, 0, 1, 1], [], []>} : vector<16x256xf32>, vector<256x160xf32>, vector<16x160xf32> -> vector<16x160xf32>
    %c0_47 = arith.constant 0 : index
    %c0_48 = arith.constant 0 : index
    %95 = vector.load %arg17[%c0_47, %c0_48] : memref<1x160xf32, #tpu.memory_space<vmem>>, vector<1x160xf32>
    %96 = vector.broadcast %95 : vector<1x160xf32> to vector<16x160xf32>
    %97 = arith.addf %94, %96 : vector<16x160xf32>
    %98 = arith.addf %85, %97 : vector<16x160xf32>
    %c0_49 = arith.constant 0 : index
    %c0_50 = arith.constant 0 : index
    %99 = vector.load %arg12[%c0_49, %c0_50] : memref<1x160xf32, #tpu.memory_space<vmem>>, vector<1x160xf32>
    %c0_51 = arith.constant 0 : index
    %c0_52 = arith.constant 0 : index
    %100 = vector.load %arg13[%c0_51, %c0_52] : memref<1x160xf32, #tpu.memory_space<vmem>>, vector<1x160xf32>
    %cst_53 = arith.constant dense<0.000000e+00> : vector<16xf32>
    %101 = vector.multi_reduction <add>, %98, %cst_53 [1] : vector<16x160xf32> to vector<16xf32>
    %102 = vector.shape_cast %101 : vector<16xf32> to vector<16x1xf32>
    %cst_54 = arith.constant 1.600000e+02 : f32
    %103 = vector.broadcast %cst_54 : f32 to vector<16x1xf32>
    %104 = arith.divf %102, %103 : vector<16x1xf32>
    %105 = arith.mulf %98, %98 : vector<16x160xf32>
    %cst_55 = arith.constant dense<0.000000e+00> : vector<16xf32>
    %106 = vector.multi_reduction <add>, %105, %cst_55 [1] : vector<16x160xf32> to vector<16xf32>
    %107 = vector.shape_cast %106 : vector<16xf32> to vector<16x1xf32>
    %cst_56 = arith.constant 1.600000e+02 : f32
    %108 = vector.broadcast %cst_56 : f32 to vector<16x1xf32>
    %109 = arith.divf %107, %108 : vector<16x1xf32>
    %110 = arith.mulf %104, %104 : vector<16x1xf32>
    %111 = arith.subf %109, %110 : vector<16x1xf32>
    %112 = vector.broadcast %104 : vector<16x1xf32> to vector<16x160xf32>
    %113 = arith.subf %98, %112 : vector<16x160xf32>
    %cst_57 = arith.constant 9.99999974E-6 : f32
    %114 = vector.broadcast %cst_57 : f32 to vector<16x1xf32>
    %115 = arith.addf %111, %114 : vector<16x1xf32>
    %116 = math.rsqrt %115 : vector<16x1xf32>
    %117 = vector.broadcast %116 : vector<16x1xf32> to vector<16x160xf32>
    %118 = arith.mulf %113, %117 : vector<16x160xf32>
    %119 = vector.broadcast %99 : vector<1x160xf32> to vector<16x160xf32>
    %120 = arith.mulf %118, %119 : vector<16x160xf32>
    %121 = vector.broadcast %100 : vector<1x160xf32> to vector<16x160xf32>
    %122 = arith.addf %120, %121 : vector<16x160xf32>
    %123 = vector.shape_cast %122 : vector<16x160xf32> to vector<2x8x160xf32>
    %cst_58 = arith.constant dense<0.000000e+00> : vector<2x160xf32>
    %124 = vector.multi_reduction <add>, %123, %cst_58 [1] : vector<2x8x160xf32> to vector<2x160xf32>
    %c0_59 = arith.constant 0 : index
    %c0_60 = arith.constant 0 : index
    %125 = vector.load %arg18[%c0_59, %c0_60] : memref<160x512xf32, #tpu.memory_space<vmem>>, vector<160x512xf32>
    %cst_61 = arith.constant dense<0.000000e+00> : vector<2x512xf32>
    %126 = tpu.matmul %124, %125, %cst_61 {dimension_numbers = #tpu.dot_dimension_numbers<[1], [0], [0], [1], [0, 0, 1, 1], [], []>} : vector<2x160xf32>, vector<160x512xf32>, vector<2x512xf32> -> vector<2x512xf32>
    %c0_62 = arith.constant 0 : index
    %c0_63 = arith.constant 0 : index
    %127 = vector.load %arg19[%c0_62, %c0_63] : memref<1x512xf32, #tpu.memory_space<vmem>>, vector<1x512xf32>
    %128 = vector.broadcast %127 : vector<1x512xf32> to vector<2x512xf32>
    %129 = arith.addf %126, %128 : vector<2x512xf32>
    %cst_64 = arith.constant 0.000000e+00 : f32
    %130 = vector.broadcast %cst_64 : f32 to vector<2x512xf32>
    %131 = arith.maximumf %129, %130 : vector<2x512xf32>
    %c0_65 = arith.constant 0 : index
    %c0_66 = arith.constant 0 : index
    %132 = vector.load %arg20[%c0_65, %c0_66] : memref<512x512xf32, #tpu.memory_space<vmem>>, vector<512x512xf32>
    %cst_67 = arith.constant dense<0.000000e+00> : vector<2x512xf32>
    %133 = tpu.matmul %131, %132, %cst_67 {dimension_numbers = #tpu.dot_dimension_numbers<[1], [0], [0], [1], [0, 0, 1, 1], [], []>} : vector<2x512xf32>, vector<512x512xf32>, vector<2x512xf32> -> vector<2x512xf32>
    %c0_68 = arith.constant 0 : index
    %c0_69 = arith.constant 0 : index
    %134 = vector.load %arg21[%c0_68, %c0_69] : memref<1x512xf32, #tpu.memory_space<vmem>>, vector<1x512xf32>
    %135 = vector.broadcast %134 : vector<1x512xf32> to vector<2x512xf32>
    %136 = arith.addf %133, %135 : vector<2x512xf32>
    %cst_70 = arith.constant 0.000000e+00 : f32
    %137 = vector.broadcast %cst_70 : f32 to vector<2x512xf32>
    %138 = arith.maximumf %136, %137 : vector<2x512xf32>
    %c0_71 = arith.constant 0 : index
    %c0_72 = arith.constant 0 : index
    %139 = vector.load %arg22[%c0_71, %c0_72] : memref<512x640xf32, #tpu.memory_space<vmem>>, vector<512x640xf32>
    %cst_73 = arith.constant dense<0.000000e+00> : vector<2x640xf32>
    %140 = tpu.matmul %138, %139, %cst_73 {dimension_numbers = #tpu.dot_dimension_numbers<[1], [0], [0], [1], [0, 0, 1, 1], [], []>} : vector<2x512xf32>, vector<512x640xf32>, vector<2x640xf32> -> vector<2x640xf32>
    %c0_74 = arith.constant 0 : index
    %c0_75 = arith.constant 0 : index
    %141 = vector.load %arg23[%c0_74, %c0_75] : memref<1x640xf32, #tpu.memory_space<vmem>>, vector<1x640xf32>
    %142 = vector.broadcast %141 : vector<1x640xf32> to vector<2x640xf32>
    %143 = arith.addf %140, %142 : vector<2x640xf32>
    %c0_76 = arith.constant 0 : index
    %c0_77 = arith.constant 0 : index
    %c0_78 = arith.constant 0 : index
    %144 = vector.load %arg24[%c0_76, %c0_77, %c0_78] : memref<1x2x640xf32, #tpu.memory_space<vmem>>, vector<1x2x640xf32>
    %145 = vector.shape_cast %144 : vector<1x2x640xf32> to vector<2x640xf32>
    %146 = vector.shape_cast %143 : vector<2x640xf32> to vector<1x2x640xf32>
    tpu.vector_store %arg24[%c0_76, %c0_77, %c0_78], %146 {strides = array<i32>} : memref<1x2x640xf32, #tpu.memory_space<vmem>>, vector<1x2x640xf32>,
    return
  }
  func.func @transform_0(%arg0: i32) -> (i32, i32) {
    %c0_i32 = arith.constant 0 : i32
    %c0_i32_0 = arith.constant 0 : i32
    return %arg0, %c0_i32 : i32, i32
  }
  func.func @transform_1(%arg0: i32) -> (i32, i32) {
    %c0_i32 = arith.constant 0 : i32
    %c0_i32_0 = arith.constant 0 : i32
    %c0_i32_1 = arith.constant 0 : i32
    return %c0_i32, %c0_i32_0 : i32, i32
  }
  func.func @transform_2(%arg0: i32) -> (i32, i32) {
    %c0_i32 = arith.constant 0 : i32
    %c0_i32_0 = arith.constant 0 : i32
    %c0_i32_1 = arith.constant 0 : i32
    return %c0_i32, %c0_i32_0 : i32, i32
  }
  func.func @transform_3(%arg0: i32) -> (i32, i32) {
    %c0_i32 = arith.constant 0 : i32
    %c0_i32_0 = arith.constant 0 : i32
    %c0_i32_1 = arith.constant 0 : i32
    return %c0_i32, %c0_i32_0 : i32, i32
  }
  func.func @transform_4(%arg0: i32) -> (i32, i32) {
    %c0_i32 = arith.constant 0 : i32
    %c0_i32_0 = arith.constant 0 : i32
    %c0_i32_1 = arith.constant 0 : i32
    return %c0_i32, %c0_i32_0 : i32, i32
  }
  func.func @transform_5(%arg0: i32) -> (i32, i32) {
    %c0_i32 = arith.constant 0 : i32
    %c0_i32_0 = arith.constant 0 : i32
    %c0_i32_1 = arith.constant 0 : i32
    return %c0_i32, %c0_i32_0 : i32, i32
  }
  func.func @transform_6(%arg0: i32) -> (i32, i32) {
    %c0_i32 = arith.constant 0 : i32
    %c0_i32_0 = arith.constant 0 : i32
    %c0_i32_1 = arith.constant 0 : i32
    return %c0_i32, %c0_i32_0 : i32, i32
  }
  func.func @transform_7(%arg0: i32) -> (i32, i32) {
    %c0_i32 = arith.constant 0 : i32
    %c0_i32_0 = arith.constant 0 : i32
    %c0_i32_1 = arith.constant 0 : i32
    return %c0_i32, %c0_i32_0 : i32, i32
  }
  func.func @transform_8(%arg0: i32) -> (i32, i32) {
    %c0_i32 = arith.constant 0 : i32
    %c0_i32_0 = arith.constant 0 : i32
    %c0_i32_1 = arith.constant 0 : i32
    return %c0_i32, %c0_i32_0 : i32, i32
  }
  func.func @transform_9(%arg0: i32) -> (i32, i32) {
    %c0_i32 = arith.constant 0 : i32
    %c0_i32_0 = arith.constant 0 : i32
    %c0_i32_1 = arith.constant 0 : i32
    return %c0_i32, %c0_i32_0 : i32, i32
  }
  func.func @transform_10(%arg0: i32) -> (i32, i32) {
    %c0_i32 = arith.constant 0 : i32
    %c0_i32_0 = arith.constant 0 : i32
    %c0_i32_1 = arith.constant 0 : i32
    return %c0_i32, %c0_i32_0 : i32, i32
  }
  func.func @transform_11(%arg0: i32) -> (i32, i32) {
    %c0_i32 = arith.constant 0 : i32
    %c0_i32_0 = arith.constant 0 : i32
    %c0_i32_1 = arith.constant 0 : i32
    return %c0_i32, %c0_i32_0 : i32, i32
  }
  func.func @transform_12(%arg0: i32) -> (i32, i32) {
    %c0_i32 = arith.constant 0 : i32
    %c0_i32_0 = arith.constant 0 : i32
    %c0_i32_1 = arith.constant 0 : i32
    return %c0_i32, %c0_i32_0 : i32, i32
  }
  func.func @transform_13(%arg0: i32) -> (i32, i32) {
    %c0_i32 = arith.constant 0 : i32
    %c0_i32_0 = arith.constant 0 : i32
    %c0_i32_1 = arith.constant 0 : i32
    return %c0_i32, %c0_i32_0 : i32, i32
  }
  func.func @transform_14(%arg0: i32) -> (i32, i32) {
    %c0_i32 = arith.constant 0 : i32
    %c0_i32_0 = arith.constant 0 : i32
    %c0_i32_1 = arith.constant 0 : i32
    return %c0_i32, %c0_i32_0 : i32, i32
  }
  func.func @transform_15(%arg0: i32) -> (i32, i32) {
    %c0_i32 = arith.constant 0 : i32
    %c0_i32_0 = arith.constant 0 : i32
    %c0_i32_1 = arith.constant 0 : i32
    return %c0_i32, %c0_i32_0 : i32, i32
  }
  func.func @transform_16(%arg0: i32) -> (i32, i32) {
    %c0_i32 = arith.constant 0 : i32
    %c0_i32_0 = arith.constant 0 : i32
    %c0_i32_1 = arith.constant 0 : i32
    return %c0_i32, %c0_i32_0 : i32, i32
  }
  func.func @transform_17(%arg0: i32) -> (i32, i32) {
    %c0_i32 = arith.constant 0 : i32
    %c0_i32_0 = arith.constant 0 : i32
    %c0_i32_1 = arith.constant 0 : i32
    return %c0_i32, %c0_i32_0 : i32, i32
  }
  func.func @transform_18(%arg0: i32) -> (i32, i32) {
    %c0_i32 = arith.constant 0 : i32
    %c0_i32_0 = arith.constant 0 : i32
    %c0_i32_1 = arith.constant 0 : i32
    return %c0_i32, %c0_i32_0 : i32, i32
  }
  func.func @transform_19(%arg0: i32) -> (i32, i32) {
    %c0_i32 = arith.constant 0 : i32
    %c0_i32_0 = arith.constant 0 : i32
    %c0_i32_1 = arith.constant 0 : i32
    return %c0_i32, %c0_i32_0 : i32, i32
  }
  func.func @transform_20(%arg0: i32) -> (i32, i32) {
    %c0_i32 = arith.constant 0 : i32
    %c0_i32_0 = arith.constant 0 : i32
    %c0_i32_1 = arith.constant 0 : i32
    return %c0_i32, %c0_i32_0 : i32, i32
  }
  func.func @transform_21(%arg0: i32) -> (i32, i32) {
    %c0_i32 = arith.constant 0 : i32
    %c0_i32_0 = arith.constant 0 : i32
    %c0_i32_1 = arith.constant 0 : i32
    return %c0_i32, %c0_i32_0 : i32, i32
  }
  func.func @transform_22(%arg0: i32) -> (i32, i32) {
    %c0_i32 = arith.constant 0 : i32
    %c0_i32_0 = arith.constant 0 : i32
    %c0_i32_1 = arith.constant 0 : i32
    return %c0_i32, %c0_i32_0 : i32, i32
  }
  func.func @transform_23(%arg0: i32) -> (i32, i32, i32) {
    %c0_i32 = arith.constant 0 : i32
    %c0_i32_0 = arith.constant 0 : i32
    %c0_i32_1 = arith.constant 0 : i32
    return %arg0, %c0_i32, %c0_i32_0 : i32, i32, i32
  }
}

</mosaic_0001>

<bundles_post_ra>
// kernel: tpu_custom_call.1
= control target key start
LH: loop header
LB: loop body
LE: loop exit
PB: predicated region body
PF: predicated region fallthrough
CT: control target
= control target key end

     0   :  { %s6663_s0 = inlined_call_operand.hbm [shape: f32[16,40], index: 0, kind: input, shape index: {}]   ;;  %s6664_s1 = inlined_call_operand.hbm [shape: f32[40,80], index: 1, kind: input, shape index: {}]   ;;  %s6665_s2 = inlined_call_operand.hbm [shape: f32[1,80], index: 2, kind: input, shape index: {}]   ;;  %s6666_s3 = inlined_call_operand.hbm [shape: f32[80,160], index: 3, kind: input, shape index: {}]   ;;  %s6667_s4 = inlined_call_operand.hbm [shape: f32[1,160], index: 4, kind: input, shape index: {}]   ;;  %s6668_s5 = inlined_call_operand.hbm [shape: f32[160,768], index: 5, kind: input, shape index: {}]   ;;  %s6669_s6 = inlined_call_operand.hbm [shape: f32[1,768], index: 6, kind: input, shape index: {}]   ;;  %s6670_s7 = inlined_call_operand.vmem [shape: f32[256,160], index: 7, kind: input, shape index: {}]   ;;  %s6671_s8 = inlined_call_operand.hbm [shape: f32[1,160], index: 8, kind: input, shape index: {}]   ;;  %s6672_s9 = inlined_call_operand.hbm [shape: f32[1,160], index: 9, kind: input, shape index: {}]   ;;  %s6673_s10 = inlined_call_operand.hbm [shape: f32[1,160], index: 10, kind: input, shape index: {}]   ;;  %s6674_s11 = inlined_call_operand.hbm [shape: f32[1,160], index: 11, kind: input, shape index: {}]   ;;  %s6675_s12 = inlined_call_operand.hbm [shape: f32[1,160], index: 12, kind: input, shape index: {}]   ;;  %s6676_s13 = inlined_call_operand.hbm [shape: f32[160,256], index: 13, kind: input, shape index: {}]   ;;  %s6677_s14 = inlined_call_operand.hbm [shape: f32[1,256], index: 14, kind: input, shape index: {}]   ;;  %s6678_s15 = inlined_call_operand.vmem [shape: f32[256,160], index: 15, kind: input, shape index: {}]   ;;  %s6679_s16 = inlined_call_operand.hbm [shape: f32[1,160], index: 16, kind: input, shape index: {}]   ;;  %s6680_s17 = inlined_call_operand.hbm [shape: f32[160,512], index: 17, kind: input, shape index: {}]   ;;  %s6681_s18 = inlined_call_operand.hbm [shape: f32[1,512], index: 18, kind: input, shape index: {}]   ;;  %s6682_s19 = inlined_call_operand.hbm [shape: f32[512,512], index: 19, kind: input, shape index: {}]   ;;  %s6683_s20 = inlined_call_operand.hbm [shape: f32[1,512], index: 20, kind: input, shape index: {}]   ;;  %s6684_s21 = inlined_call_operand.hbm [shape: f32[512,640], index: 21, kind: input, shape index: {}]   ;;  %s6685_s22 = inlined_call_operand.hbm [shape: f32[1,640], index: 22, kind: input, shape index: {}]   ;;  %s6686_s23 = inlined_call_operand.hbm [shape: f32[1,2,640], index: 23, kind: output, shape index: {}]  }
   0x1   :  { %6701 = sst [smem:[#allocation48_spill]] %s6663_s0 }
   0x2   :  { %6702 = sst [smem:[#allocation49_spill]] %s6664_s1 }
   0x3   :  { %6703 = sst [smem:[#allocation50_spill]] %s6665_s2 }
   0x4   :  { %6704 = sst [smem:[#allocation51_spill]] %s6666_s3 }
   0x5   :  { %6705 = sst [smem:[#allocation52_spill]] %s6667_s4 }
   0x6   :  { %6706 = sst [smem:[#allocation53_spill]] %s6668_s5 }
   0x7   :  { %6707 = sst [smem:[#allocation54_spill]] %s6669_s6 }
   0x8   :  { %6708 = sst [smem:[#allocation55_spill]] %s6670_s7 }
   0x9   :  { %6709 = sst [smem:[#allocation56_spill]] %s6678_s15 }
   0xa   :  { %6710 = sst [smem:[#allocation57_spill]] %s6686_s23 }
   0xb   :  { %28 = vsyncpa [#allocation3], 0 }
   0xc   :  { %29 = vsyncpa [#allocation6], 0 }
   0xd   :  { %30 = vsyncpa [#allocation9], 0 }
   0xe   :  { %31 = vsyncpa [#allocation12], 0 }
   0xf   :  { %32 = vsyncpa [#allocation15], 0 }
  0x10   :  { %33 = vsyncpa [#allocation18], 0 }
  0x11   :  { %34 = vsyncpa [#allocation21], 0 }
  0x12   :  { %35 = vsyncpa [#allocation24], 0 }
  0x13   :  { %36 = vsyncpa [#allocation27], 0 }
  0x14   :  { %37 = vsyncpa [#allocation30], 0 }
  0x15   :  { %38 = vsyncpa [#allocation33], 0 }
  0x16   :  { %39 = vsyncpa [#allocation4], 0  ;;  %s5552_s4 = smov [#allocation5]   ;;  %s5553_s24 = smov [#allocation8]  }
  0x17   :  { %s57_s30 = sshll.u32 %s5552_s4, 4  ;;  %s79_s25 = sshll.u32 %s5553_s24, 4  ;;  %s58_s30 = int_to_ptr.vmem [resolvable:$true] %s57_s30  ;;  %s5707_s25 = int_to_ptr.vmem [resolvable:$true] %s79_s25 }
  0x18   :  { %s6711_s26 = sld [smem:[#allocation49_spill]] }
  0x1e   :  { %s5044_s2 = scalar_lea.hbm %s6711_s26, 640 }
  0x1f   :  { %p5045_p0 = scmp.ne.s32.totalorder %s6711_s26, %s5044_s2  ;;  %p5048_p1 = scmp.lt.u32.totalorder %s5044_s2, %s6711_s26 }
  0x21   :  { %p5050_p2 = pnand %p5048_p1, %p5045_p0 }
  0x23   :  { %5053 = shalt.err (!%p5050_p2)
}
  0x24   :  { %s5054_s29 = scalar_lea.vmem %s58_s30, 640  ;;  %p5059_p4 = scmp.lt.s32.totalorder %s58_s30, %s58_s30 }
  0x25   :  { %p5055_p3 = scmp.ne.s32.totalorder %s58_s30, %s5054_s29  ;;  %p5060_p5 = scmp.lt.s32.totalorder %s5054_s29, %s5054_s29 }
  0x27   :  { %p5061_p6 = por %p5060_p5, %p5059_p4 }
  0x29   :  { %p5062_p7 = pnand %p5061_p6, %p5055_p3 }
  0x2b   :  { %5065 = shalt.err (!%p5062_p7)
}
  0x2c   :  { %s6696_s3 = smov 128   ;;  %s6697_s0 = smov 8  }
  0x2d   :  { %63 = dma.hbm_to_vmem [thread:$0]  %s6711_s26, 640, %s58_s30, [#allocation6], %s6696_s3, %s6696_s3, %s6697_s0  }
  0x2e   :  { %s6712_s2 = sld [smem:[#allocation51_spill]] }
  0x34   :  { %s5066_s6 = scalar_lea.hbm %s6712_s2, 2560 }
  0x35   :  { %p5067_p8 = scmp.ne.s32.totalorder %s6712_s2, %s5066_s6  ;;  %p5070_p9 = scmp.lt.u32.totalorder %s5066_s6, %s6712_s2 }
  0x37   :  { %p5072_p10 = pnand %p5070_p9, %p5067_p8 }
  0x39   :  { %5075 = shalt.err (!%p5072_p10)
}
  0x3a   :  { %s5076_s23 = scalar_lea.vmem %s5707_s25, 2560  ;;  %p5081_p12 = scmp.lt.s32.totalorder %s5707_s25, %s5707_s25 }
  0x3b   :  { %p5077_p11 = scmp.ne.s32.totalorder %s5707_s25, %s5076_s23  ;;  %p5082_p13 = scmp.lt.s32.totalorder %s5076_s23, %s5076_s23 }
  0x3d   :  { %p5083_p0 = por %p5082_p13, %p5081_p12 }
  0x3f   :  { %p5084_p1 = pnand %p5083_p0, %p5077_p11 }
  0x41   :  { %5087 = shalt.err (!%p5084_p1)
}
  0x42   :  { %s6699_s30 = smov 256   ;;  %s6700_s26 = smov 16  }
  0x43   :  { %85 = dma.hbm_to_vmem [thread:$0]  %s6712_s2, 2560, %s5707_s25, [#allocation9], %s6699_s30, %s6699_s30, %s6700_s26  }
  0x44   :  { %s5558_s5 = smov [#allocation11]   ;;  %s6713_s7 = sld [smem:[#allocation53_spill]] }
  0x45   :  { %s101_s1 = sshll.u32 %s5558_s5, 4  ;;  %s102_s1 = int_to_ptr.vmem [resolvable:$true] %s101_s1 }
  0x4a   :  { %s5088_s23 = scalar_lea.hbm %s6713_s7, 15360 }
  0x4b   :  { %p5089_p2 = scmp.ne.s32.totalorder %s6713_s7, %s5088_s23  ;;  %p5092_p3 = scmp.lt.u32.totalorder %s5088_s23, %s6713_s7 }
  0x4d   :  { %p5094_p4 = pnand %p5092_p3, %p5089_p2 }
  0x4f   :  { %5097 = shalt.err (!%p5094_p4)
}
  0x50   :  { %s5098_s15 = scalar_lea.vmem %s102_s1, 15360  ;;  %p5103_p6 = scmp.lt.s32.totalorder %s102_s1, %s102_s1 }
  0x51   :  { %p5099_p5 = scmp.ne.s32.totalorder %s102_s1, %s5098_s15  ;;  %p5104_p7 = scmp.lt.s32.totalorder %s5098_s15, %s5098_s15 }
  0x53   :  { %p5105_p8 = por %p5104_p7, %p5103_p6 }
  0x55   :  { %p5106_p9 = pnand %p5105_p8, %p5099_p5 }
  0x57   :  { %5109 = shalt.err (!%p5106_p9)
}
  0x58   :  { %s5559_s25 = smov 768   ;;  %s5560_s2 = smov 48  }
  0x59   :  { %107 = dma.hbm_to_vmem [thread:$0]  %s6713_s7, 15360, %s102_s1, [#allocation12], %s5559_s25, %s5559_s25, %s5560_s2  }
  0x5a   :  { %s5561_s5 = smov [#allocation14]   ;;  %s5562_s3 = smov [#allocation17]  }
  0x5b   :  { %s126_s6 = sshll.u32 %s5561_s5, 4  ;;  %s146_s0 = sshll.u32 %s5562_s3, 4  ;;  %s127_s6 = int_to_ptr.vmem [resolvable:$true] %s126_s6  ;;  %s147_s0 = int_to_ptr.vmem [resolvable:$true] %s146_s0 }
  0x5c   :  { %s5110_s28 = scalar_lea.hbm %s6671_s8, 32 }
  0x5d   :  { %p5111_p10 = scmp.ne.s32.totalorder %s6671_s8, %s5110_s28  ;;  %p5114_p11 = scmp.lt.u32.totalorder %s5110_s28, %s6671_s8 }
  0x5f   :  { %p5116_p12 = pnand %p5114_p11, %p5111_p10 }
  0x61   :  { %5119 = shalt.err (!%p5116_p12)
}
  0x62   :  { %s5120_s1 = scalar_lea.vmem %s127_s6, 32  ;;  %p5125_p0 = scmp.lt.s32.totalorder %s127_s6, %s127_s6 }
  0x63   :  { %p5121_p13 = scmp.ne.s32.totalorder %s127_s6, %s5120_s1  ;;  %p5126_p1 = scmp.lt.s32.totalorder %s5120_s1, %s5120_s1 }
  0x65   :  { %p5127_p2 = por %p5126_p1, %p5125_p0 }
  0x67   :  { %p5128_p3 = pnand %p5127_p2, %p5121_p13 }
  0x69   :  { %5131 = shalt.err (!%p5128_p3)
}
  0x6a   :  { %129 = dma.hbm_to_vmem [thread:$0]  %s6671_s8, 32, %s127_s6, [#allocation15]  }
  0x6b   :  { %s5132_s24 = scalar_lea.hbm %s6673_s10, 32 }
  0x6c   :  { %p5133_p4 = scmp.ne.s32.totalorder %s6673_s10, %s5132_s24  ;;  %p5136_p5 = scmp.lt.u32.totalorder %s5132_s24, %s6673_s10 }
  0x6e   :  { %p5138_p6 = pnand %p5136_p5, %p5133_p4 }
  0x70   :  { %5141 = shalt.err (!%p5138_p6)
}
  0x71   :  { %s5142_s27 = scalar_lea.vmem %s147_s0, 32  ;;  %p5147_p8 = scmp.lt.s32.totalorder %s147_s0, %s147_s0 }
  0x72   :  { %p5143_p7 = scmp.ne.s32.totalorder %s147_s0, %s5142_s27  ;;  %p5148_p9 = scmp.lt.s32.totalorder %s5142_s27, %s5142_s27 }
  0x74   :  { %p5149_p10 = por %p5148_p9, %p5147_p8 }
  0x76   :  { %p5150_p11 = pnand %p5149_p10, %p5143_p7 }
  0x78   :  { %5153 = shalt.err (!%p5150_p11)
}
  0x79   :  { %149 = dma.hbm_to_vmem [thread:$0]  %s6673_s10, 32, %s147_s0, [#allocation18]  }
  0x7a   :  { %s5563_s23 = smov [#allocation20]   ;;  %s5564_s29 = smov [#allocation23]  }
  0x7b   :  { %s166_s28 = sshll.u32 %s5563_s23, 4  ;;  %s188_s15 = sshll.u32 %s5564_s29, 4  ;;  %s167_s28 = int_to_ptr.vmem [resolvable:$true] %s166_s28  ;;  %s189_s15 = int_to_ptr.vmem [resolvable:$true] %s188_s15 }
  0x7c   :  { %s5154_s25 = scalar_lea.hbm %s6675_s12, 32 }
  0x7d   :  { %p5155_p12 = scmp.ne.s32.totalorder %s6675_s12, %s5154_s25  ;;  %p5158_p13 = scmp.lt.u32.totalorder %s5154_s25, %s6675_s12 }
  0x7f   :  { %p5160_p0 = pnand %p5158_p13, %p5155_p12 }
  0x81   :  { %5163 = shalt.err (!%p5160_p0)
}
  0x82   :  { %s5164_s10 = scalar_lea.vmem %s167_s28, 32  ;;  %p5169_p2 = scmp.lt.s32.totalorder %s167_s28, %s167_s28 }
  0x83   :  { %p5165_p1 = scmp.ne.s32.totalorder %s167_s28, %s5164_s10  ;;  %p5170_p3 = scmp.lt.s32.totalorder %s5164_s10, %s5164_s10 }
  0x85   :  { %p5171_p4 = por %p5170_p3, %p5169_p2 }
  0x87   :  { %p5172_p5 = pnand %p5171_p4, %p5165_p1 }
  0x89   :  { %5175 = shalt.err (!%p5172_p5)
}
  0x8a   :  { %169 = dma.hbm_to_vmem [thread:$0]  %s6675_s12, 32, %s167_s28, [#allocation21]  }
  0x8b   :  { %s5176_s27 = scalar_lea.hbm %s6677_s14, 32 }
  0x8c   :  { %p5177_p6 = scmp.ne.s32.totalorder %s6677_s14, %s5176_s27  ;;  %p5180_p7 = scmp.lt.u32.totalorder %s5176_s27, %s6677_s14 }
  0x8e   :  { %p5182_p8 = pnand %p5180_p7, %p5177_p6 }
  0x90   :  { %5185 = shalt.err (!%p5182_p8)
}
  0x91   :  { %s5186_s1 = scalar_lea.vmem %s189_s15, 32  ;;  %p5191_p10 = scmp.lt.s32.totalorder %s189_s15, %s189_s15 }
  0x92   :  { %p5187_p9 = scmp.ne.s32.totalorder %s189_s15, %s5186_s1  ;;  %p5192_p11 = scmp.lt.s32.totalorder %s5186_s1, %s5186_s1 }
  0x94   :  { %p5193_p12 = por %p5192_p11, %p5191_p10 }
  0x96   :  { %p5194_p13 = pnand %p5193_p12, %p5187_p9 }
  0x98   :  { %5197 = shalt.err (!%p5194_p13)
}
  0x99   :  { %191 = dma.hbm_to_vmem [thread:$0]  %s6677_s14, 32, %s189_s15, [#allocation24]  }
  0x9a   :  { %s5565_s7 = smov [#allocation26]   ;;  %s5198_s24 = scalar_lea.hbm %s6680_s17, 10240 }
  0x9b   :  { %s209_s25 = sshll.u32 %s5565_s7, 4  ;;  %p5199_p0 = scmp.ne.s32.totalorder %s6680_s17, %s5198_s24  ;;  %s210_s25 = int_to_ptr.vmem [resolvable:$true] %s209_s25 }
  0x9c   :  { %p5202_p1 = scmp.lt.u32.totalorder %s5198_s24, %s6680_s17 }
  0x9e   :  { %p5204_p2 = pnand %p5202_p1, %p5199_p0 }
  0xa0   :  { %5207 = shalt.err (!%p5204_p2)
}
  0xa1   :  { %s5208_s5 = scalar_lea.vmem %s210_s25, 10240  ;;  %p5213_p4 = scmp.lt.s32.totalorder %s210_s25, %s210_s25 }
  0xa2   :  { %p5209_p3 = scmp.ne.s32.totalorder %s210_s25, %s5208_s5  ;;  %p5214_p5 = scmp.lt.s32.totalorder %s5208_s5, %s5208_s5 }
  0xa4   :  { %p5215_p6 = por %p5214_p5, %p5213_p4 }
  0xa6   :  { %p5216_p7 = pnand %p5215_p6, %p5209_p3 }
  0xa8   :  { %5219 = shalt.err (!%p5216_p7)
}
  0xa9   :  { %s5566_s14 = smov 512   ;;  %s5567_s15 = smov 32  }
  0xaa   :  { %215 = dma.hbm_to_vmem [thread:$0]  %s6680_s17, 10240, %s210_s25, [#allocation27], %s5566_s14, %s5566_s14, %s5567_s15  }
  0xab   :  { %s5568_s8 = smov [#allocation29]   ;;  %s5569_s23 = smov [#allocation32]  }
  0xac   :  { %s231_s6 = sshll.u32 %s5568_s8, 4  ;;  %s253_s29 = sshll.u32 %s5569_s23, 4  ;;  %s232_s6 = int_to_ptr.vmem [resolvable:$true] %s231_s6  ;;  %s5816_s29 = int_to_ptr.vmem [resolvable:$true] %s253_s29 }
  0xad   :  { %s5220_s28 = scalar_lea.hbm %s6682_s19, 32768 }
  0xae   :  { %p5221_p8 = scmp.ne.s32.totalorder %s6682_s19, %s5220_s28  ;;  %p5224_p9 = scmp.lt.u32.totalorder %s5220_s28, %s6682_s19 }
  0xb0   :  { %p5226_p10 = pnand %p5224_p9, %p5221_p8 }
  0xb2   :  { %5229 = shalt.err (!%p5226_p10)
}
  0xb3   :  { %s5230_s17 = scalar_lea.vmem %s232_s6, 32768  ;;  %p5235_p12 = scmp.lt.s32.totalorder %s232_s6, %s232_s6 }
  0xb4   :  { %p5231_p11 = scmp.ne.s32.totalorder %s232_s6, %s5230_s17  ;;  %p5236_p13 = scmp.lt.s32.totalorder %s5230_s17, %s5230_s17 }
  0xb6   :  { %p5237_p0 = por %p5236_p13, %p5235_p12 }
  0xb8   :  { %p5238_p1 = pnand %p5237_p0, %p5231_p11 }
  0xba   :  { %5241 = shalt.err (!%p5238_p1)
}
  0xbb   :  { %237 = dma.hbm_to_vmem [thread:$0]  %s6682_s19, 32768, %s232_s6, [#allocation30], %s5566_s14, %s5566_s14, %s5567_s15  }
  0xbc   :  { %s5242_s26 = scalar_lea.hbm %s6684_s21, 40960 }
  0xbd   :  { %p5243_p2 = scmp.ne.s32.totalorder %s6684_s21, %s5242_s26  ;;  %p5246_p3 = scmp.lt.u32.totalorder %s5242_s26, %s6684_s21 }
  0xbf   :  { %p5248_p4 = pnand %p5246_p3, %p5243_p2 }
  0xc1   :  { %5251 = shalt.err (!%p5248_p4)
}
  0xc2   :  { %s5252_s23 = scalar_lea.vmem %s5816_s29, 40960  ;;  %p5257_p6 = scmp.lt.s32.totalorder %s5816_s29, %s5816_s29 }
  0xc3   :  { %p5253_p5 = scmp.ne.s32.totalorder %s5816_s29, %s5252_s23  ;;  %p5258_p7 = scmp.lt.s32.totalorder %s5252_s23, %s5252_s23 }
  0xc5   :  { %p5259_p8 = por %p5258_p7, %p5257_p6 }
  0xc7   :  { %p5260_p9 = pnand %p5259_p8, %p5253_p5 }
  0xc9   :  { %5263 = shalt.err (!%p5260_p9)
}
  0xca   :  { %s5570_s19 = smov 640   ;;  %s5571_s14 = smov 40  }
  0xcb   :  { %259 = dma.hbm_to_vmem [thread:$0]  %s6684_s21, 40960, %s5816_s29, [#allocation33], %s5570_s19, %s5570_s19, %s5571_s14  }
  0xcc   :  { %s5572_s1 = smov [#allocation2]   ;;  %s5573_s28 = smov [#allocation7]  }
  0xcd   :  { %s45_s12 = sshll.u32 %s5572_s1, 4  ;;  %s70_s7 = sshll.u32 %s5573_s28, 4  ;;  %s46_s12 = int_to_ptr.vmem [resolvable:$true] %s45_s12  ;;  %s71_s7 = int_to_ptr.vmem [resolvable:$true] %s70_s7 }
  0xce   :  { %s6714_s24 = sld [smem:[#allocation48_spill]] }
  0xd4   :  { %s5264_s17 = scalar_lea.hbm %s6714_s24, 256 }
  0xd5   :  { %p5265_p10 = scmp.ne.s32.totalorder %s6714_s24, %s5264_s17  ;;  %p5268_p11 = scmp.lt.u32.totalorder %s5264_s17, %s6714_s24 }
  0xd7   :  { %p5270_p12 = pnand %p5268_p11, %p5265_p10 }
  0xd9   :  { %5273 = shalt.err (!%p5270_p12)
}
  0xda   :  { %s5274_s21 = scalar_lea.vmem %s46_s12, 256  ;;  %p5279_p0 = scmp.lt.s32.totalorder %s46_s12, %s46_s12 }
  0xdb   :  { %p5275_p13 = scmp.ne.s32.totalorder %s46_s12, %s5274_s21  ;;  %p5280_p1 = scmp.lt.s32.totalorder %s5274_s21, %s5274_s21 }
  0xdd   :  { %p5281_p2 = por %p5280_p1, %p5279_p0 }
  0xdf   :  { %p5282_p3 = pnand %p5281_p2, %p5275_p13 }
  0xe1   :  { %5285 = shalt.err (!%p5282_p3)
}
  0xe2   :  { %s6715_s29 = smov 8   ;;  %s6716_s26 = smov 128  }
  0xe3   :  { %51 = dma.hbm_to_vmem [thread:$0]  %s6714_s24, 256, %s46_s12, [#allocation3], %s6716_s26, %s6716_s26, %s6715_s29  }
  0xe4   :  { %s6717_s23 = sld [smem:[#allocation50_spill]] }
  0xea   :  { %s5286_s19 = scalar_lea.hbm %s6717_s23, 16 }
  0xeb   :  { %p5287_p4 = scmp.ne.s32.totalorder %s6717_s23, %s5286_s19  ;;  %p5290_p5 = scmp.lt.u32.totalorder %s5286_s19, %s6717_s23 }
  0xed   :  { %p5292_p6 = pnand %p5290_p5, %p5287_p4 }
  0xef   :  { %5295 = shalt.err (!%p5292_p6)
}
  0xf0   :  { %s5296_s28 = scalar_lea.vmem %s71_s7, 16  ;;  %s5300_s2 = scalar_lea.vmem %s71_s7, 32 }
  0xf1   :  { %p5297_p7 = scmp.ne.s32.totalorder %s71_s7, %s5296_s28  ;;  %p5301_p8 = scmp.lt.s32.totalorder %s71_s7, %s71_s7 }
  0xf2   :  { %p5302_p9 = scmp.lt.s32.totalorder %s5300_s2, %s5296_s28 }
  0xf4   :  { %p5303_p10 = por %p5302_p9, %p5301_p8 }
  0xf6   :  { %p5304_p11 = pnand %p5303_p10, %p5297_p7 }
  0xf8   :  { %5307 = shalt.err (!%p5304_p11)
}
  0xf9   :  { %73 = dma.hbm_to_vmem [thread:$0]  %s6717_s23, 16, %s71_s7, [#allocation6]  }
  0xfa   :  { %s5574_s24 = smov [#allocation10]   ;;  %s5575_s25 = smov [#allocation13]  }
  0xfb   :  { %s92_s17 = sshll.u32 %s5574_s24, 4  ;;  %s114_s30 = sshll.u32 %s5575_s25, 4  ;;  %s93_s17 = int_to_ptr.vmem [resolvable:$true] %s92_s17  ;;  %s115_s30 = int_to_ptr.vmem [resolvable:$true] %s114_s30 }
  0xfc   :  { %s6718_s21 = sld [smem:[#allocation52_spill]] }
 0x102   :  { %s5308_s29 = scalar_lea.hbm %s6718_s21, 32 }
 0x103   :  { %p5309_p12 = scmp.ne.s32.totalorder %s6718_s21, %s5308_s29  ;;  %p5312_p13 = scmp.lt.u32.totalorder %s5308_s29, %s6718_s21 }
 0x105   :  { %p5314_p0 = pnand %p5312_p13, %p5309_p12 }
 0x107   :  { %5317 = shalt.err (!%p5314_p0)
}
 0x108   :  { %s5318_s7 = scalar_lea.vmem %s93_s17, 32  ;;  %p5323_p2 = scmp.lt.s32.totalorder %s93_s17, %s93_s17 }
 0x109   :  { %p5319_p1 = scmp.ne.s32.totalorder %s93_s17, %s5318_s7  ;;  %p5324_p3 = scmp.lt.s32.totalorder %s5318_s7, %s5318_s7 }
 0x10b   :  { %p5325_p4 = por %p5324_p3, %p5323_p2 }
 0x10d   :  { %p5326_p5 = pnand %p5325_p4, %p5319_p1 }
 0x10f   :  { %5329 = shalt.err (!%p5326_p5)
}
 0x110   :  { %95 = dma.hbm_to_vmem [thread:$0]  %s6718_s21, 32, %s93_s17, [#allocation9]  }
 0x111   :  { %s6719_s15 = sld [smem:[#allocation54_spill]] }
 0x117   :  { %s5330_s6 = scalar_lea.hbm %s6719_s15, 96 }
 0x118   :  { %p5331_p6 = scmp.ne.s32.totalorder %s6719_s15, %s5330_s6  ;;  %p5334_p7 = scmp.lt.u32.totalorder %s5330_s6, %s6719_s15 }
 0x11a   :  { %p5336_p8 = pnand %p5334_p7, %p5331_p6 }
 0x11c   :  { %5339 = shalt.err (!%p5336_p8)
}
 0x11d   :  { %s5340_s4 = scalar_lea.vmem %s115_s30, 96  ;;  %p5345_p10 = scmp.lt.s32.totalorder %s115_s30, %s115_s30 }
 0x11e   :  { %p5341_p9 = scmp.ne.s32.totalorder %s115_s30, %s5340_s4  ;;  %p5346_p11 = scmp.lt.s32.totalorder %s5340_s4, %s5340_s4 }
 0x120   :  { %p5347_p12 = por %p5346_p11, %p5345_p10 }
 0x122   :  { %p5348_p13 = pnand %p5347_p12, %p5341_p9 }
 0x124   :  { %5351 = shalt.err (!%p5348_p13)
}
 0x125   :  { %117 = dma.hbm_to_vmem [thread:$0]  %s6719_s15, 96, %s115_s30, [#allocation12]  }
 0x126   :  { %s5576_s25 = smov [#allocation16]   ;;  %s5577_s0 = smov [#allocation19]  }
 0x127   :  { %s136_s10 = sshll.u32 %s5576_s25, 4  ;;  %s156_s21 = sshll.u32 %s5577_s0, 4  ;;  %s137_s10 = int_to_ptr.vmem [resolvable:$true] %s136_s10  ;;  %s157_s21 = int_to_ptr.vmem [resolvable:$true] %s156_s21 }
 0x128   :  { %s5352_s5 = scalar_lea.hbm %s6672_s9, 32 }
 0x129   :  { %p5353_p0 = scmp.ne.s32.totalorder %s6672_s9, %s5352_s5  ;;  %p5356_p1 = scmp.lt.u32.totalorder %s5352_s5, %s6672_s9 }
 0x12b   :  { %p5358_p2 = pnand %p5356_p1, %p5353_p0 }
 0x12d   :  { %5361 = shalt.err (!%p5358_p2)
}
 0x12e   :  { %s5362_s30 = scalar_lea.vmem %s137_s10, 32  ;;  %p5367_p4 = scmp.lt.s32.totalorder %s137_s10, %s137_s10 }
 0x12f   :  { %p5363_p3 = scmp.ne.s32.totalorder %s137_s10, %s5362_s30  ;;  %p5368_p5 = scmp.lt.s32.totalorder %s5362_s30, %s5362_s30 }
 0x131   :  { %p5369_p6 = por %p5368_p5, %p5367_p4 }
 0x133   :  { %p5370_p7 = pnand %p5369_p6, %p5363_p3 }
 0x135   :  { %5373 = shalt.err (!%p5370_p7)
}
 0x136   :  { %139 = dma.hbm_to_vmem [thread:$0]  %s6672_s9, 32, %s137_s10, [#allocation15]  }
 0x137   :  { %s5374_s6 = scalar_lea.hbm %s6674_s11, 32 }
 0x138   :  { %p5375_p8 = scmp.ne.s32.totalorder %s6674_s11, %s5374_s6  ;;  %p5378_p9 = scmp.lt.u32.totalorder %s5374_s6, %s6674_s11 }
 0x13a   :  { %p5380_p10 = pnand %p5378_p9, %p5375_p8 }
 0x13c   :  { %5383 = shalt.err (!%p5380_p10)
}
 0x13d   :  { %s5384_s4 = scalar_lea.vmem %s157_s21, 32  ;;  %p5389_p12 = scmp.lt.s32.totalorder %s157_s21, %s157_s21 }
 0x13e   :  { %p5385_p11 = scmp.ne.s32.totalorder %s157_s21, %s5384_s4  ;;  %p5390_p13 = scmp.lt.s32.totalorder %s5384_s4, %s5384_s4 }
 0x140   :  { %p5391_p0 = por %p5390_p13, %p5389_p12 }
 0x142   :  { %p5392_p1 = pnand %p5391_p0, %p5385_p11 }
 0x144   :  { %5395 = shalt.err (!%p5392_p1)
}
 0x145   :  { %159 = dma.hbm_to_vmem [thread:$0]  %s6674_s11, 32, %s157_s21, [#allocation18]  }
 0x146   :  { %s5578_s17 = smov [#allocation22]   ;;  %s5579_s10 = smov [#allocation25]  }
 0x147   :  { %s175_s25 = sshll.u32 %s5578_s17, 4  ;;  %s200_s0 = sshll.u32 %s5579_s10, 4  ;;  %s176_s25 = int_to_ptr.vmem [resolvable:$true] %s175_s25  ;;  %s201_s0 = int_to_ptr.vmem [resolvable:$true] %s200_s0 }
 0x148   :  { %s5396_s5 = scalar_lea.hbm %s6676_s13, 5120 }
 0x149   :  { %p5397_p2 = scmp.ne.s32.totalorder %s6676_s13, %s5396_s5  ;;  %p5400_p3 = scmp.lt.u32.totalorder %s5396_s5, %s6676_s13 }
 0x14b   :  { %p5402_p4 = pnand %p5400_p3, %p5397_p2 }
 0x14d   :  { %5405 = shalt.err (!%p5402_p4)
}
 0x14e   :  { %s5406_s11 = scalar_lea.vmem %s176_s25, 5120  ;;  %p5411_p6 = scmp.lt.s32.totalorder %s176_s25, %s176_s25 }
 0x14f   :  { %p5407_p5 = scmp.ne.s32.totalorder %s176_s25, %s5406_s11  ;;  %p5412_p7 = scmp.lt.s32.totalorder %s5406_s11, %s5406_s11 }
 0x151   :  { %p5413_p8 = por %p5412_p7, %p5411_p6 }
 0x153   :  { %p5414_p9 = pnand %p5413_p8, %p5407_p5 }
 0x155   :  { %5417 = shalt.err (!%p5414_p9)
}
 0x156   :  { %s6720_s21 = smov 16   ;;  %s6721_s30 = smov 256  }
 0x157   :  { %181 = dma.hbm_to_vmem [thread:$0]  %s6676_s13, 5120, %s176_s25, [#allocation21], %s6721_s30, %s6721_s30, %s6720_s21  }
 0x158   :  { %s5418_s6 = scalar_lea.hbm %s6679_s16, 32 }
 0x159   :  { %p5419_p10 = scmp.ne.s32.totalorder %s6679_s16, %s5418_s6  ;;  %p5422_p11 = scmp.lt.u32.totalorder %s5418_s6, %s6679_s16 }
 0x15b   :  { %p5424_p12 = pnand %p5422_p11, %p5419_p10 }
 0x15d   :  { %5427 = shalt.err (!%p5424_p12)
}
 0x15e   :  { %s5428_s4 = scalar_lea.vmem %s201_s0, 32  ;;  %p5433_p0 = scmp.lt.s32.totalorder %s201_s0, %s201_s0 }
 0x15f   :  { %p5429_p13 = scmp.ne.s32.totalorder %s201_s0, %s5428_s4  ;;  %p5434_p1 = scmp.lt.s32.totalorder %s5428_s4, %s5428_s4 }
 0x161   :  { %p5435_p2 = por %p5434_p1, %p5433_p0 }
 0x163   :  { %p5436_p3 = pnand %p5435_p2, %p5429_p13 }
 0x165   :  { %5439 = shalt.err (!%p5436_p3)
}
 0x166   :  { %203 = dma.hbm_to_vmem [thread:$0]  %s6679_s16, 32, %s201_s0, [#allocation24]  }
 0x167   :  { %s5580_s24 = smov [#allocation28]   ;;  %s5581_s25 = smov [#allocation31]  }
 0x168   :  { %s222_s17 = sshll.u32 %s5580_s24, 4  ;;  %s244_s10 = sshll.u32 %s5581_s25, 4  ;;  %s223_s17 = int_to_ptr.vmem [resolvable:$true] %s222_s17  ;;  %s245_s10 = int_to_ptr.vmem [resolvable:$true] %s244_s10 }
 0x169   :  { %s5440_s5 = scalar_lea.hbm %s6681_s18, 64 }
 0x16a   :  { %p5441_p4 = scmp.ne.s32.totalorder %s6681_s18, %s5440_s5  ;;  %p5444_p5 = scmp.lt.u32.totalorder %s5440_s5, %s6681_s18 }
 0x16c   :  { %p5446_p6 = pnand %p5444_p5, %p5441_p4 }
 0x16e   :  { %5449 = shalt.err (!%p5446_p6)
}
 0x16f   :  { %s5450_s16 = scalar_lea.vmem %s223_s17, 64  ;;  %p5455_p8 = scmp.lt.s32.totalorder %s223_s17, %s223_s17 }
 0x170   :  { %p5451_p7 = scmp.ne.s32.totalorder %s223_s17, %s5450_s16  ;;  %p5456_p9 = scmp.lt.s32.totalorder %s5450_s16, %s5450_s16 }
 0x172   :  { %p5457_p10 = por %p5456_p9, %p5455_p8 }
 0x174   :  { %p5458_p11 = pnand %p5457_p10, %p5451_p7 }
 0x176   :  { %5461 = shalt.err (!%p5458_p11)
}
 0x177   :  { %225 = dma.hbm_to_vmem [thread:$0]  %s6681_s18, 64, %s223_s17, [#allocation27]  }
 0x178   :  { %s5462_s23 = scalar_lea.hbm %s6683_s20, 64 }
 0x179   :  { %p5463_p12 = scmp.ne.s32.totalorder %s6683_s20, %s5462_s23  ;;  %p5466_p13 = scmp.lt.u32.totalorder %s5462_s23, %s6683_s20 }
 0x17b   :  { %p5468_p0 = pnand %p5466_p13, %p5463_p12 }
 0x17d   :  { %5471 = shalt.err (!%p5468_p0)
}
 0x17e   :  { %s5472_s1 = scalar_lea.vmem %s245_s10, 64  ;;  %p5477_p2 = scmp.lt.s32.totalorder %s245_s10, %s245_s10 }
 0x17f   :  { %p5473_p1 = scmp.ne.s32.totalorder %s245_s10, %s5472_s1  ;;  %p5478_p3 = scmp.lt.s32.totalorder %s5472_s1, %s5472_s1 }
 0x181   :  { %p5479_p4 = por %p5478_p3, %p5477_p2 }
 0x183   :  { %p5480_p5 = pnand %p5479_p4, %p5473_p1 }
 0x185   :  { %5483 = shalt.err (!%p5480_p5)
}
 0x186   :  { %247 = dma.hbm_to_vmem [thread:$0]  %s6683_s20, 64, %s245_s10, [#allocation30]  }
 0x187   :  { %s5582_s2 = smov [#allocation34]   ;;  %s5484_s9 = scalar_lea.hbm %s6685_s22, 80 }
 0x188   :  { %s266_s12 = sshll.u32 %s5582_s2, 4  ;;  %p5485_p6 = scmp.ne.s32.totalorder %s6685_s22, %s5484_s9  ;;  %s267_s12 = int_to_ptr.vmem [resolvable:$true] %s266_s12 }
 0x189   :  { %p5488_p7 = scmp.lt.u32.totalorder %s5484_s9, %s6685_s22 }
 0x18b   :  { %p5490_p8 = pnand %p5488_p7, %p5485_p6 }
 0x18d   :  { %5493 = shalt.err (!%p5490_p8)
}
 0x18e   :  { %s5494_s26 = scalar_lea.vmem %s267_s12, 80  ;;  %s5498_s20 = scalar_lea.vmem %s267_s12, 96 }
 0x18f   :  { %p5495_p9 = scmp.ne.s32.totalorder %s267_s12, %s5494_s26  ;;  %p5499_p10 = scmp.lt.s32.totalorder %s267_s12, %s267_s12 }
 0x190   :  { %p5500_p11 = scmp.lt.s32.totalorder %s5498_s20, %s5494_s26 }
 0x192   :  { %p5501_p12 = por %p5500_p11, %p5499_p10 }
 0x194   :  { %p5502_p13 = pnand %p5501_p12, %p5495_p9 }
 0x196   :  { %5505 = shalt.err (!%p5502_p13)
}
 0x197   :  { %269 = dma.hbm_to_vmem [thread:$0]  %s6685_s22, 80, %s267_s12, [#allocation33]  }
 0x198   :  { %5528 = dma.done.wait [#allocation3], 256  }
 0x199   :  { %5529 = vsyncadd [#allocation3], 4294967040 }
 0x19a   :  { %5530 = dma.done.wait [#allocation6], 656  }
 0x19b   :  { %5531 = vsyncadd [#allocation6], 4294966640 }
 0x19c   :  { %5532 = dma.done.wait [#allocation9], 2592  }
 0x19d   :  { %5533 = vsyncadd [#allocation9], 4294964704 }
 0x19e   :  { %5534 = dma.done.wait [#allocation12], 15456  }
 0x19f   :  { %5535 = vsyncadd [#allocation12], 4294951840 }
 0x1a0   :  { %5536 = dma.done.wait [#allocation15], 64  }
 0x1a1   :  { %5537 = vsyncadd [#allocation15], 4294967232 }
 0x1a2   :  { %5538 = dma.done.wait [#allocation18], 64  }
 0x1a3   :  { %5539 = vsyncadd [#allocation18], 4294967232 }
 0x1a4   :  { %5540 = dma.done.wait [#allocation21], 5152  }
 0x1a5   :  { %5541 = vsyncadd [#allocation21], 4294962144 }
 0x1a6   :  { %5542 = dma.done.wait [#allocation24], 64  }
 0x1a7   :  { %5543 = vsyncadd [#allocation24], 4294967232 }
 0x1a8   :  { %5544 = dma.done.wait [#allocation27], 10304  }
 0x1a9   :  { %5545 = vsyncadd [#allocation27], 4294956992 }
 0x1aa   :  { %5546 = dma.done.wait [#allocation30], 32832  }
 0x1ab   :  { %5547 = vsyncadd [#allocation30], 4294934464 }
 0x1ac   :  { %5548 = dma.done.wait [#allocation33], 41040  }
 0x1ad   :  { %5549 = vsyncadd [#allocation33], 4294926256  ;;  %vm347_vm0 = vcmask 326656   ;;  %v335_v0 = vld [vmem:[#allocation5] sm:$0xff]  ;;  %v336_v1 = vld [vmem:[#allocation5 + $0x8] sm:$0xff]  ;;  %v5583_v39 = vmov 0.0  }
 0x1ae   :  { %v337_v2 = vld [vmem:[#allocation5 + $0x10] sm:$0xff]  ;;  %v3997_v3 = vpack.c.bf16 %v336_v1, %v335_v0  ;;  %v338_v4 = vld [vmem:[#allocation5 + $0x18] sm:$0xff]  ;;  %v339_v7 = vld [vmem:[#allocation5 + $0x20] sm:$0xff]  ;;  %vm463_vm1 = vcmask 654336   ;;  %vm699_vm2 = vcmask 261120   ;;  %vm5584_vm3 = vmmov 0  }
 0x1af   :  { %v333_v5 = vld [vmem:[#allocation2] sm:$0xff]  ;;  %v4001_v6 = vpack.c.bf16 %v338_v4, %v337_v2  ;;  %v434_v9 = vld [vmem:[#allocation8 + $0x18] sm:$0xff]  ;;  %v433_v11 = vld [vmem:[#allocation8 + $0x10] sm:$0xff]  ;;  %vm1077_vm4 = vcmask 64512   ;;  %s6722_s27 = sld [smem:[#allocation55_spill]]  ;;  %s6723_s23 = sld [smem:[#allocation56_spill]] }
 0x1b0   :  { %3954 = vmatprep.mubr.msk.f32.mxu0 %vm347_vm0, %v333_v5  ;;  %3998 = vmatprep.subr.bf16.mxu0 %v3997_v3  ;;  %v432_v8 = vld [vmem:[#allocation8 + $0x8] sm:$0xff]  ;;  %v431_v10 = vld [vmem:[#allocation8] sm:$0xff]  ;;  %v438_v13 = vld [vmem:[#allocation8 + $0x38] sm:$0xff]  ;;  %vm2284_vm5 = vcmask 1041409  }
 0x1b1   :  { %4000 = vmatpush3.bf16.msra.mxu0 %v3997_v3  ;;  %v436_v12 = vld [vmem:[#allocation8 + $0x28] sm:$0xff]  ;;  %v4005_v14 = vpack.c.bf16 %v434_v9, %v432_v8  ;;  %v4007_v16 = vpack.c.bf16 %v433_v11, %v431_v10  ;;  %v435_v18 = vld [vmem:[#allocation8 + $0x20] sm:$0xff]  ;;  %v437_v19 = vld [vmem:[#allocation8 + $0x30] sm:$0xff] }
 0x1b2   :  { %4002 = vmatprep.subr.bf16.mxu0 %v4001_v6  ;;  %v334_v15 = vld [vmem:[#allocation2 + $0x8] sm:$0xff]  ;;  %v4009_v17 = vpack.c.bf16 %v438_v13, %v436_v12  ;;  %v442_v21 = vld [vmem:[#allocation8 + $0x58] sm:$0xff]  ;;  %v4011_v22 = vpack.c.bf16 %v437_v19, %v435_v18  ;;  %v439_v24 = vld [vmem:[#allocation8 + $0x40] sm:$0xff] }
 0x1b3   :  { %v440_v20 = vld [vmem:[#allocation8 + $0x48] sm:$0xff]  ;;  %v441_v25 = vld [vmem:[#allocation8 + $0x50] sm:$0xff]  ;;  %v446_v27 = vld [vmem:[#allocation8 + $0x78] sm:$0xff] }
 0x1b4   :  { %v4013_v23 = vpack.c.bf16 %v442_v21, %v440_v20  ;;  %v444_v26 = vld [vmem:[#allocation8 + $0x68] sm:$0xff]  ;;  %v4015_v28 = vpack.c.bf16 %v441_v25, %v439_v24  ;;  %v443_v30 = vld [vmem:[#allocation8 + $0x60] sm:$0xff]  ;;  %v445_v31 = vld [vmem:[#allocation8 + $0x70] sm:$0xff] }
 0x1b5   :  { %4004 = vmatpush3.bf16.msra.mxu0 %v4001_v6  ;;  %v4017_v29 = vpack.c.bf16 %v446_v27, %v444_v26  ;;  %v4019_v32 = vpack.c.bf16 %v445_v31, %v443_v30  ;;  %v448_v33 = vld [vmem:[#allocation8 + $0x88] sm:$0xff]  ;;  %v450_v34 = vld [vmem:[#allocation8 + $0x98] sm:$0xff]  ;;  %v447_v36 = vld [vmem:[#allocation8 + $0x80] sm:$0xff] }
 0x1b6   :  { %3952 = vmatprep.subr.mxu0 %v339_v7  ;;  %v4021_v35 = vpack.c.bf16 %v450_v34, %v448_v33  ;;  %v449_v37 = vld [vmem:[#allocation8 + $0x90] sm:$0xff]  ;;  %v554_v41 = vld [vmem:[#allocation11 + $0x38] sm:$0xff]  ;;  %v555_v47 = vld [vmem:[#allocation11 + $0x40] sm:$0xff] }
 0x1b7   :  { %v4023_v38 = vpack.c.bf16 %v449_v37, %v447_v36  ;;  %v548_v40 = vld [vmem:[#allocation11 + $0x8] sm:$0xff]  ;;  %v550_v43 = vld [vmem:[#allocation11 + $0x18] sm:$0xff]  ;;  %v549_v46 = vld [vmem:[#allocation11 + $0x10] sm:$0xff] }
 0x1b8   :  { %v4025_v42 = vpack.c.bf16 %v554_v41, %v548_v40  ;;  %v556_v44 = vld [vmem:[#allocation11 + $0x48] sm:$0xff]  ;;  %v4067_v48 = vpack.c.bf16 %v555_v47, %v549_v46  ;;  %v562_v49 = vld [vmem:[#allocation11 + $0x78] sm:$0xff]  ;;  %v561_v51 = vld [vmem:[#allocation11 + $0x70] sm:$0xff] }
 0x1b9   :  { %3953 = vmatpush3.msra.mxu0 %v339_v7  ;;  %v4065_v45 = vpack.c.bf16 %v556_v44, %v550_v43  ;;  %v568_v50 = vld [vmem:[#allocation11 + $0xa8] sm:$0xff]  ;;  %v567_v53 = vld [vmem:[#allocation11 + $0xa0] sm:$0xff]  ;;  %v574_v55 = vld [vmem:[#allocation11 + $0xd8] sm:$0xff] }
 0x1ba   :  { %3955 = vmatmul.mubr.msk.f32.vlgmr.msra.gmra.mrb[0].mxu0 %vm347_vm0, %v334_v15  ;;  %4006 = vmatprep.subr.bf16.mxu0 %v4005_v14  ;;  %v4069_v52 = vpack.c.bf16 %v568_v50, %v562_v49  ;;  %v4071_v54 = vpack.c.bf16 %v567_v53, %v561_v51  ;;  %v580_v56 = vld [vmem:[#allocation11 + $0x108] sm:$0xff]  ;;  %v573_v57 = vld [vmem:[#allocation11 + $0xd0] sm:$0xff]  ;;  %v579_v58 = vld [vmem:[#allocation11 + $0x100] sm:$0xff] }
 0x1bb   :  { %4008 = vmatpush1.bf16.msra.mxu0 %v4007_v16  ;;  %534 = vmatprep.mubr.f32.mxu0 %v5583_v39  ;;  %v4073_v59 = vpack.c.bf16 %v580_v56, %v574_v55  ;;  %v4075_v60 = vpack.c.bf16 %v579_v58, %v573_v57  ;;  %v586_v61 = vld [vmem:[#allocation11 + $0x138] sm:$0xff]  ;;  %v592_v62 = vld [vmem:[#allocation11 + $0x168] sm:$0xff]  ;;  %v585_v0 = vld [vmem:[#allocation11 + $0x130] sm:$0xff] }
 0x1bc   :  { %4010 = vmatprep.subr.bf16.mxu0 %v4009_v17  ;;  %4066 = vmatprep.subr.bf16.mxu1 %v4065_v45  ;;  %v4077_v63 = vpack.c.bf16 %v592_v62, %v586_v61  ;;  %v591_v1 = vld [vmem:[#allocation11 + $0x160] sm:$0xff]  ;;  %v598_v3 = vld [vmem:[#allocation11 + $0x198] sm:$0xff]  ;;  %v604_v4 = vld [vmem:[#allocation11 + $0x1c8] sm:$0xff] }
 0x1bd   :  { %4068 = vmatpush1.bf16.msra.mxu1 %v4067_v48  ;;  %v4079_v2 = vpack.c.bf16 %v591_v1, %v585_v0  ;;  %v4081_v5 = vpack.c.bf16 %v604_v4, %v598_v3  ;;  %v597_v6 = vld [vmem:[#allocation11 + $0x190] sm:$0xff]  ;;  %v603_v7 = vld [vmem:[#allocation11 + $0x1c0] sm:$0xff]  ;;  %v610_v9 = vld [vmem:[#allocation11 + $0x1f8] sm:$0xff] }
 0x1be   :  { %4070 = vmatprep.subr.bf16.mxu1 %v4069_v52  ;;  %v4083_v8 = vpack.c.bf16 %v603_v7, %v597_v6  ;;  %v616_v10 = vld [vmem:[#allocation11 + $0x228] sm:$0xff]  ;;  %v609_v12 = vld [vmem:[#allocation11 + $0x1f0] sm:$0xff]  ;;  %v615_v13 = vld [vmem:[#allocation11 + $0x220] sm:$0xff] }
 0x1bf   :  { %4012 = vmatpush1.bf16.msra.mxu0 %v4011_v22  ;;  %v4085_v11 = vpack.c.bf16 %v616_v10, %v610_v9  ;;  %v4087_v14 = vpack.c.bf16 %v615_v13, %v609_v12  ;;  %v622_v15 = vld [vmem:[#allocation11 + $0x258] sm:$0xff]  ;;  %v628_v16 = vld [vmem:[#allocation11 + $0x288] sm:$0xff]  ;;  %v621_v18 = vld [vmem:[#allocation11 + $0x250] sm:$0xff] }
 0x1c0   :  { %4014 = vmatprep.subr.bf16.mxu0 %v4013_v23  ;;  %v4089_v17 = vpack.c.bf16 %v628_v16, %v622_v15  ;;  %v627_v19 = vld [vmem:[#allocation11 + $0x280] sm:$0xff]  ;;  %v634_v21 = vld [vmem:[#allocation11 + $0x2b8] sm:$0xff]  ;;  %v640_v22 = vld [vmem:[#allocation11 + $0x2e8] sm:$0xff] }
 0x1c1   :  { %4072 = vmatpush1.bf16.msra.mxu1 %v4071_v54  ;;  %v4091_v20 = vpack.c.bf16 %v627_v19, %v621_v18  ;;  %v4093_v23 = vpack.c.bf16 %v640_v22, %v634_v21  ;;  %v633_v24 = vld [vmem:[#allocation11 + $0x2b0] sm:$0xff]  ;;  %v639_v25 = vld [vmem:[#allocation11 + $0x2e0] sm:$0xff]  ;;  %v646_v27 = vld [vmem:[#allocation11 + $0x318] sm:$0xff] }
 0x1c2   :  { %4074 = vmatprep.subr.bf16.mxu1 %v4073_v59  ;;  %v4095_v26 = vpack.c.bf16 %v639_v25, %v633_v24  ;;  %v645_v30 = vld [vmem:[#allocation11 + $0x310] sm:$0xff]  ;;  %v651_v31 = vld [vmem:[#allocation11 + $0x340] sm:$0xff]  ;;  %v3831_v33 = vld [vmem:[#allocation7] ss:$0 sm:$0xff] }
 0x1c3   :  { %4016 = vmatpush1.bf16.msra.mxu0 %v4015_v28  ;;  %v652_v28 = vld [vmem:[#allocation11 + $0x348] sm:$0xff]  ;;  %v553_v36 = vld [vmem:[#allocation11 + $0x30] sm:$0xff]  ;;  %v566_v40 = vld [vmem:[#allocation11 + $0x98] sm:$0xff] }
 0x1c4   :  { %4018 = vmatprep.subr.bf16.mxu0 %v4017_v29  ;;  %v4097_v29 = vpack.c.bf16 %v652_v28, %v646_v27  ;;  %v559_v46 = vld [vmem:[#allocation11 + $0x60] sm:$0xff]  ;;  %v565_v47 = vld [vmem:[#allocation11 + $0x90] sm:$0xff]  ;;  %v572_v48 = vld [vmem:[#allocation11 + $0xc8] sm:$0xff] }
 0x1c5   :  { %4076 = vmatpush1.bf16.msra.mxu1 %v4075_v60  ;;  %v578_v49 = vld [vmem:[#allocation11 + $0xf8] sm:$0xff]  ;;  %v4031_v50 = vpack.c.bf16 %v565_v47, %v559_v46  ;;  %v571_v53 = vld [vmem:[#allocation11 + $0xc0] sm:$0xff]  ;;  %v577_v54 = vld [vmem:[#allocation11 + $0xf0] sm:$0xff] }
 0x1c6   :  { %4078 = vmatprep.subr.bf16.mxu1 %v4077_v63  ;;  %v4033_v52 = vpack.c.bf16 %v578_v49, %v572_v48  ;;  %v584_v55 = vld [vmem:[#allocation11 + $0x128] sm:$0xff]  ;;  %v590_v56 = vld [vmem:[#allocation11 + $0x158] sm:$0xff]  ;;  %v4035_v57 = vpack.c.bf16 %v577_v54, %v571_v53  ;;  %v583_v59 = vld [vmem:[#allocation11 + $0x120] sm:$0xff] }
 0x1c7   :  { %4020 = vmatpush1.bf16.msra.mxu0 %v4019_v32  ;;  %v4099_v32 = vpack.c.bf16 %v651_v31, %v645_v30  ;;  %v4037_v58 = vpack.c.bf16 %v590_v56, %v584_v55  ;;  %v589_v60 = vld [vmem:[#allocation11 + $0x150] sm:$0xff]  ;;  %v596_v61 = vld [vmem:[#allocation11 + $0x188] sm:$0xff]  ;;  %v602_v62 = vld [vmem:[#allocation11 + $0x1b8] sm:$0xff] }
 0x1c8   :  { %4022 = vmatprep.subr.bf16.mxu0 %v4021_v35  ;;  %v547_v35 = vld [vmem:[#allocation11] sm:$0xff]  ;;  %v4039_v63 = vpack.c.bf16 %v589_v60, %v583_v59  ;;  %v4041_v0 = vpack.c.bf16 %v602_v62, %v596_v61  ;;  %v608_v3 = vld [vmem:[#allocation11 + $0x1e8] sm:$0xff]  ;;  %v614_v4 = vld [vmem:[#allocation11 + $0x218] sm:$0xff] }
 0x1c9   :  { %4080 = vmatpush1.bf16.msra.mxu1 %v4079_v2  ;;  %v595_v1 = vld [vmem:[#allocation11 + $0x180] sm:$0xff]  ;;  %v601_v2 = vld [vmem:[#allocation11 + $0x1b0] sm:$0xff]  ;;  %v4045_v6 = vpack.c.bf16 %v614_v4, %v608_v3  ;;  %v620_v9 = vld [vmem:[#allocation11 + $0x248] sm:$0xff] }
 0x1ca   :  { %4082 = vmatprep.subr.bf16.mxu1 %v4081_v5  ;;  %v4043_v5 = vpack.c.bf16 %v601_v2, %v595_v1  ;;  %v607_v7 = vld [vmem:[#allocation11 + $0x1e0] sm:$0xff]  ;;  %v626_v10 = vld [vmem:[#allocation11 + $0x278] sm:$0xff]  ;;  %v632_v15 = vld [vmem:[#allocation11 + $0x2a8] sm:$0xff] }
 0x1cb   :  { %4024 = vmatpush1.bf16.msra.mxu0 %v4023_v38  ;;  %v560_v38 = vld [vmem:[#allocation11 + $0x68] sm:$0xff]  ;;  %v4049_v12 = vpack.c.bf16 %v626_v10, %v620_v9  ;;  %v619_v13 = vld [vmem:[#allocation11 + $0x240] sm:$0xff]  ;;  %v638_v16 = vld [vmem:[#allocation11 + $0x2d8] sm:$0xff] }
 0x1cc   :  { %4026 = vmatprep.subr.bf16.mxu0 %v4025_v42  ;;  %v4027_v42 = vpack.c.bf16 %v553_v36, %v547_v35  ;;  %v4029_v45 = vpack.c.bf16 %v566_v40, %v560_v38  ;;  %v4053_v18 = vpack.c.bf16 %v638_v16, %v632_v15  ;;  %v631_v19 = vld [vmem:[#allocation11 + $0x2a0] sm:$0xff]  ;;  %v644_v21 = vld [vmem:[#allocation11 + $0x308] sm:$0xff]  ;;  %v650_v22 = vld [vmem:[#allocation11 + $0x338] sm:$0xff] }
 0x1cd   :  { %4084 = vmatpush1.bf16.msra.mxu1 %v4083_v8  ;;  %v613_v8 = vld [vmem:[#allocation11 + $0x210] sm:$0xff]  ;;  %v4057_v24 = vpack.c.bf16 %v650_v22, %v644_v21  ;;  %v643_v25 = vld [vmem:[#allocation11 + $0x300] sm:$0xff]  ;;  %v656_v28 = vld [vmem:[#allocation11 + $0x368] sm:$0xff] }
 0x1ce   :  { %4086 = vmatprep.subr.bf16.mxu1 %v4085_v11  ;;  %v4047_v11 = vpack.c.bf16 %v613_v8, %v607_v7  ;;  %v655_v31 = vld [vmem:[#allocation11 + $0x360] sm:$0xff]  ;;  %v664_v35 = vld [vmem:[#allocation11 + $0x3a8] sm:$0xff]  ;;  %v657_v36 = vld [vmem:[#allocation11 + $0x370] sm:$0xff] }
 0x1cf   :  { %v451_v47 = vld [vmem:[#allocation10] sm:$0x3]  ;;  %v564_v54 = vld [vmem:[#allocation11 + $0x88] sm:$0xff]  ;;  %v563_v61 = vld [vmem:[#allocation11 + $0x80] sm:$0xff] }
 0x1d0   :  { %v570_v55 = vld [vmem:[#allocation11 + $0xb8] sm:$0xff]  ;;  %v569_v62 = vld [vmem:[#allocation11 + $0xb0] sm:$0xff]  ;;  %v575_v7 = vld [vmem:[#allocation11 + $0xe0] sm:$0xff] }
 0x1d1   :  { %4088 = vmatpush1.bf16.msra.mxu1 %v4087_v14  ;;  %v625_v14 = vld [vmem:[#allocation11 + $0x270] sm:$0xff]  ;;  %v4109_v60 = vpack.c.bf16 %v570_v55, %v564_v54  ;;  %v582_v1 = vld [vmem:[#allocation11 + $0x118] sm:$0xff]  ;;  %v4111_v4 = vpack.c.bf16 %v569_v62, %v563_v61  ;;  %v588_v9 = vld [vmem:[#allocation11 + $0x148] sm:$0xff] }
 0x1d2   :  { %4090 = vmatprep.subr.bf16.mxu1 %v4089_v17  ;;  %v4051_v17 = vpack.c.bf16 %v625_v14, %v619_v13  ;;  %v581_v8 = vld [vmem:[#allocation11 + $0x110] sm:$0xff]  ;;  %v594_v10 = vld [vmem:[#allocation11 + $0x178] sm:$0xff]  ;;  %v587_v13 = vld [vmem:[#allocation11 + $0x140] sm:$0xff] }
 0x1d3   :  { %v593_v14 = vld [vmem:[#allocation11 + $0x170] sm:$0xff]  ;;  %v600_v15 = vld [vmem:[#allocation11 + $0x1a8] sm:$0xff]  ;;  %v606_v16 = vld [vmem:[#allocation11 + $0x1d8] sm:$0xff] }
 0x1d4   :  { %v612_v21 = vld [vmem:[#allocation11 + $0x208] sm:$0xff]  ;;  %v618_v22 = vld [vmem:[#allocation11 + $0x238] sm:$0xff]  ;;  %v665_v54 = vld [vmem:[#allocation11 + $0x3b0] sm:$0xff] }
 0x1d5   :  { %4092 = vmatpush1.bf16.msra.mxu1 %v4091_v20  ;;  %v637_v20 = vld [vmem:[#allocation11 + $0x2d0] sm:$0xff] }
 0x1d6   :  { %4094 = vmatprep.subr.bf16.mxu1 %v4093_v23  ;;  %v4055_v23 = vpack.c.bf16 %v637_v20, %v631_v19  ;;  %v599_v19 = vld [vmem:[#allocation11 + $0x1a0] sm:$0xff]  ;;  %v605_v20 = vld [vmem:[#allocation11 + $0x1d0] sm:$0xff] }
 0x1d9   :  { %4096 = vmatpush1.bf16.msra.mxu1 %v4095_v26  ;;  %v649_v26 = vld [vmem:[#allocation11 + $0x330] sm:$0xff] }
 0x1da   :  { %4098 = vmatprep.subr.bf16.mxu1 %v4097_v29  ;;  %v4059_v27 = vpack.c.bf16 %v649_v26, %v643_v25  ;;  %v662_v29 = vld [vmem:[#allocation11 + $0x398] sm:$0xff]  ;;  %v611_v25 = vld [vmem:[#allocation11 + $0x200] sm:$0xff]  ;;  %v617_v26 = vld [vmem:[#allocation11 + $0x230] sm:$0xff] }
 0x1db   :  { %v4061_v30 = vpack.c.bf16 %v662_v29, %v656_v28  ;;  %v630_v28 = vld [vmem:[#allocation11 + $0x298] sm:$0xff]  ;;  %v4127_v29 = vpack.c.bf16 %v617_v26, %v611_v25 }
 0x1dd   :  { %4100 = vmatpush1.bf16.msra.mxu1 %v4099_v32  ;;  %v661_v32 = vld [vmem:[#allocation11 + $0x390] sm:$0xff] }
 0x28d   :  { %v3956_v34 = vpop.f32.mrb[0].mxu0 }
 0x28e   :  { %v420_v37 = vpop.f32.mrb[1].mxu0  ;;  %v426_v43 = vadd.f32 %v3956_v34, %v3831_v33  ;;  %v4063_v34 = vpack.c.bf16 %v661_v32, %v655_v31  ;;  %v623_v31 = vld [vmem:[#allocation11 + $0x260] sm:$0xff]  ;;  %v629_v32 = vld [vmem:[#allocation11 + $0x290] sm:$0xff] }
 0x28f   :  { %v421_v41 = vadd.f32 %v3831_v33, %v420_v37  ;;  %v658_v33 = vld [vmem:[#allocation11 + $0x378] sm:$0xff]  ;;  %v663_v37 = vld [vmem:[#allocation11 + $0x3a0] sm:$0xff] }
 0x290   :  { %v430_v51 = vmax.f32 %v426_v43, 0.0  ;;  %v4101_v38 = vpack.c.bf16 %v664_v35, %v658_v33  ;;  %v4103_v40 = vpack.c.bf16 %v663_v37, %v657_v36  ;;  %v636_v33 = vld [vmem:[#allocation11 + $0x2c8] sm:$0xff]  ;;  %v4131_v35 = vpack.c.bf16 %v629_v32, %v623_v31  ;;  %v635_v37 = vld [vmem:[#allocation11 + $0x2c0] sm:$0xff] }
 0x291   :  { %v429_v44 = vmax.f32 %v421_v41, 0.0  ;;  %v552_v41 = vld [vmem:[#allocation11 + $0x28] sm:$0xff] }
 0x292   :  { %4102 = vmatprep.subr.bf16.mxu1 %v4101_v38  ;;  %v641_v38 = vld [vmem:[#allocation11 + $0x2f0] sm:$0xff] }
 0x293   :  { %3834 = vmatmul.mubr.msk.f32.vlgmr.msra.gmra.mrb[2].mxu0 %vm463_vm1, %v429_v44  ;;  %4104 = vmatpush1.bf16.msra.mxu1 %v4103_v40  ;;  %v453_v44 = vlaneseq  ;;  %v648_v40 = vld [vmem:[#allocation11 + $0x328] sm:$0xff] }
 0x294   :  { %540 = vmatprep.mubr.f32.mxu0 %v5583_v39  ;;  %4028 = vmatpush1.bf16.msra.mxu0 %v4027_v42  ;;  %v558_v42 = vld [vmem:[#allocation11 + $0x58] sm:$0xff] }
 0x295   :  { %4030 = vmatprep.subr.bf16.mxu0 %v4029_v45  ;;  %v4105_v43 = vpack.c.bf16 %v558_v42, %v552_v41  ;;  %3957 = vmatprep.subr.mxu1 %v5583_v39  ;;  %v5992_v45 = vshrl.u32 %v453_v44, 7  ;;  %v654_v41 = vld [vmem:[#allocation11 + $0x358] sm:$0xff]  ;;  %v4135_v42 = vpack.c.bf16 %v641_v38, %v635_v37  ;;  %v647_v44 = vld [vmem:[#allocation11 + $0x320] sm:$0xff] }
 0x297   :  { %3835 = vmatmul.mubr.msk.f32.gmra.mrb[4].mxu0 %vm463_vm1, %v430_v51  ;;  %v5995_v46 = vsub.s32 1, %v5992_v45  ;;  %v5998_v48 = vsub.s32 0, %v5992_v45  ;;  %v551_v51 = vld [vmem:[#allocation11 + $0x20] sm:$0xff] }
 0x298   :  { %4032 = vmatpush1.bf16.msra.mxu0 %v4031_v50 }
 0x299   :  { %4034 = vmatprep.subr.bf16.mxu0 %v4033_v52  ;;  %v460_v49 = vrot.slane %v451_v47, %v5995_v46  ;;  %v456_v50 = vrot.slane %v451_v47, %v5998_v48  ;;  %v557_v52 = vld [vmem:[#allocation11 + $0x50] sm:$0xff] }
 0x29a   :  { %v653_v47 = vld [vmem:[#allocation11 + $0x350] sm:$0xff] }
 0x29c   :  { %4036 = vmatpush1.bf16.msra.mxu0 %v4035_v57 }
 0x29d   :  { %4038 = vmatprep.subr.bf16.mxu0 %v4037_v58  ;;  %v4107_v58 = vpack.c.bf16 %v557_v52, %v551_v51  ;;  %v4139_v51 = vpack.c.bf16 %v653_v47, %v647_v44 }
 0x2a0   :  { %4040 = vmatpush1.bf16.msra.mxu0 %v4039_v63 }
 0x2a1   :  { %4042 = vmatprep.subr.bf16.mxu0 %v4041_v0  ;;  %v576_v0 = vld [vmem:[#allocation11 + $0xe8] sm:$0xff] }
 0x2a4   :  { %4044 = vmatpush1.bf16.msra.mxu0 %v4043_v5 }
 0x2a5   :  { %4046 = vmatprep.subr.bf16.mxu0 %v4045_v6  ;;  %v4113_v6 = vpack.c.bf16 %v582_v1, %v576_v0 }
 0x2a8   :  { %4048 = vmatpush1.bf16.msra.mxu0 %v4047_v11  ;;  %v4115_v11 = vpack.c.bf16 %v581_v8, %v575_v7 }
 0x2a9   :  { %4050 = vmatprep.subr.bf16.mxu0 %v4049_v12  ;;  %v4117_v12 = vpack.c.bf16 %v594_v10, %v588_v9 }
 0x2ac   :  { %4052 = vmatpush1.bf16.msra.mxu0 %v4051_v17  ;;  %v4119_v17 = vpack.c.bf16 %v593_v14, %v587_v13 }
 0x2ad   :  { %4054 = vmatprep.subr.bf16.mxu0 %v4053_v18  ;;  %v4121_v18 = vpack.c.bf16 %v606_v16, %v600_v15  ;;  %v691_v15 = vsub.s32 5, %v5992_v45 }
 0x2b0   :  { %4056 = vmatpush1.bf16.msra.mxu0 %v4055_v23  ;;  %v4123_v23 = vpack.c.bf16 %v605_v20, %v599_v19 }
 0x2b1   :  { %4058 = vmatprep.subr.bf16.mxu0 %v4057_v24  ;;  %v4125_v24 = vpack.c.bf16 %v618_v22, %v612_v21 }
 0x2b4   :  { %4060 = vmatpush1.bf16.msra.mxu0 %v4059_v27  ;;  %v624_v27 = vld [vmem:[#allocation11 + $0x268] sm:$0xff] }
 0x2b5   :  { %4062 = vmatprep.subr.bf16.mxu0 %v4061_v30  ;;  %v4129_v30 = vpack.c.bf16 %v630_v28, %v624_v27 }
 0x2b8   :  { %4064 = vmatpush1.bf16.msra.mxu0 %v4063_v34  ;;  %v642_v34 = vld [vmem:[#allocation11 + $0x2f8] sm:$0xff] }
 0x2b9   :  { %4106 = vmatprep.subr.bf16.mxu0 %v4105_v43  ;;  %v4133_v36 = vpack.c.bf16 %v642_v34, %v636_v33  ;;  %v4137_v43 = vpack.c.bf16 %v654_v41, %v648_v40 }
 0x366   :  { %v536_v53 = vpop.f32.mrb[2].mxu0 }
 0x367   :  { %v538_v56 = vpop.f32.mrb[3].mxu0  ;;  %v6004_v59 = vadd.f32 %v536_v53, %v456_v50  ;;  %v659_v53 = vld [vmem:[#allocation11 + $0x380] sm:$0xff] }
 0x368   :  { %v6002_v57 = vadd.f32 %v538_v56, %v460_v49  ;;  %v4143_v55 = vpack.c.bf16 %v665_v54, %v659_v53  ;;  %v6031_v56 = vsub.s32 2, %v5992_v45 }
 0x36a   :  { %v542_v63 = vpop.f32.mrb[4].mxu0  ;;  %3836 = vmatprep.mubr.msk.f32.mxu0 %vm699_vm2, %v6002_v57  ;;  %3838 = vmatprep.mubr.msk.f32.mxu1 %vm699_vm2, %v6002_v57 }
 0x36b   :  { %v544_v2 = vpop.f32.mrb[5].mxu0  ;;  %771 = vmatmul.mubr.f32.vlgmr.msra.gmra.mrb[6].mxu0 %v6004_v59  ;;  %848 = vmatmul.mubr.f32.vlgmr.msra.gmra.mrb[0].mxu1 %v6004_v59  ;;  %v6014_v5 = vadd.f32 %v542_v63, %v456_v50  ;;  %v666_v50 = vld [vmem:[#allocation11 + $0x3b8] sm:$0xff] }
 0x36c   :  { %v6012_v3 = vadd.f32 %v544_v2, %v460_v49  ;;  %4108 = vmatpush1.bf16.msra.mxu0 %v4107_v58  ;;  %v660_v49 = vld [vmem:[#allocation11 + $0x388] sm:$0xff]  ;;  %v6033_v58 = vld [vmem:[#allocation13] sm:$0x3f] }
 0x36d   :  { %4110 = vmatprep.subr.bf16.mxu0 %v4109_v60  ;;  %v4141_v52 = vpack.c.bf16 %v666_v50, %v660_v49  ;;  %v680_v60 = vrot.slane %v6033_v58, %v6031_v56  ;;  %v672_v61 = vrot.slane %v6033_v58, %v5998_v48 }
 0x36e   :  { %3837 = vmatprep.mubr.msk.f32.mxu0 %vm699_vm2, %v6012_v3  ;;  %3839 = vmatprep.mubr.msk.f32.mxu1 %vm699_vm2, %v6012_v3 }
 0x36f   :  { %777 = vmatmul.mubr.f32.gmra.mrb[8].mxu0 %v6014_v5  ;;  %854 = vmatmul.mubr.f32.gmra.mrb[2].mxu1 %v6014_v5 }
 0x370   :  { %4112 = vmatpush1.bf16.msra.mxu0 %v4111_v4  ;;  %3840 = vmatprep.mubr.msk.f32.mxu0 %vm699_vm2, %v6002_v57 }
 0x371   :  { %4114 = vmatprep.subr.bf16.mxu0 %v4113_v6  ;;  %3959 = vmatprep.mubr.msk.f32.mxu1 %vm5584_vm3, %v5583_v39 }
 0x374   :  { %4116 = vmatpush1.bf16.msra.mxu0 %v4115_v11 }
 0x375   :  { %4118 = vmatprep.subr.bf16.mxu0 %v4117_v12  ;;  %v687_v12 = vsub.s32 4, %v5992_v45 }
 0x377   :  { %v688_v13 = vrot.slane %v6033_v58, %v687_v12 }
 0x378   :  { %4120 = vmatpush1.bf16.msra.mxu0 %v4119_v17 }
 0x379   :  { %4122 = vmatprep.subr.bf16.mxu0 %v4121_v18  ;;  %v692_v18 = vrot.slane %v6033_v58, %v691_v15 }
 0x37c   :  { %4124 = vmatpush1.bf16.msra.mxu0 %v4123_v23 }
 0x37d   :  { %4126 = vmatprep.subr.bf16.mxu0 %v4125_v24 }
 0x380   :  { %4128 = vmatpush1.bf16.msra.mxu0 %v4127_v29 }
 0x381   :  { %4130 = vmatprep.subr.bf16.mxu0 %v4129_v30 }
 0x384   :  { %4132 = vmatpush1.bf16.msra.mxu0 %v4131_v35 }
 0x385   :  { %4134 = vmatprep.subr.bf16.mxu0 %v4133_v36 }
 0x388   :  { %4136 = vmatpush1.bf16.msra.mxu0 %v4135_v42 }
 0x389   :  { %4138 = vmatprep.subr.bf16.mxu0 %v4137_v43  ;;  %v6067_v43 = vsub.s32 3, %v5992_v45 }
 0x38b   :  { %v684_v49 = vrot.slane %v6033_v58, %v6067_v43 }
 0x38c   :  { %4140 = vmatpush1.bf16.msra.mxu0 %v4139_v51  ;;  %v676_v51 = vrot.slane %v6033_v58, %v5995_v46 }
 0x38d   :  { %4142 = vmatprep.subr.bf16.mxu0 %v4141_v52 }
 0x390   :  { %4144 = vmatpush1.bf16.msra.mxu0 %v4143_v55 }
 0x393   :  { %925 = vmatmul.mubr.f32.vlgmr.msra.gmra.mrb[10].mxu0 %v6004_v59 }
 0x394   :  { %3841 = vmatprep.mubr.msk.f32.mxu0 %vm699_vm2, %v6012_v3 }
 0x397   :  { %931 = vmatmul.mubr.f32.gmra.mrb[12].mxu0 %v6014_v5 }
 0x43e   :  { %v772_v62 = vpop.f32.mrb[6].mxu0  ;;  %v849_v63 = vpop.f32.mrb[0].mxu1 }
 0x43f   :  { %v850_v0 = vadd.f32 %v849_v63, %v680_v60  ;;  %v6039_v1 = vpop.f32.mrb[7].mxu0  ;;  %v6041_v2 = vpop.f32.mrb[1].mxu1  ;;  %v773_v4 = vadd.f32 %v772_v62, %v672_v61 }
 0x440   :  { %v852_v52 = vadd.f32 %v6041_v2, %v684_v49  ;;  %v775_v53 = vadd.f32 %v6039_v1, %v676_v51 }
 0x441   :  { %3958 = vmatpush3.xpose.msra.mxu1 %v850_v0 }
 0x442   :  { %v778_v6 = vpop.f32.mrb[8].mxu0  ;;  %v855_v7 = vpop.f32.mrb[2].mxu1  ;;  %3962 = vmatprep.subr.mxu1 %v5583_v39 }
 0x443   :  { %v856_v8 = vadd.f32 %v855_v7, %v680_v60  ;;  %v6044_v9 = vpop.f32.mrb[9].mxu0  ;;  %v6046_v10 = vpop.f32.mrb[3].mxu1  ;;  %v779_v11 = vadd.f32 %v778_v6, %v672_v61 }
 0x444   :  { %3960 = vmatmul.mubr.f32.vlgmr.msra.gmra.mrb[4].mxu1 %v773_v4  ;;  %v858_v54 = vadd.f32 %v6046_v10, %v684_v49  ;;  %v781_v55 = vadd.f32 %v6044_v9, %v676_v51  ;;  %v1573_v49 = vld [vmem:[%s6722_s27 + $0x98] sm:$0xff] }
 0x445   :  { %3963 = vmatpush3.xpose.msra.mxu1 %v856_v8  ;;  %3964 = vmatprep.mubr.msk.f32.mxu1 %vm5584_vm3, %v5583_v39 }
 0x446   :  { %3967 = vmatprep.subr.mxu1 %v5583_v39 }
 0x448   :  { %3965 = vmatmul.mubr.f32.vlgmr.msra.gmra.mrb[6].mxu1 %v779_v11 }
 0x449   :  { %3969 = vmatprep.mubr.msk.f32.mxu1 %vm5584_vm3, %v5583_v39 }
 0x466   :  { %v926_v14 = vpop.f32.mrb[10].mxu0 }
 0x467   :  { %v927_v16 = vadd.f32 %v926_v14, %v688_v13  ;;  %v928_v17 = vpop.f32.mrb[11].mxu0 }
 0x468   :  { %v929_v58 = vadd.f32 %v928_v17, %v692_v18 }
 0x469   :  { %3968 = vmatpush3.msra.mxu1 %v927_v16 }
 0x46a   :  { %v932_v19 = vpop.f32.mrb[12].mxu0  ;;  %3972 = vmatprep.subr.mxu1 %v5583_v39 }
 0x46b   :  { %v933_v20 = vadd.f32 %v932_v19, %v688_v13  ;;  %v934_v21 = vpop.f32.mrb[13].mxu0  ;;  %v1555_v19 = vld [vmem:[%s6722_s27 + $0x8] sm:$0xff] }
 0x46c   :  { %v6060_v22 = vadd.f32 %v934_v21, %v692_v18  ;;  %v1554_v21 = vld [vmem:[%s6722_s27] sm:$0xff] }
 0x517   :  { %v1003_v23 = vpop.f32.mrb[4].mxu1 }
 0x518   :  { %v3961_v24 = vpop.f32.mrb[5].mxu1  ;;  %v1078_v25 = vsel %vm1077_vm4, %v1003_v23, -inf }
 0x519   :  { %1079 = vmax.xlane.f32.xlu0 %v1078_v25  ;;  %v1556_v24 = vld [vmem:[%s6722_s27 + $0x10] sm:$0xff]  ;;  %v1559_v25 = vld [vmem:[%s6722_s27 + $0x28] sm:$0xff] }
 0x51b   :  { %v1073_v26 = vpop.f32.mrb[6].mxu1 }
 0x51c   :  { %v3966_v27 = vpop.f32.mrb[7].mxu1  ;;  %v1081_v28 = vsel %vm1077_vm4, %v1073_v26, -inf }
 0x51d   :  { %1082 = vmax.xlane.f32.xlu0 %v1081_v28  ;;  %v4147_v27 = vpack.c.bf16 %v1556_v24, %v1554_v21  ;;  %v1588_v24 = vld [vmem:[%s6722_s27 + $0x110] sm:$0xff] }
 0x5a6   :  { %v1080_v29 = vpop.xlane.xlu0 %1079 }
 0x5a7   :  { %v1084_v30 = vsub.f32 %v1003_v23, %v1080_v29  ;;  %v1558_v29 = vld [vmem:[%s6722_s27 + $0x20] sm:$0xff] }
 0x5a9   :  { %v1086_v31 = vmul.f32 1.442695, %v1084_v30  ;;  %v1560_v30 = vld [vmem:[%s6722_s27 + $0x30] sm:$0xff] }
 0x5aa   :  { %v1083_v32 = vpop.xlane.xlu0 %1082 }
 0x5ab   :  { %5020 = vpow2.f32 %v1086_v31  ;;  %v1085_v33 = vsub.f32 %v1073_v26, %v1083_v32  ;;  %v1561_v26 = vld [vmem:[%s6722_s27 + $0x38] sm:$0xff]  ;;  %v1563_v31 = vld [vmem:[%s6722_s27 + $0x48] sm:$0xff] }
 0x5ac   :  { %v4149_v28 = vpack.c.bf16 %v1561_v26, %v1559_v25  ;;  %v1565_v32 = vld [vmem:[%s6722_s27 + $0x58] sm:$0xff]  ;;  %v1591_v25 = vld [vmem:[%s6722_s27 + $0x128] sm:$0xff] }
 0x5ad   :  { %v1088_v34 = vmul.f32 1.442695, %v1085_v33  ;;  %v4151_v33 = vpack.c.bf16 %v1560_v30, %v1558_v29  ;;  %v1593_v26 = vld [vmem:[%s6722_s27 + $0x138] sm:$0xff]  ;;  %v1590_v29 = vld [vmem:[%s6722_s27 + $0x120] sm:$0xff]  ;;  %v1592_v30 = vld [vmem:[%s6722_s27 + $0x130] sm:$0xff] }
 0x5af   :  { %5022 = vpow2.f32 %v1088_v34  ;;  %v4153_v34 = vpack.c.bf16 %v1565_v32, %v1563_v31  ;;  %v1595_v31 = vld [vmem:[%s6722_s27 + $0x148] sm:$0xff]  ;;  %v1597_v32 = vld [vmem:[%s6722_s27 + $0x158] sm:$0xff] }
 0x5b5   :  { %v5021_v35 = vpop.eup %5020 }
 0x5b6   :  { %v1090_v36 = vsel %vm1077_vm4, %v5021_v35, 0.0 }
 0x5b7   :  { %1091 = vadd.xlane.f32.xlu1 %v1090_v36  ;;  %v1564_v36 = vld [vmem:[%s6722_s27 + $0x50] sm:$0xff] }
 0x5b9   :  { %v5023_v37 = vpop.eup %5022 }
 0x5ba   :  { %v1093_v38 = vsel %vm1077_vm4, %v5023_v37, 0.0 }
 0x5bb   :  { %1094 = vadd.xlane.f32.xlu1 %v1093_v38  ;;  %v1569_v38 = vld [vmem:[%s6722_s27 + $0x78] sm:$0xff] }
 0x644   :  { %v1092_v40 = vpop.xlane.xlu1 %1091 }
 0x645   :  { %5024 = vrcp.f32 %v1092_v40 }
 0x648   :  { %v1095_v41 = vpop.xlane.xlu1 %1094 }
 0x649   :  { %5026 = vrcp.f32 %v1095_v41 }
 0x64f   :  { %v5025_v42 = vpop.eup %5024 }
 0x650   :  { %v1098_v44 = vmul.f32 %v5025_v42, %v5021_v35  ;;  %v1562_v35 = vld [vmem:[%s6722_s27 + $0x40] sm:$0xff] }
 0x651   :  { %v4155_v40 = vpack.c.bf16 %v1564_v36, %v1562_v35  ;;  %v1566_v42 = vld [vmem:[%s6722_s27 + $0x60] sm:$0xff]  ;;  %v1596_v36 = vld [vmem:[%s6722_s27 + $0x150] sm:$0xff] }
 0x652   :  { %3970 = vmatmul.mubr.msk.f32.vlgmr.msra.gmra.mrb[8].mxu1 %vm1077_vm4, %v1098_v44  ;;  %v1568_v44 = vld [vmem:[%s6722_s27 + $0x70] sm:$0xff]  ;;  %v1594_v35 = vld [vmem:[%s6722_s27 + $0x140] sm:$0xff] }
 0x653   :  { %v5027_v47 = vpop.eup %5026  ;;  %3973 = vmatpush3.msra.mxu1 %v933_v20  ;;  %3974 = vmatprep.mubr.msk.f32.mxu1 %vm5584_vm3, %v5583_v39  ;;  %v1557_v20 = vld [vmem:[%s6722_s27 + $0x18] sm:$0xff] }
 0x654   :  { %v1099_v50 = vmul.f32 %v5027_v47, %v5023_v37  ;;  %3977 = vmatprep.subr.mxu1 %v5583_v39  ;;  %v4145_v23 = vpack.c.bf16 %v1557_v20, %v1555_v19  ;;  %v1567_v37 = vld [vmem:[%s6722_s27 + $0x68] sm:$0xff]  ;;  %v1589_v19 = vld [vmem:[%s6722_s27 + $0x118] sm:$0xff] }
 0x655   :  { %v4157_v41 = vpack.c.bf16 %v1569_v38, %v1567_v37  ;;  %v1571_v47 = vld [vmem:[%s6722_s27 + $0x88] sm:$0xff]  ;;  %v1601_v38 = vld [vmem:[%s6722_s27 + $0x178] sm:$0xff] }
 0x656   :  { %3975 = vmatmul.mubr.msk.f32.vlgmr.msra.gmra.mrb[10].mxu1 %vm1077_vm4, %v1099_v50  ;;  %4146 = vmatprep.subr.bf16.mxu0 %v4145_v23  ;;  %v4159_v50 = vpack.c.bf16 %v1568_v44, %v1566_v42  ;;  %v4161_v51 = vpack.c.bf16 %v1573_v49, %v1571_v47  ;;  %v1586_v23 = vld [vmem:[%s6722_s27 + $0x100] sm:$0xff]  ;;  %v1599_v37 = vld [vmem:[%s6722_s27 + $0x168] sm:$0xff]  ;;  %v1600_v44 = vld [vmem:[%s6722_s27 + $0x170] sm:$0xff] }
 0x657   :  { %3979 = vmatprep.mubr.msk.f32.mxu1 %vm5584_vm3, %v5583_v39  ;;  %4148 = vmatpush1.bf16.msra.mxu0 %v4147_v27  ;;  %v4179_v27 = vpack.c.bf16 %v1588_v24, %v1586_v23  ;;  %v1598_v42 = vld [vmem:[%s6722_s27 + $0x160] sm:$0xff]  ;;  %v1603_v47 = vld [vmem:[%s6722_s27 + $0x188] sm:$0xff]  ;;  %v1605_v49 = vld [vmem:[%s6722_s27 + $0x198] sm:$0xff] }
 0x658   :  { %4150 = vmatprep.subr.bf16.mxu0 %v4149_v28  ;;  %v4181_v28 = vpack.c.bf16 %v1593_v26, %v1591_v25 }
 0x65a   :  { %3978 = vmatpush3.xpose.msra.mxu1 %v852_v52  ;;  %v1570_v52 = vld [vmem:[%s6722_s27 + $0x80] sm:$0xff] }
 0x65b   :  { %3982 = vmatprep.subr.mxu1 %v5583_v39  ;;  %4152 = vmatpush1.bf16.msra.mxu0 %v4151_v33  ;;  %v4183_v33 = vpack.c.bf16 %v1592_v30, %v1590_v29  ;;  %v1787_v30 = vld [vmem:[#allocation22 + $0x18] sm:$0xff] }
 0x65c   :  { %4154 = vmatprep.subr.bf16.mxu0 %v4153_v34  ;;  %v4185_v34 = vpack.c.bf16 %v1597_v32, %v1595_v31  ;;  %v1786_v32 = vld [vmem:[#allocation22 + $0x10] sm:$0xff] }
 0x65d   :  { %3980 = vmatmul.mubr.f32.vlgmr.msra.gmra.mrb[12].mxu1 %v775_v53  ;;  %v1572_v53 = vld [vmem:[%s6722_s27 + $0x90] sm:$0xff] }
 0x65e   :  { %3983 = vmatpush3.xpose.msra.mxu1 %v858_v54  ;;  %3984 = vmatprep.mubr.msk.f32.mxu1 %vm5584_vm3, %v5583_v39  ;;  %v1575_v54 = vld [vmem:[%s6722_s27 + $0xa8] sm:$0xff] }
 0x65f   :  { %3987 = vmatprep.subr.mxu1 %v5583_v39  ;;  %4156 = vmatpush1.bf16.msra.mxu0 %v4155_v40  ;;  %v4187_v40 = vpack.c.bf16 %v1596_v36, %v1594_v35  ;;  %v1788_v35 = vld [vmem:[#allocation22 + $0x20] sm:$0xff]  ;;  %v1790_v36 = vld [vmem:[#allocation22 + $0x30] sm:$0xff] }
 0x660   :  { %4158 = vmatprep.subr.bf16.mxu0 %v4157_v41  ;;  %v4189_v41 = vpack.c.bf16 %v1601_v38, %v1599_v37  ;;  %v1793_v37 = vld [vmem:[#allocation22 + $0x48] sm:$0xff]  ;;  %v1795_v38 = vld [vmem:[#allocation22 + $0x58] sm:$0xff] }
 0x661   :  { %3985 = vmatmul.mubr.f32.vlgmr.msra.gmra.mrb[14].mxu1 %v781_v55  ;;  %v1577_v55 = vld [vmem:[%s6722_s27 + $0xb8] sm:$0xff] }
 0x662   :  { %3988 = vmatpush3.msra.mxu1 %v929_v58  ;;  %3989 = vmatprep.mubr.msk.f32.mxu1 %vm5584_vm3, %v5583_v39  ;;  %v4163_v58 = vpack.c.bf16 %v1572_v53, %v1570_v52  ;;  %v1602_v52 = vld [vmem:[%s6722_s27 + $0x180] sm:$0xff]  ;;  %v1604_v53 = vld [vmem:[%s6722_s27 + $0x190] sm:$0xff] }
 0x663   :  { %3992 = vmatprep.subr.mxu1 %v5583_v39  ;;  %4160 = vmatpush1.bf16.msra.mxu0 %v4159_v50  ;;  %v4191_v50 = vpack.c.bf16 %v1600_v44, %v1598_v42  ;;  %v1797_v42 = vld [vmem:[#allocation22 + $0x68] sm:$0xff]  ;;  %v1799_v44 = vld [vmem:[#allocation22 + $0x78] sm:$0xff] }
 0x664   :  { %4162 = vmatprep.subr.bf16.mxu0 %v4161_v51  ;;  %v4193_v51 = vpack.c.bf16 %v1605_v49, %v1603_v47  ;;  %v4221_v49 = vpack.c.bf16 %v1799_v44, %v1797_v42  ;;  %v1819_v44 = vld [vmem:[#allocation22 + $0x118] sm:$0xff] }
 0x667   :  { %4164 = vmatpush1.bf16.msra.mxu0 %v4163_v58  ;;  %v4195_v58 = vpack.c.bf16 %v1604_v53, %v1602_v52  ;;  %v1618_v53 = vld [vmem:[#allocation14] sm:$0x3] }
 0x725   :  { %v6091_v60 = vpop.f32.mrb[8].mxu1 }
 0x726   :  { %v3971_v61 = vpop.f32.mrb[9].mxu1 }
 0x727   :  { %v4165_v61 = vpack.c.bf16 %v1577_v55, %v1575_v54  ;;  %v1607_v54 = vld [vmem:[%s6722_s27 + $0x1a8] sm:$0xff]  ;;  %v1609_v55 = vld [vmem:[%s6722_s27 + $0x1b8] sm:$0xff] }
 0x729   :  { %v6093_v62 = vpop.f32.mrb[10].mxu1  ;;  %4166 = vmatprep.subr.bf16.mxu0 %v4165_v61  ;;  %v4197_v61 = vpack.c.bf16 %v1609_v55, %v1607_v54  ;;  %v1623_v54 = vrot.slane %v1618_v53, %v5998_v48  ;;  %v1627_v55 = vrot.slane %v1618_v53, %v5995_v46 }
 0x72a   :  { %v3976_v63 = vpop.f32.mrb[11].mxu1 }
 0x72b   :  { %v1574_v63 = vld [vmem:[%s6722_s27 + $0xa0] sm:$0xff] }
 0x730   :  { %v1312_v0 = vpop.f32.mrb[12].mxu1 }
 0x731   :  { %v3981_v1 = vpop.f32.mrb[13].mxu1  ;;  %v1386_v2 = vsel %vm1077_vm4, %v1312_v0, -inf }
 0x732   :  { %1387 = vmax.xlane.f32.xlu0 %v1386_v2  ;;  %v1579_v1 = vld [vmem:[%s6722_s27 + $0xc8] sm:$0xff]  ;;  %v1581_v2 = vld [vmem:[%s6722_s27 + $0xd8] sm:$0xff] }
 0x734   :  { %v1382_v4 = vpop.f32.mrb[14].mxu1 }
 0x735   :  { %v3986_v6 = vpop.f32.mrb[15].mxu1  ;;  %v1389_v7 = vsel %vm1077_vm4, %v1382_v4, -inf }
 0x736   :  { %1390 = vmax.xlane.f32.xlu1 %v1389_v7  ;;  %v4169_v6 = vpack.c.bf16 %v1581_v2, %v1579_v1  ;;  %v1578_v7 = vld [vmem:[%s6722_s27 + $0xc0] sm:$0xff]  ;;  %v1611_v1 = vld [vmem:[%s6722_s27 + $0x1c8] sm:$0xff]  ;;  %v1613_v2 = vld [vmem:[%s6722_s27 + $0x1d8] sm:$0xff] }
 0x7bf   :  { %v1388_v8 = vpop.xlane.xlu0 %1387 }
 0x7c0   :  { %v1392_v9 = vsub.f32 %v1312_v0, %v1388_v8  ;;  %v1576_v0 = vld [vmem:[%s6722_s27 + $0xb0] sm:$0xff] }
 0x7c1   :  { %v1580_v8 = vld [vmem:[%s6722_s27 + $0xd0] sm:$0xff] }
 0x7c2   :  { %v1394_v10 = vmul.f32 1.442695, %v1392_v9  ;;  %v1583_v9 = vld [vmem:[%s6722_s27 + $0xe8] sm:$0xff] }
 0x7c3   :  { %v1391_v11 = vpop.xlane.xlu1 %1390 }
 0x7c4   :  { %5028 = vpow2.f32 %v1394_v10  ;;  %v1393_v13 = vsub.f32 %v1382_v4, %v1391_v11  ;;  %v4167_v4 = vpack.c.bf16 %v1576_v0, %v1574_v63  ;;  %v1585_v10 = vld [vmem:[%s6722_s27 + $0xf8] sm:$0xff]  ;;  %v4171_v11 = vpack.c.bf16 %v1580_v8, %v1578_v7  ;;  %v1606_v63 = vld [vmem:[%s6722_s27 + $0x1a0] sm:$0xff]  ;;  %v1608_v0 = vld [vmem:[%s6722_s27 + $0x1b0] sm:$0xff] }
 0x7c5   :  { %v1610_v7 = vld [vmem:[%s6722_s27 + $0x1c0] sm:$0xff]  ;;  %v1612_v8 = vld [vmem:[%s6722_s27 + $0x1d0] sm:$0xff] }
 0x7c6   :  { %v1396_v14 = vmul.f32 1.442695, %v1393_v13  ;;  %4168 = vmatpush1.bf16.msra.mxu0 %v4167_v4  ;;  %v4173_v13 = vpack.c.bf16 %v1585_v10, %v1583_v9  ;;  %v4199_v4 = vpack.c.bf16 %v1608_v0, %v1606_v63  ;;  %v1615_v9 = vld [vmem:[%s6722_s27 + $0x1e8] sm:$0xff]  ;;  %v1617_v10 = vld [vmem:[%s6722_s27 + $0x1f8] sm:$0xff] }
 0x7c7   :  { %4170 = vmatprep.subr.bf16.mxu0 %v4169_v6  ;;  %v4201_v6 = vpack.c.bf16 %v1613_v2, %v1611_v1 }
 0x7c8   :  { %5030 = vpow2.f32 %v1396_v14  ;;  %v1582_v14 = vld [vmem:[%s6722_s27 + $0xe0] sm:$0xff] }
 0x7ca   :  { %4172 = vmatpush1.bf16.msra.mxu0 %v4171_v11  ;;  %v4203_v11 = vpack.c.bf16 %v1612_v8, %v1610_v7 }
 0x7cb   :  { %4174 = vmatprep.subr.bf16.mxu0 %v4173_v13  ;;  %v4205_v13 = vpack.c.bf16 %v1617_v10, %v1615_v9 }
 0x7ce   :  { %v6097_v15 = vpop.eup %5028 }
 0x7cf   :  { %v1398_v16 = vsel %vm1077_vm4, %v6097_v15, 0.0 }
 0x7d0   :  { %1399 = vadd.xlane.f32.xlu0 %v1398_v16  ;;  %v1584_v16 = vld [vmem:[%s6722_s27 + $0xf0] sm:$0xff] }
 0x7d1   :  { %v4175_v20 = vpack.c.bf16 %v1584_v16, %v1582_v14  ;;  %v1614_v14 = vld [vmem:[%s6722_s27 + $0x1e0] sm:$0xff]  ;;  %v1616_v16 = vld [vmem:[%s6722_s27 + $0x1f0] sm:$0xff] }
 0x7d2   :  { %v6101_v17 = vpop.eup %5030 }
 0x7d3   :  { %v1401_v18 = vsel %vm1077_vm4, %v6101_v17, 0.0  ;;  %4176 = vmatpush1.bf16.msra.mxu0 %v4175_v20 }
 0x7d4   :  { %1402 = vadd.xlane.f32.xlu1 %v1401_v18  ;;  %v1587_v18 = vld [vmem:[%s6722_s27 + $0x108] sm:$0xff] }
 0x7d5   :  { %v4177_v21 = vpack.c.bf16 %v1589_v19, %v1587_v18  ;;  %v4207_v18 = vpack.c.bf16 %v1616_v16, %v1614_v14 }
 0x7d7   :  { %4178 = vmatprep.subr.bf16.mxu0 %v4177_v21 }
 0x7d8   :  { %4180 = vmatpush1.bf16.msra.mxu0 %v4179_v27 }
 0x7d9   :  { %4182 = vmatprep.subr.bf16.mxu0 %v4181_v28 }
 0x7dc   :  { %4184 = vmatpush1.bf16.msra.mxu0 %v4183_v33  ;;  %v1791_v33 = vld [vmem:[#allocation22 + $0x38] sm:$0xff] }
 0x7dd   :  { %4186 = vmatprep.subr.bf16.mxu0 %v4185_v34 }
 0x7e0   :  { %4188 = vmatpush1.bf16.msra.mxu0 %v4187_v40  ;;  %v4217_v40 = vpack.c.bf16 %v1795_v38, %v1793_v37  ;;  %v1813_v37 = vld [vmem:[#allocation22 + $0xe8] sm:$0xff]  ;;  %v1815_v38 = vld [vmem:[#allocation22 + $0xf8] sm:$0xff] }
 0x7e1   :  { %4190 = vmatprep.subr.bf16.mxu0 %v4189_v41  ;;  %v1792_v41 = vld [vmem:[#allocation22 + $0x40] sm:$0xff] }
 0x7e4   :  { %4192 = vmatpush1.bf16.msra.mxu0 %v4191_v50  ;;  %v1796_v50 = vld [vmem:[#allocation22 + $0x60] sm:$0xff] }
 0x7e5   :  { %4194 = vmatprep.subr.bf16.mxu0 %v4193_v51  ;;  %v1798_v51 = vld [vmem:[#allocation22 + $0x70] sm:$0xff] }
 0x7e6   :  { %v4223_v52 = vpack.c.bf16 %v1798_v51, %v1796_v50  ;;  %v1821_v51 = vld [vmem:[#allocation22 + $0x128] sm:$0xff] }
 0x7e8   :  { %4196 = vmatpush1.bf16.msra.mxu0 %v4195_v58 }
 0x7e9   :  { %4198 = vmatprep.subr.bf16.mxu0 %v4197_v61 }
 0x7ec   :  { %4200 = vmatpush1.bf16.msra.mxu0 %v4199_v4 }
 0x7ed   :  { %4202 = vmatprep.subr.bf16.mxu0 %v4201_v6 }
 0x7f0   :  { %4204 = vmatpush1.bf16.msra.mxu0 %v4203_v11 }
 0x7f1   :  { %4206 = vmatprep.subr.bf16.mxu0 %v4205_v13 }
 0x7f4   :  { %4208 = vmatpush1.bf16.msra.mxu0 %v4207_v18 }
 0x85d   :  { %v1400_v19 = vpop.xlane.xlu0 %1399 }
 0x85e   :  { %5032 = vrcp.f32 %v1400_v19 }
 0x861   :  { %v1403_v20 = vpop.xlane.xlu1 %1402 }
 0x862   :  { %5034 = vrcp.f32 %v1403_v20 }
 0x868   :  { %v5033_v21 = vpop.eup %5032 }
 0x869   :  { %v1406_v23 = vmul.f32 %v5033_v21, %v6097_v15  ;;  %v1785_v15 = vld [vmem:[#allocation22 + $0x8] sm:$0xff] }
 0x86a   :  { %v4209_v31 = vpack.c.bf16 %v1787_v30, %v1785_v15  ;;  %v1807_v15 = vld [vmem:[#allocation22 + $0xb8] sm:$0xff] }
 0x86b   :  { %3990 = vmatmul.mubr.msk.f32.vlgmr.msra.gmra.mrb[16].mxu1 %vm1077_vm4, %v1406_v23  ;;  %v1801_v23 = vld [vmem:[#allocation22 + $0x88] sm:$0xff] }
 0x86c   :  { %v5035_v24 = vpop.eup %5034  ;;  %3993 = vmatpush3.msra.mxu1 %v6060_v22  ;;  %3994 = vmatprep.mubr.msk.f32.mxu1 %vm5584_vm3, %v5583_v39  ;;  %v1784_v22 = vld [vmem:[#allocation22] sm:$0xff]  ;;  %v1789_v39 = vld [vmem:[#allocation22 + $0x28] sm:$0xff] }
 0x86d   :  { %v1407_v25 = vmul.f32 %v5035_v24, %v6101_v17  ;;  %v4211_v17 = vpack.c.bf16 %v1786_v32, %v1784_v22  ;;  %v4213_v34 = vpack.c.bf16 %v1791_v33, %v1789_v39  ;;  %4210 = vmatprep.subr.bf16.mxu1 %v4209_v31  ;;  %v1803_v24 = vld [vmem:[#allocation22 + $0x98] sm:$0xff]  ;;  %v1804_v22 = vld [vmem:[#allocation22 + $0xa0] sm:$0xff]  ;;  %v1806_v31 = vld [vmem:[#allocation22 + $0xb0] sm:$0xff] }
 0x86e   :  { %v4231_v32 = vpack.c.bf16 %v1806_v31, %v1804_v22  ;;  %v1809_v39 = vld [vmem:[#allocation22 + $0xc8] sm:$0xff]  ;;  %v1811_v33 = vld [vmem:[#allocation22 + $0xd8] sm:$0xff] }
 0x86f   :  { %3995 = vmatmul.mubr.msk.f32.vlgmr.msra.gmra.mrb[18].mxu1 %vm1077_vm4, %v1407_v25  ;;  %v4225_v25 = vpack.c.bf16 %v1803_v24, %v1801_v23  ;;  %v1712_v23 = vld [vmem:[#allocation17] sm:$0x3] }
 0x870   :  { %4212 = vmatpush1.bf16.msra.mxu1 %v4211_v17  ;;  %v4233_v17 = vpack.c.bf16 %v1811_v33, %v1809_v39  ;;  %v1773_v22 = vrot.slane %v1712_v23, %v5998_v48  ;;  %v1923_v31 = vld [vmem:[%s6723_s23] sm:$0xff]  ;;  %v1928_v39 = vld [vmem:[%s6723_s23 + $0x28] sm:$0xff]  ;;  %v1930_v33 = vld [vmem:[%s6723_s23 + $0x38] sm:$0xff] }
 0x871   :  { %4214 = vmatprep.subr.bf16.mxu1 %v4213_v34  ;;  %v1808_v34 = vld [vmem:[#allocation22 + $0xc0] sm:$0xff] }
 0x93e   :  { %v1477_v26 = vpop.f32.mrb[16].mxu1 }
 0x93f   :  { %v3991_v27 = vpop.f32.mrb[17].mxu1  ;;  %1694 = vmatprep.mubr.f32.mxu0 %v1477_v26  ;;  %v1800_v26 = vld [vmem:[#allocation22 + $0x80] sm:$0xff] }
 0x940   :  { %1695 = vmatmul.mubr.f32.vlgmr.msra.gmra.mrb[14].mxu0 %v6091_v60  ;;  %v4215_v60 = vpack.c.bf16 %v1790_v36, %v1788_v35  ;;  %v1802_v27 = vld [vmem:[#allocation22 + $0x90] sm:$0xff] }
 0x941   :  { %v1810_v35 = vld [vmem:[#allocation22 + $0xd0] sm:$0xff] }
 0x942   :  { %v1550_v28 = vpop.f32.mrb[18].mxu1  ;;  %4216 = vmatpush1.bf16.msra.mxu1 %v4215_v60  ;;  %v4235_v36 = vpack.c.bf16 %v1810_v35, %v1808_v34  ;;  %v4237_v60 = vpack.c.bf16 %v1815_v38, %v1813_v37 }
 0x943   :  { %v3996_v29 = vpop.f32.mrb[19].mxu1  ;;  %1700 = vmatprep.mubr.f32.mxu0 %v1550_v28  ;;  %4218 = vmatprep.subr.bf16.mxu1 %v4217_v40  ;;  %v4227_v28 = vpack.c.bf16 %v1802_v27, %v1800_v26  ;;  %v1812_v40 = vld [vmem:[#allocation22 + $0xe0] sm:$0xff] }
 0x944   :  { %1701 = vmatmul.mubr.f32.gmra.mrb[16].mxu0 %v6093_v62  ;;  %v1794_v62 = vld [vmem:[#allocation22 + $0x50] sm:$0xff]  ;;  %v1805_v29 = vld [vmem:[#allocation22 + $0xa8] sm:$0xff] }
 0x945   :  { %v4219_v47 = vpack.c.bf16 %v1794_v62, %v1792_v41  ;;  %v4229_v30 = vpack.c.bf16 %v1807_v15, %v1805_v29  ;;  %v1814_v41 = vld [vmem:[#allocation22 + $0xf0] sm:$0xff]  ;;  %v1817_v62 = vld [vmem:[#allocation22 + $0x108] sm:$0xff]  ;;  %v1777_v15 = vrot.slane %v1712_v23, %v5995_v46 }
 0x946   :  { %v4239_v42 = vpack.c.bf16 %v1814_v41, %v1812_v40  ;;  %v4241_v50 = vpack.c.bf16 %v1819_v44, %v1817_v62  ;;  %v4253_v41 = vpack.c.bf16 %v1930_v33, %v1928_v39  ;;  %v1927_v62 = vld [vmem:[%s6723_s23 + $0x20] sm:$0xff]  ;;  %v1932_v44 = vld [vmem:[%s6723_s23 + $0x48] sm:$0xff]  ;;  %v1957_v39 = vld [vmem:[%s6723_s23 + $0x110] sm:$0xff] }
 0x947   :  { %4220 = vmatpush1.bf16.msra.mxu1 %v4219_v47  ;;  %v1816_v47 = vld [vmem:[#allocation22 + $0x100] sm:$0xff] }
 0x948   :  { %4222 = vmatprep.subr.bf16.mxu1 %v4221_v49  ;;  %v1818_v49 = vld [vmem:[#allocation22 + $0x110] sm:$0xff]  ;;  %v1960_v33 = vld [vmem:[%s6723_s23 + $0x128] sm:$0xff] }
 0x949   :  { %v4243_v53 = vpack.c.bf16 %v1818_v49, %v1816_v47  ;;  %v1934_v47 = vld [vmem:[%s6723_s23 + $0x58] sm:$0xff] }
 0x94b   :  { %4224 = vmatpush1.bf16.msra.mxu1 %v4223_v52  ;;  %v1823_v52 = vld [vmem:[#allocation22 + $0x138] sm:$0xff] }
 0x94c   :  { %4226 = vmatprep.subr.bf16.mxu1 %v4225_v25 }
 0x94f   :  { %4228 = vmatpush1.bf16.msra.mxu1 %v4227_v28 }
 0x950   :  { %4230 = vmatprep.subr.bf16.mxu1 %v4229_v30 }
 0x953   :  { %4232 = vmatpush1.bf16.msra.mxu1 %v4231_v32 }
 0x954   :  { %4234 = vmatprep.subr.bf16.mxu1 %v4233_v17 }
 0x957   :  { %4236 = vmatpush1.bf16.msra.mxu1 %v4235_v36 }
 0x958   :  { %4238 = vmatprep.subr.bf16.mxu1 %v4237_v60 }
 0x95b   :  { %4240 = vmatpush1.bf16.msra.mxu1 %v4239_v42 }
 0x95c   :  { %4242 = vmatprep.subr.bf16.mxu1 %v4241_v50 }
 0x95f   :  { %4244 = vmatpush1.bf16.msra.mxu1 %v4243_v53  ;;  %v1931_v53 = vld [vmem:[%s6723_s23 + $0x40] sm:$0xff] }
 0xa13   :  { %v1696_v58 = vpop.f32.mrb[14].mxu0 }
 0xa14   :  { %v1697_v61 = vadd.f32 %v1696_v58, %v1623_v54  ;;  %v1698_v63 = vpop.f32.mrb[15].mxu0  ;;  %v1822_v58 = vld [vmem:[#allocation22 + $0x130] sm:$0xff] }
 0xa15   :  { %v1699_v0 = vadd.f32 %v1698_v63, %v1627_v55  ;;  %v1924_v63 = vld [vmem:[%s6723_s23 + $0x8] sm:$0xff] }
 0xa16   :  { %v6309_v1 = vadd.f32 %v1697_v61, %v6004_v59 }
 0xa17   :  { %v6312_v2 = vadd.f32 %v1699_v0, %v6002_v57  ;;  %v1702_v4 = vpop.f32.mrb[16].mxu0  ;;  %v1926_v0 = vld [vmem:[%s6723_s23 + $0x18] sm:$0xff] }
 0xa18   :  { %v1703_v6 = vadd.f32 %v1702_v4, %v1623_v54  ;;  %v1704_v7 = vpop.f32.mrb[17].mxu0  ;;  %v1724_v59 = vmul.f32 %v6309_v1, %v6309_v1  ;;  %v4245_v54 = vpack.c.bf16 %v1823_v52, %v1821_v51  ;;  %v4249_v4 = vpack.c.bf16 %v1926_v0, %v1924_v63  ;;  %v1935_v0 = vld [vmem:[%s6723_s23 + $0x60] sm:$0xff] }
 0xa19   :  { %v1705_v8 = vadd.f32 %v1704_v7, %v1627_v55  ;;  %v1713_v9 = vsel %vm699_vm2, %v6312_v2, 0.0  ;;  %v1725_v10 = vmul.f32 %v6312_v2, %v6312_v2  ;;  %v1820_v55 = vld [vmem:[#allocation22 + $0x120] sm:$0xff]  ;;  %v4257_v52 = vpack.c.bf16 %v1934_v47, %v1932_v44  ;;  %v1970_v47 = vld [vmem:[%s6723_s23 + $0x178] sm:$0xff] }
 0xa1a   :  { %v6319_v11 = vadd.f32 %v1703_v6, %v6014_v5  ;;  %v1714_v13 = vadd.f32 %v1713_v9, %v6309_v1  ;;  %v4247_v61 = vpack.c.bf16 %v1822_v58, %v1820_v55  ;;  %4246 = vmatprep.subr.bf16.mxu1 %v4245_v54  ;;  %v1933_v54 = vld [vmem:[%s6723_s23 + $0x50] sm:$0xff]  ;;  %v1936_v55 = vld [vmem:[%s6723_s23 + $0x68] sm:$0xff]  ;;  %v1938_v58 = vld [vmem:[%s6723_s23 + $0x78] sm:$0xff] }
 0xa1b   :  { %v6325_v57 = vadd.f32 %v1705_v8, %v6012_v3  ;;  %v1728_v14 = vsel %vm699_vm2, %v1725_v10, 0.0  ;;  %v4261_v63 = vpack.c.bf16 %v1938_v58, %v1936_v55  ;;  %v1968_v44 = vld [vmem:[%s6723_s23 + $0x168] sm:$0xff]  ;;  %v1974_v58 = vld [vmem:[%s6723_s23 + $0x198] sm:$0xff] }
 0xa1c   :  { %1715 = vadd.xlane.f32.xlu0 %v1714_v13  ;;  %v1729_v16 = vadd.f32 %v1728_v14, %v1724_v59  ;;  %v1726_v20 = vmul.f32 %v6319_v11, %v6319_v11  ;;  %4248 = vmatpush1.bf16.msra.mxu1 %v4247_v61  ;;  %v4259_v61 = vpack.c.bf16 %v1933_v54, %v1931_v53  ;;  %v1967_v53 = vld [vmem:[%s6723_s23 + $0x160] sm:$0xff]  ;;  %v1969_v54 = vld [vmem:[%s6723_s23 + $0x170] sm:$0xff]  ;;  %v1972_v55 = vld [vmem:[%s6723_s23 + $0x188] sm:$0xff] }
 0xa1d   :  { %v1717_v18 = vsel %vm699_vm2, %v6325_v57, 0.0  ;;  %v1727_v19 = vmul.f32 %v6325_v57, %v6325_v57  ;;  %4250 = vmatprep.subr.bf16.mxu1 %v4249_v4  ;;  %v1937_v4 = vld [vmem:[%s6723_s23 + $0x70] sm:$0xff] }
 0xa1e   :  { %1730 = vadd.xlane.f32.xlu1 %v1729_v16  ;;  %v1718_v5 = vadd.f32 %v1717_v18, %v6319_v11 }
 0xa1f   :  { %v1732_v21 = vsel %vm699_vm2, %v1727_v19, 0.0 }
 0xa20   :  { %1719 = vadd.xlane.f32.xlu0 %v1718_v5  ;;  %v1733_v3 = vadd.f32 %v1732_v21, %v1726_v20 }
 0xa22   :  { %1734 = vadd.xlane.f32.xlu1 %v1733_v3  ;;  %v1711_v3 = vld [vmem:[#allocation16] sm:$0x3] }
 0xa23   :  { %v1762_v26 = vrot.slane %v1711_v3, %v5995_v46  ;;  %v1758_v27 = vrot.slane %v1711_v3, %v5998_v48 }
 0xaa9   :  { %v1716_v6 = vpop.xlane.xlu0 %1715 }
 0xaaa   :  { %v1722_v7 = vmul.f32 0.00625, %v1716_v6  ;;  %v1940_v6 = vld [vmem:[%s6723_s23 + $0x88] sm:$0xff] }
 0xaab   :  { %v1731_v8 = vpop.xlane.xlu1 %1730 }
 0xaac   :  { %v1736_v9 = vmul.f32 0.00625, %v1731_v8  ;;  %v1738_v10 = vmul.f32 %v1722_v7, %v1722_v7  ;;  %v1742_v24 = vsub.f32 %v6309_v1, %v1722_v7  ;;  %v1743_v25 = vsub.f32 %v6312_v2, %v1722_v7  ;;  %v1925_v1 = vld [vmem:[%s6723_s23 + $0x10] sm:$0xff]  ;;  %v1942_v7 = vld [vmem:[%s6723_s23 + $0x98] sm:$0xff] }
 0xaad   :  { %v1720_v13 = vpop.xlane.xlu0 %1719  ;;  %v4251_v38 = vpack.c.bf16 %v1925_v1, %v1923_v31  ;;  %v4263_v8 = vpack.c.bf16 %v1937_v4, %v1935_v0  ;;  %v1958_v31 = vld [vmem:[%s6723_s23 + $0x118] sm:$0xff]  ;;  %v1971_v0 = vld [vmem:[%s6723_s23 + $0x180] sm:$0xff]  ;;  %v1973_v4 = vld [vmem:[%s6723_s23 + $0x190] sm:$0xff] }
 0xaae   :  { %v1740_v59 = vsub.f32 %v1736_v9, %v1738_v10  ;;  %v1723_v14 = vmul.f32 0.00625, %v1720_v13  ;;  %v4265_v9 = vpack.c.bf16 %v1942_v7, %v1940_v6  ;;  %v1939_v10 = vld [vmem:[%s6723_s23 + $0x80] sm:$0xff]  ;;  %v1941_v13 = vld [vmem:[%s6723_s23 + $0x90] sm:$0xff]  ;;  %v1976_v6 = vld [vmem:[%s6723_s23 + $0x1a8] sm:$0xff] }
 0xaaf   :  { %v1735_v16 = vpop.xlane.xlu1 %1734  ;;  %v1978_v7 = vld [vmem:[%s6723_s23 + $0x1b8] sm:$0xff] }
 0xab0   :  { %v1746_v18 = vadd.f32 1e-05, %v1740_v59  ;;  %v1737_v19 = vmul.f32 0.00625, %v1735_v16  ;;  %v1739_v5 = vmul.f32 %v1723_v14, %v1723_v14  ;;  %v1744_v17 = vsub.f32 %v6319_v11, %v1723_v14  ;;  %v1929_v11 = vld [vmem:[%s6723_s23 + $0x30] sm:$0xff]  ;;  %v1944_v59 = vld [vmem:[%s6723_s23 + $0xa8] sm:$0xff] }
 0xab1   :  { %v1745_v34 = vsub.f32 %v6325_v57, %v1723_v14  ;;  %v4255_v51 = vpack.c.bf16 %v1929_v11, %v1927_v62  ;;  %v1946_v14 = vld [vmem:[%s6723_s23 + $0xb8] sm:$0xff]  ;;  %v4267_v16 = vpack.c.bf16 %v1941_v13, %v1939_v10  ;;  %v1975_v10 = vld [vmem:[%s6723_s23 + $0x1a0] sm:$0xff]  ;;  %v1977_v13 = vld [vmem:[%s6723_s23 + $0x1b0] sm:$0xff] }
 0xab2   :  { %5036 = vrsqrt.f32 %v1746_v18  ;;  %v1741_v20 = vsub.f32 %v1737_v19, %v1739_v5  ;;  %v4269_v18 = vpack.c.bf16 %v1946_v14, %v1944_v59  ;;  %v1943_v19 = vld [vmem:[%s6723_s23 + $0xa0] sm:$0xff]  ;;  %v1945_v5 = vld [vmem:[%s6723_s23 + $0xb0] sm:$0xff]  ;;  %v1980_v59 = vld [vmem:[%s6723_s23 + $0x1c8] sm:$0xff] }
 0xab3   :  { %v4271_v3 = vpack.c.bf16 %v1945_v5, %v1943_v19  ;;  %v1982_v14 = vld [vmem:[%s6723_s23 + $0x1d8] sm:$0xff]  ;;  %v1979_v19 = vld [vmem:[%s6723_s23 + $0x1c0] sm:$0xff]  ;;  %v1981_v5 = vld [vmem:[%s6723_s23 + $0x1d0] sm:$0xff] }
 0xab4   :  { %v1747_v21 = vadd.f32 1e-05, %v1741_v20  ;;  %v1948_v20 = vld [vmem:[%s6723_s23 + $0xc8] sm:$0xff] }
 0xab6   :  { %5038 = vrsqrt.f32 %v1747_v21  ;;  %v1950_v21 = vld [vmem:[%s6723_s23 + $0xd8] sm:$0xff] }
 0xab7   :  { %v4273_v23 = vpack.c.bf16 %v1950_v21, %v1948_v20  ;;  %v4307_v20 = vpack.c.bf16 %v1981_v5, %v1979_v19  ;;  %v1984_v21 = vld [vmem:[%s6723_s23 + $0x1e8] sm:$0xff]  ;;  %v2191_v19 = vld [vmem:[#allocation26 + $0x68] sm:$0xff] }
 0xabc   :  { %v5037_v28 = vpop.eup %5036 }
 0xabd   :  { %v1751_v29 = vmul.f32 %v5037_v28, %v1743_v25  ;;  %v1750_v30 = vmul.f32 %v5037_v28, %v1742_v24  ;;  %v1947_v24 = vld [vmem:[%s6723_s23 + $0xc0] sm:$0xff]  ;;  %v1949_v25 = vld [vmem:[%s6723_s23 + $0xd0] sm:$0xff] }
 0xabe   :  { %v4275_v28 = vpack.c.bf16 %v1949_v25, %v1947_v24  ;;  %v1983_v24 = vld [vmem:[%s6723_s23 + $0x1e0] sm:$0xff]  ;;  %v1985_v25 = vld [vmem:[%s6723_s23 + $0x1f0] sm:$0xff] }
 0xabf   :  { %v1766_v2 = vmul.f32 %v1762_v26, %v1751_v29  ;;  %v1765_v32 = vmul.f32 %v1758_v27, %v1750_v30  ;;  %v1953_v30 = vld [vmem:[%s6723_s23 + $0xf0] sm:$0xff] }
 0xac0   :  { %v5039_v35 = vpop.eup %5038 }
 0xac1   :  { %v6362_v36 = vadd.f32 %v1777_v15, %v1766_v2  ;;  %v6364_v37 = vadd.f32 %v1773_v22, %v1765_v32  ;;  %v1753_v60 = vmul.f32 %v5039_v35, %v1745_v34  ;;  %v1752_v40 = vmul.f32 %v5039_v35, %v1744_v17  ;;  %v1955_v32 = vld [vmem:[%s6723_s23 + $0x100] sm:$0xff]  ;;  %v1962_v17 = vld [vmem:[%s6723_s23 + $0x138] sm:$0xff] }
 0xac2   :  { %v4283_v34 = vpack.c.bf16 %v1957_v39, %v1955_v32  ;;  %v4285_v35 = vpack.c.bf16 %v1962_v17, %v1960_v33 }
 0xac3   :  { %3846 = vmatprep.mubr.msk.f32.mxu1 %vm699_vm2, %v6362_v36  ;;  %v1768_v57 = vmul.f32 %v1762_v26, %v1753_v60  ;;  %v1767_v42 = vmul.f32 %v1758_v27, %v1752_v40  ;;  %v1952_v26 = vld [vmem:[%s6723_s23 + $0xe8] sm:$0xff]  ;;  %v1954_v27 = vld [vmem:[%s6723_s23 + $0xf8] sm:$0xff]  ;;  %v1961_v60 = vld [vmem:[%s6723_s23 + $0x130] sm:$0xff] }
 0xac4   :  { %1907 = vmatmul.mubr.f32.vlgmr.msra.gmra.mrb[20].mxu1 %v6364_v37  ;;  %v4277_v29 = vpack.c.bf16 %v1954_v27, %v1952_v26  ;;  %v1964_v40 = vld [vmem:[%s6723_s23 + $0x148] sm:$0xff]  ;;  %v4311_v26 = vpack.c.bf16 %v1985_v25, %v1983_v24  ;;  %v2199_v24 = vld [vmem:[#allocation26 + $0xa8] sm:$0xff] }
 0xac5   :  { %4252 = vmatpush1.bf16.msra.mxu1 %v4251_v38  ;;  %v6381_v49 = vadd.f32 %v1777_v15, %v1768_v57  ;;  %v6383_v50 = vadd.f32 %v1773_v22, %v1767_v42  ;;  %v1951_v15 = vld [vmem:[%s6723_s23 + $0xe0] sm:$0xff]  ;;  %v1956_v22 = vld [vmem:[%s6723_s23 + $0x108] sm:$0xff]  ;;  %v1965_v42 = vld [vmem:[%s6723_s23 + $0x150] sm:$0xff] }
 0xac6   :  { %4254 = vmatprep.subr.bf16.mxu1 %v4253_v41  ;;  %v4279_v1 = vpack.c.bf16 %v1953_v30, %v1951_v15  ;;  %v4281_v2 = vpack.c.bf16 %v1958_v31, %v1956_v22  ;;  %v1959_v38 = vld [vmem:[%s6723_s23 + $0x120] sm:$0xff]  ;;  %v1966_v41 = vld [vmem:[%s6723_s23 + $0x158] sm:$0xff]  ;;  %v1824_v27 = vld [vmem:[#allocation23] sm:$0x3] }
 0xac7   :  { %3847 = vmatprep.mubr.msk.f32.mxu1 %vm699_vm2, %v6381_v49  ;;  %v4287_v62 = vpack.c.bf16 %v1961_v60, %v1959_v38  ;;  %v4289_v11 = vpack.c.bf16 %v1966_v41, %v1964_v40  ;;  %v1963_v57 = vld [vmem:[%s6723_s23 + $0x140] sm:$0xff]  ;;  %v1987_v38 = vld [vmem:[#allocation25] sm:$0x3] }
 0xac8   :  { %1913 = vmatmul.mubr.f32.gmra.mrb[22].mxu1 %v6383_v50  ;;  %v1992_v60 = vrot.slane %v1987_v38, %v5998_v48  ;;  %v1996_v40 = vrot.slane %v1987_v38, %v5995_v46  ;;  %v2223_v38 = vld [vmem:[#allocation26 + $0x168] sm:$0xff] }
 0xac9   :  { %4256 = vmatpush1.bf16.msra.mxu1 %v4255_v51  ;;  %v4291_v51 = vpack.c.bf16 %v1965_v42, %v1963_v57 }
 0xaca   :  { %4258 = vmatprep.subr.bf16.mxu1 %v4257_v52  ;;  %v4293_v52 = vpack.c.bf16 %v1970_v47, %v1968_v44 }
 0xacd   :  { %4260 = vmatpush1.bf16.msra.mxu1 %v4259_v61  ;;  %v4295_v61 = vpack.c.bf16 %v1969_v54, %v1967_v53 }
 0xace   :  { %4262 = vmatprep.subr.bf16.mxu1 %v4261_v63  ;;  %v4297_v63 = vpack.c.bf16 %v1974_v58, %v1972_v55 }
 0xad1   :  { %4264 = vmatpush1.bf16.msra.mxu1 %v4263_v8  ;;  %v4299_v8 = vpack.c.bf16 %v1973_v4, %v1971_v0 }
 0xad2   :  { %4266 = vmatprep.subr.bf16.mxu1 %v4265_v9  ;;  %v4301_v9 = vpack.c.bf16 %v1978_v7, %v1976_v6 }
 0xad5   :  { %4268 = vmatpush1.bf16.msra.mxu1 %v4267_v16  ;;  %v4303_v16 = vpack.c.bf16 %v1977_v13, %v1975_v10  ;;  %v2183_v10 = vld [vmem:[#allocation26 + $0x28] sm:$0xff] }
 0xad6   :  { %4270 = vmatprep.subr.bf16.mxu1 %v4269_v18  ;;  %v4305_v18 = vpack.c.bf16 %v1982_v14, %v1980_v59  ;;  %v2178_v59 = vld [vmem:[#allocation26] sm:$0xff] }
 0xad7   :  { %v2182_v14 = vld [vmem:[#allocation26 + $0x20] sm:$0xff] }
 0xad9   :  { %4272 = vmatpush1.bf16.msra.mxu1 %v4271_v3  ;;  %v1986_v3 = vld [vmem:[%s6723_s23 + $0x1f8] sm:$0xff]  ;;  %s5586_s23 = smov [#allocation35]  }
 0xada   :  { %4274 = vmatprep.subr.bf16.mxu1 %v4273_v23  ;;  %v4309_v23 = vpack.c.bf16 %v1986_v3, %v1984_v21  ;;  %v2190_v21 = vld [vmem:[#allocation26 + $0x60] sm:$0xff]  ;;  %s3812_s28 = sshll.u32 %s5586_s23, 4  ;;  %s3813_s28 = int_to_ptr.vmem [resolvable:$true] %s3812_s28 }
 0xadb   :  { %s5506_s2 = scalar_lea.vmem %s3813_s28, 160  ;;  %p5511_p1 = scmp.lt.s32.totalorder %s3813_s28, %s3813_s28 }
 0xadc   :  { %p5507_p0 = scmp.ne.s32.totalorder %s3813_s28, %s5506_s2  ;;  %p5512_p2 = scmp.lt.s32.totalorder %s5506_s2, %s5506_s2 }
 0xadd   :  { %4276 = vmatpush1.bf16.msra.mxu1 %v4275_v28  ;;  %v1829_v28 = vrot.slane %v1824_v27, %v5998_v48 }
 0xade   :  { %4278 = vmatprep.subr.bf16.mxu1 %v4277_v29  ;;  %v1833_v29 = vrot.slane %v1824_v27, %v5995_v46  ;;  %v2198_v27 = vld [vmem:[#allocation26 + $0xa0] sm:$0xff]  ;;  %p5513_p3 = por %p5512_p2, %p5511_p1 }
 0xae0   :  { %p5514_p4 = pnand %p5513_p3, %p5507_p0 }
 0xae1   :  { %4280 = vmatpush1.bf16.msra.mxu1 %v4279_v1 }
 0xae2   :  { %4282 = vmatprep.subr.bf16.mxu1 %v4281_v2 }
 0xae5   :  { %4284 = vmatpush1.bf16.msra.mxu1 %v4283_v34 }
 0xae6   :  { %4286 = vmatprep.subr.bf16.mxu1 %v4285_v35 }
 0xae9   :  { %4288 = vmatpush1.bf16.msra.mxu1 %v4287_v62 }
 0xaea   :  { %4290 = vmatprep.subr.bf16.mxu1 %v4289_v11 }
 0xaed   :  { %4292 = vmatpush1.bf16.msra.mxu1 %v4291_v51 }
 0xaee   :  { %4294 = vmatprep.subr.bf16.mxu1 %v4293_v52 }
 0xaf1   :  { %4296 = vmatpush1.bf16.msra.mxu1 %v4295_v61 }
 0xaf2   :  { %4298 = vmatprep.subr.bf16.mxu1 %v4297_v63 }
 0xaf5   :  { %4300 = vmatpush1.bf16.msra.mxu1 %v4299_v8 }
 0xaf6   :  { %4302 = vmatprep.subr.bf16.mxu1 %v4301_v9 }
 0xaf9   :  { %4304 = vmatpush1.bf16.msra.mxu1 %v4303_v16  ;;  %v4315_v16 = vpack.c.bf16 %v2182_v14, %v2178_v59  ;;  %v2250_v59 = vld [vmem:[#allocation26 + $0x240] sm:$0xff] }
 0xafa   :  { %4306 = vmatprep.subr.bf16.mxu1 %v4305_v18  ;;  %v2187_v18 = vld [vmem:[#allocation26 + $0x48] sm:$0xff]  ;;  %v2254_v14 = vld [vmem:[#allocation26 + $0x260] sm:$0xff] }
 0xafb   :  { %v4317_v5 = vpack.c.bf16 %v2191_v19, %v2187_v18  ;;  %v2181_v18 = vld [vmem:[#allocation26 + $0x18] sm:$0xff] }
 0xafc   :  { %v2185_v19 = vld [vmem:[#allocation26 + $0x38] sm:$0xff] }
 0xafd   :  { %4308 = vmatpush1.bf16.msra.mxu1 %v4307_v20  ;;  %v2186_v20 = vld [vmem:[#allocation26 + $0x40] sm:$0xff] }
 0xafe   :  { %4310 = vmatprep.subr.bf16.mxu1 %v4309_v23  ;;  %v4319_v3 = vpack.c.bf16 %v2190_v21, %v2186_v20  ;;  %v2195_v23 = vld [vmem:[#allocation26 + $0x88] sm:$0xff] }
 0xaff   :  { %v4321_v25 = vpack.c.bf16 %v2199_v24, %v2195_v23  ;;  %v2437_v20 = vld [vmem:[#allocation29 + $0x8] sm:$0xff]  ;;  %v2436_v23 = vld [vmem:[#allocation29] sm:$0xff] }
 0xb00   :  { %v2441_v21 = vld [vmem:[#allocation29 + $0x28] sm:$0xff]  ;;  %v2440_v24 = vld [vmem:[#allocation29 + $0x20] sm:$0xff] }
 0xb01   :  { %4312 = vmatpush1.bf16.msra.mxu1 %v4311_v26  ;;  %v2194_v26 = vld [vmem:[#allocation26 + $0x80] sm:$0xff] }
 0xb97   :  { %v1908_v15 = vpop.f32.mrb[20].mxu1 }
 0xb98   :  { %v1909_v30 = vadd.f32 %v1908_v15, %v1829_v28  ;;  %v1910_v22 = vpop.f32.mrb[21].mxu1  ;;  %v2207_v15 = vld [vmem:[#allocation26 + $0xe8] sm:$0xff] }
 0xb99   :  { %v1911_v31 = vadd.f32 %v1910_v22, %v1833_v29  ;;  %v2202_v22 = vld [vmem:[#allocation26 + $0xc0] sm:$0xff] }
 0xb9a   :  { %v1919_v2 = vmax.f32 %v1909_v30, 0.0 }
 0xb9b   :  { %v1920_v1 = vmax.f32 %v1911_v31, 0.0  ;;  %v1914_v32 = vpop.f32.mrb[22].mxu1  ;;  %v2206_v31 = vld [vmem:[#allocation26 + $0xe0] sm:$0xff] }
 0xb9c   :  { %v1915_v39 = vadd.f32 %v1914_v32, %v1829_v28  ;;  %v1916_v33 = vpop.f32.mrb[23].mxu1  ;;  %v4323_v28 = vpack.c.bf16 %v2198_v27, %v2194_v26  ;;  %v2215_v32 = vld [vmem:[#allocation26 + $0x128] sm:$0xff] }
 0xb9d   :  { %2063 = vmatprep.mubr.f32.mxu1 %v1920_v1  ;;  %v1917_v17 = vadd.f32 %v1916_v33, %v1833_v29  ;;  %v2203_v29 = vld [vmem:[#allocation26 + $0xc8] sm:$0xff]  ;;  %v4327_v1 = vpack.c.bf16 %v2206_v31, %v2202_v22  ;;  %v2210_v33 = vld [vmem:[#allocation26 + $0x100] sm:$0xff] }
 0xb9e   :  { %2064 = vmatmul.mubr.f32.vlgmr.msra.gmra.mrb[24].mxu1 %v1919_v2  ;;  %v1921_v35 = vmax.f32 %v1915_v39, 0.0  ;;  %v4325_v30 = vpack.c.bf16 %v2207_v15, %v2203_v29  ;;  %v2211_v2 = vld [vmem:[#allocation26 + $0x108] sm:$0xff] }
 0xb9f   :  { %v1922_v34 = vmax.f32 %v1917_v17, 0.0  ;;  %v4329_v39 = vpack.c.bf16 %v2215_v32, %v2211_v2  ;;  %v2214_v17 = vld [vmem:[#allocation26 + $0x120] sm:$0xff]  ;;  %v2445_v26 = vld [vmem:[#allocation29 + $0x48] sm:$0xff] }
 0xba0   :  { %v2449_v27 = vld [vmem:[#allocation29 + $0x68] sm:$0xff]  ;;  %v2444_v29 = vld [vmem:[#allocation29 + $0x40] sm:$0xff] }
 0xba1   :  { %2069 = vmatprep.mubr.f32.mxu1 %v1922_v34  ;;  %v4331_v34 = vpack.c.bf16 %v2214_v17, %v2210_v33  ;;  %v2448_v15 = vld [vmem:[#allocation29 + $0x60] sm:$0xff]  ;;  %v2453_v22 = vld [vmem:[#allocation29 + $0x88] sm:$0xff] }
 0xba2   :  { %2070 = vmatmul.mubr.f32.gmra.mrb[26].mxu1 %v1921_v35  ;;  %v2219_v35 = vld [vmem:[#allocation26 + $0x148] sm:$0xff] }
 0xba3   :  { %v2457_v31 = vld [vmem:[#allocation29 + $0xa8] sm:$0xff]  ;;  %v2452_v2 = vld [vmem:[#allocation29 + $0x80] sm:$0xff] }
 0xba4   :  { %v2456_v32 = vld [vmem:[#allocation29 + $0xa0] sm:$0xff]  ;;  %v2461_v33 = vld [vmem:[#allocation29 + $0xc8] sm:$0xff] }
 0xba5   :  { %v2465_v17 = vld [vmem:[#allocation29 + $0xe8] sm:$0xff] }
 0xc71   :  { %v2065_v41 = vpop.f32.mrb[24].mxu1 }
 0xc72   :  { %v2066_v62 = vadd.f32 %v2065_v41, %v1992_v60  ;;  %v2067_v11 = vpop.f32.mrb[25].mxu1  ;;  %v2222_v41 = vld [vmem:[#allocation26 + $0x160] sm:$0xff] }
 0xc73   :  { %v2068_v57 = vadd.f32 %v2067_v11, %v1996_v40  ;;  %v2227_v11 = vld [vmem:[#allocation26 + $0x188] sm:$0xff] }
 0xc74   :  { %v6558_v44 = vadd.f32 %v2066_v62, %v6364_v37 }
 0xc75   :  { %v6555_v42 = vadd.f32 %v2068_v57, %v6362_v36  ;;  %v2071_v47 = vpop.f32.mrb[26].mxu1  ;;  %v2231_v57 = vld [vmem:[#allocation26 + $0x1a8] sm:$0xff] }
 0xc76   :  { %v2072_v51 = vadd.f32 %v2071_v47, %v1992_v60  ;;  %v2073_v52 = vpop.f32.mrb[27].mxu1  ;;  %v2092_v37 = vmul.f32 %v6558_v44, %v6558_v44  ;;  %v4333_v60 = vpack.c.bf16 %v2223_v38, %v2219_v35  ;;  %v4337_v47 = vpack.c.bf16 %v2231_v57, %v2227_v11  ;;  %v2460_v35 = vld [vmem:[#allocation29 + $0xc0] sm:$0xff] }
 0xc77   :  { %v2082_v53 = vsel %vm699_vm2, %v6555_v42, 0.0  ;;  %v2093_v54 = vmul.f32 %v6555_v42, %v6555_v42  ;;  %v2074_v55 = vadd.f32 %v2073_v52, %v1996_v40  ;;  %v2218_v40 = vld [vmem:[#allocation26 + $0x140] sm:$0xff] }
 0xc78   :  { %v2083_v58 = vadd.f32 %v2082_v53, %v6558_v44  ;;  %v6572_v63 = vadd.f32 %v2072_v51, %v6383_v50  ;;  %v2179_v50 = vld [vmem:[#allocation26 + $0x8] sm:$0xff]  ;;  %v4335_v62 = vpack.c.bf16 %v2222_v41, %v2218_v40  ;;  %v2226_v51 = vld [vmem:[#allocation26 + $0x180] sm:$0xff] }
 0xc79   :  { %v2096_v61 = vsel %vm699_vm2, %v2093_v54, 0.0  ;;  %v6567_v36 = vadd.f32 %v2074_v55, %v6381_v49  ;;  %v4313_v13 = vpack.c.bf16 %v2183_v10, %v2179_v50  ;;  %v2230_v52 = vld [vmem:[#allocation26 + $0x1a0] sm:$0xff]  ;;  %v2235_v53 = vld [vmem:[#allocation26 + $0x1c8] sm:$0xff] }
 0xc7a   :  { %2084 = vadd.xlane.f32.xlu0 %v2083_v58  ;;  %v2097_v4 = vadd.f32 %v2096_v61, %v2092_v37  ;;  %v2094_v8 = vmul.f32 %v6572_v63, %v6572_v63  ;;  %v4339_v54 = vpack.c.bf16 %v2230_v52, %v2226_v51  ;;  %v2239_v55 = vld [vmem:[#allocation26 + $0x1e8] sm:$0xff]  ;;  %v2234_v58 = vld [vmem:[#allocation26 + $0x1c0] sm:$0xff] }
 0xc7b   :  { %v2086_v0 = vsel %vm699_vm2, %v6567_v36, 0.0  ;;  %v2095_v6 = vmul.f32 %v6567_v36, %v6567_v36  ;;  %4314 = vmatprep.subr.bf16.mxu0 %v4313_v13  ;;  %v2238_v61 = vld [vmem:[#allocation26 + $0x1e0] sm:$0xff]  ;;  %v4341_v37 = vpack.c.bf16 %v2239_v55, %v2235_v53  ;;  %v2255_v50 = vld [vmem:[#allocation26 + $0x268] sm:$0xff] }
 0xc7c   :  { %v2087_v7 = vadd.f32 %v2086_v0, %v6572_v63  ;;  %4316 = vmatpush1.bf16.msra.mxu0 %v4315_v16  ;;  %v2243_v0 = vld [vmem:[#allocation26 + $0x208] sm:$0xff]  ;;  %v4351_v16 = vpack.c.bf16 %v2254_v14, %v2250_v59 }
 0xc7d   :  { %v2100_v49 = vsel %vm699_vm2, %v2095_v6, 0.0  ;;  %4318 = vmatprep.subr.bf16.mxu0 %v4317_v5  ;;  %v4343_v6 = vpack.c.bf16 %v2238_v61, %v2234_v58  ;;  %v4353_v5 = vpack.c.bf16 %v2185_v19, %v2181_v18  ;;  %v2464_v38 = vld [vmem:[#allocation29 + $0xe0] sm:$0xff]  ;;  %v2469_v40 = vld [vmem:[#allocation29 + $0x108] sm:$0xff] }
 0xc7e   :  { %2098 = vadd.xlane.f32.xlu0 %v2097_v4  ;;  %2088 = vadd.xlane.f32.xlu1 %v2087_v7  ;;  %v2101_v9 = vadd.f32 %v2100_v49, %v2094_v8  ;;  %v2247_v4 = vld [vmem:[#allocation26 + $0x228] sm:$0xff]  ;;  %v2242_v49 = vld [vmem:[#allocation26 + $0x200] sm:$0xff] }
 0xc7f   :  { %v4345_v7 = vpack.c.bf16 %v2247_v4, %v2243_v0  ;;  %v2246_v8 = vld [vmem:[#allocation26 + $0x220] sm:$0xff]  ;;  %v2473_v41 = vld [vmem:[#allocation29 + $0x128] sm:$0xff] }
 0xc80   :  { %4320 = vmatpush1.bf16.msra.mxu0 %v4319_v3  ;;  %v4347_v10 = vpack.c.bf16 %v2246_v8, %v2242_v49  ;;  %v4393_v3 = vpack.c.bf16 %v2441_v21, %v2437_v20  ;;  %v2468_v11 = vld [vmem:[#allocation29 + $0x100] sm:$0xff]  ;;  %v2477_v51 = vld [vmem:[#allocation29 + $0x148] sm:$0xff] }
 0xc81   :  { %4322 = vmatprep.subr.bf16.mxu0 %v4321_v25  ;;  %v4395_v25 = vpack.c.bf16 %v2440_v24, %v2436_v23  ;;  %v2472_v57 = vld [vmem:[#allocation29 + $0x120] sm:$0xff]  ;;  %v2481_v52 = vld [vmem:[#allocation29 + $0x168] sm:$0xff] }
 0xc82   :  { %2102 = vadd.xlane.f32.xlu1 %v2101_v9  ;;  %v2251_v9 = vld [vmem:[#allocation26 + $0x248] sm:$0xff]  ;;  %4394 = vmatprep.subr.bf16.mxu1 %v4393_v3  ;;  %v4413_v53 = vpack.c.bf16 %v2481_v52, %v2477_v51 }
 0xc83   :  { %v4349_v13 = vpack.c.bf16 %v2255_v50, %v2251_v9  ;;  %4396 = vmatpush1.bf16.msra.mxu1 %v4395_v25  ;;  %v2480_v55 = vld [vmem:[#allocation29 + $0x160] sm:$0xff]  ;;  %v2485_v61 = vld [vmem:[#allocation29 + $0x188] sm:$0xff] }
 0xc84   :  { %4324 = vmatpush1.bf16.msra.mxu0 %v4323_v28  ;;  %v4397_v28 = vpack.c.bf16 %v2449_v27, %v2445_v26  ;;  %v2484_v4 = vld [vmem:[#allocation29 + $0x180] sm:$0xff]  ;;  %v2493_v49 = vld [vmem:[#allocation29 + $0x1c8] sm:$0xff] }
 0xc85   :  { %4326 = vmatprep.subr.bf16.mxu0 %v4325_v30  ;;  %v4399_v30 = vpack.c.bf16 %v2448_v15, %v2444_v29  ;;  %v2497_v8 = vld [vmem:[#allocation29 + $0x1e8] sm:$0xff]  ;;  %v2492_v50 = vld [vmem:[#allocation29 + $0x1c0] sm:$0xff] }
 0xc86   :  { %4398 = vmatprep.subr.bf16.mxu1 %v4397_v28  ;;  %v4421_v9 = vpack.c.bf16 %v2497_v8, %v2493_v49  ;;  %v2501_v59 = vld [vmem:[#allocation29 + $0x208] sm:$0xff]  ;;  %v2500_v18 = vld [vmem:[#allocation29 + $0x200] sm:$0xff] }
 0xc87   :  { %4400 = vmatpush1.bf16.msra.mxu1 %v4399_v30  ;;  %v2505_v14 = vld [vmem:[#allocation29 + $0x228] sm:$0xff]  ;;  %v2504_v19 = vld [vmem:[#allocation29 + $0x220] sm:$0xff] }
 0xc88   :  { %4328 = vmatpush1.bf16.msra.mxu0 %v4327_v1  ;;  %v4401_v1 = vpack.c.bf16 %v2457_v31, %v2453_v22  ;;  %v2509_v20 = vld [vmem:[#allocation29 + $0x248] sm:$0xff]  ;;  %v2508_v23 = vld [vmem:[#allocation29 + $0x240] sm:$0xff] }
 0xc89   :  { %4330 = vmatprep.subr.bf16.mxu0 %v4329_v39  ;;  %v4403_v39 = vpack.c.bf16 %v2456_v32, %v2452_v2  ;;  %v2513_v21 = vld [vmem:[#allocation29 + $0x268] sm:$0xff]  ;;  %v2512_v24 = vld [vmem:[#allocation29 + $0x260] sm:$0xff] }
 0xc8a   :  { %4402 = vmatprep.subr.bf16.mxu1 %v4401_v1  ;;  %v4429_v3 = vpack.c.bf16 %v2513_v21, %v2509_v20  ;;  %v4431_v25 = vpack.c.bf16 %v2512_v24, %v2508_v23  ;;  %v2517_v26 = vld [vmem:[#allocation29 + $0x288] sm:$0xff]  ;;  %v2516_v29 = vld [vmem:[#allocation29 + $0x280] sm:$0xff] }
 0xc8b   :  { %4404 = vmatpush1.bf16.msra.mxu1 %v4403_v39  ;;  %v2521_v27 = vld [vmem:[#allocation29 + $0x2a8] sm:$0xff]  ;;  %v2520_v15 = vld [vmem:[#allocation29 + $0x2a0] sm:$0xff] }
 0xc8c   :  { %4332 = vmatpush1.bf16.msra.mxu0 %v4331_v34  ;;  %v4405_v34 = vpack.c.bf16 %v2465_v17, %v2461_v33  ;;  %v4433_v28 = vpack.c.bf16 %v2521_v27, %v2517_v26  ;;  %v4435_v22 = vpack.c.bf16 %v2520_v15, %v2516_v29  ;;  %v2525_v1 = vld [vmem:[#allocation29 + $0x2c8] sm:$0xff]  ;;  %v2524_v39 = vld [vmem:[#allocation29 + $0x2c0] sm:$0xff] }
 0xc8d   :  { %4334 = vmatprep.subr.bf16.mxu0 %v4333_v60  ;;  %v4407_v60 = vpack.c.bf16 %v2464_v38, %v2460_v35  ;;  %v2529_v2 = vld [vmem:[#allocation29 + $0x2e8] sm:$0xff]  ;;  %v2528_v33 = vld [vmem:[#allocation29 + $0x2e0] sm:$0xff] }
 0xc8e   :  { %4406 = vmatprep.subr.bf16.mxu1 %v4405_v34  ;;  %v4437_v32 = vpack.c.bf16 %v2529_v2, %v2525_v1  ;;  %v4439_v34 = vpack.c.bf16 %v2528_v33, %v2524_v39  ;;  %v2549_v8 = vld [vmem:[#allocation29 + $0x388] sm:$0xff] }
 0xc8f   :  { %4408 = vmatpush1.bf16.msra.mxu1 %v4407_v60 }
 0xc90   :  { %4336 = vmatpush1.bf16.msra.mxu0 %v4335_v62  ;;  %v4409_v62 = vpack.c.bf16 %v2473_v41, %v2469_v40  ;;  %v2533_v40 = vld [vmem:[#allocation29 + $0x308] sm:$0xff] }
 0xc91   :  { %4338 = vmatprep.subr.bf16.mxu0 %v4337_v47  ;;  %v4411_v47 = vpack.c.bf16 %v2472_v57, %v2468_v11  ;;  %v2537_v41 = vld [vmem:[#allocation29 + $0x328] sm:$0xff]  ;;  %v2532_v57 = vld [vmem:[#allocation29 + $0x300] sm:$0xff] }
 0xc92   :  { %4410 = vmatprep.subr.bf16.mxu1 %v4409_v62  ;;  %v4441_v11 = vpack.c.bf16 %v2537_v41, %v2533_v40 }
 0xc93   :  { %4412 = vmatpush1.bf16.msra.mxu1 %v4411_v47  ;;  %v2536_v47 = vld [vmem:[#allocation29 + $0x320] sm:$0xff] }
 0xc94   :  { %4340 = vmatpush1.bf16.msra.mxu0 %v4339_v54  ;;  %v2476_v54 = vld [vmem:[#allocation29 + $0x140] sm:$0xff]  ;;  %4414 = vmatprep.subr.bf16.mxu1 %v4413_v53  ;;  %v4443_v52 = vpack.c.bf16 %v2536_v47, %v2532_v57 }
 0xc95   :  { %4342 = vmatprep.subr.bf16.mxu0 %v4341_v37  ;;  %v4415_v58 = vpack.c.bf16 %v2480_v55, %v2476_v54  ;;  %v2489_v37 = vld [vmem:[#allocation29 + $0x1a8] sm:$0xff] }
 0xc96   :  { %v4417_v0 = vpack.c.bf16 %v2489_v37, %v2485_v61  ;;  %v2541_v55 = vld [vmem:[#allocation29 + $0x348] sm:$0xff] }
 0xc97   :  { %4416 = vmatpush1.bf16.msra.mxu1 %v4415_v58  ;;  %v2545_v58 = vld [vmem:[#allocation29 + $0x368] sm:$0xff] }
 0xc98   :  { %4344 = vmatpush1.bf16.msra.mxu0 %v4343_v6  ;;  %v2488_v6 = vld [vmem:[#allocation29 + $0x1a0] sm:$0xff]  ;;  %4418 = vmatprep.subr.bf16.mxu1 %v4417_v0  ;;  %v4445_v0 = vpack.c.bf16 %v2545_v58, %v2541_v55 }
 0xc99   :  { %4346 = vmatprep.subr.bf16.mxu0 %v4345_v7  ;;  %v4419_v7 = vpack.c.bf16 %v2488_v6, %v2484_v4  ;;  %v2540_v4 = vld [vmem:[#allocation29 + $0x340] sm:$0xff] }
 0xc9a   :  { %v2544_v6 = vld [vmem:[#allocation29 + $0x360] sm:$0xff] }
 0xc9b   :  { %4420 = vmatpush1.bf16.msra.mxu1 %v4419_v7  ;;  %v4447_v49 = vpack.c.bf16 %v2544_v6, %v2540_v4  ;;  %v2184_v4 = vld [vmem:[#allocation26 + $0x30] sm:$0xff] }
 0xc9c   :  { %4348 = vmatpush1.bf16.msra.mxu0 %v4347_v10  ;;  %v2496_v10 = vld [vmem:[#allocation29 + $0x1e0] sm:$0xff]  ;;  %4422 = vmatprep.subr.bf16.mxu1 %v4421_v9  ;;  %v2553_v9 = vld [vmem:[#allocation29 + $0x3a8] sm:$0xff] }
 0xc9d   :  { %4350 = vmatprep.subr.bf16.mxu0 %v4349_v13  ;;  %v4423_v13 = vpack.c.bf16 %v2496_v10, %v2492_v50  ;;  %v4449_v10 = vpack.c.bf16 %v2553_v9, %v2549_v8 }
 0xc9f   :  { %4424 = vmatpush1.bf16.msra.mxu1 %v4423_v13  ;;  %v2548_v13 = vld [vmem:[#allocation29 + $0x380] sm:$0xff] }
 0xca0   :  { %4352 = vmatpush1.bf16.msra.mxu0 %v4351_v16  ;;  %v4425_v16 = vpack.c.bf16 %v2505_v14, %v2501_v59  ;;  %v2552_v59 = vld [vmem:[#allocation29 + $0x3a0] sm:$0xff] }
 0xca1   :  { %4354 = vmatprep.subr.bf16.mxu0 %v4353_v5  ;;  %v4427_v5 = vpack.c.bf16 %v2504_v19, %v2500_v18  ;;  %v4451_v14 = vpack.c.bf16 %v2552_v59, %v2548_v13  ;;  %v2081_v18 = vld [vmem:[#allocation20] sm:$0x3] }
 0xca2   :  { %4426 = vmatprep.subr.bf16.mxu1 %v4425_v16  ;;  %v2080_v16 = vld [vmem:[#allocation19] sm:$0x3]  ;;  %v2141_v26 = vrot.slane %v2081_v18, %v5998_v48 }
 0xca3   :  { %4428 = vmatpush1.bf16.msra.mxu1 %v4427_v5  ;;  %v2126_v20 = vrot.slane %v2080_v16, %v5998_v48  ;;  %v2130_v21 = vrot.slane %v2080_v16, %v5995_v46  ;;  %v2192_v16 = vld [vmem:[#allocation26 + $0x70] sm:$0xff] }
 0xca4   :  { %4430 = vmatprep.subr.bf16.mxu1 %v4429_v3 }
 0xca7   :  { %4432 = vmatpush1.bf16.msra.mxu1 %v4431_v25  ;;  %v2145_v25 = vrot.slane %v2081_v18, %v5995_v46 }
 0xca8   :  { %4434 = vmatprep.subr.bf16.mxu1 %v4433_v28 }
 0xcab   :  { %4436 = vmatpush1.bf16.msra.mxu1 %v4435_v22 }
 0xcac   :  { %4438 = vmatprep.subr.bf16.mxu1 %v4437_v32 }
 0xcaf   :  { %4440 = vmatpush1.bf16.msra.mxu1 %v4439_v34 }
 0xcb0   :  { %4442 = vmatprep.subr.bf16.mxu1 %v4441_v11 }
 0xcb3   :  { %4444 = vmatpush1.bf16.msra.mxu1 %v4443_v52 }
 0xcb4   :  { %4446 = vmatprep.subr.bf16.mxu1 %v4445_v0  ;;  %v2180_v0 = vld [vmem:[#allocation26 + $0x10] sm:$0xff] }
 0xcb7   :  { %4448 = vmatpush1.bf16.msra.mxu1 %v4447_v49  ;;  %v2193_v49 = vld [vmem:[#allocation26 + $0x78] sm:$0xff] }
 0xcb8   :  { %4450 = vmatprep.subr.bf16.mxu1 %v4449_v10  ;;  %v4355_v10 = vpack.c.bf16 %v2184_v4, %v2180_v0 }
 0xcbb   :  { %4452 = vmatpush1.bf16.msra.mxu1 %v4451_v14  ;;  %v2188_v14 = vld [vmem:[#allocation26 + $0x50] sm:$0xff] }
 0xd07   :  { %v2085_v30 = vpop.xlane.xlu0 %2084 }
 0xd08   :  { %v2090_v31 = vmul.f32 0.00625, %v2085_v30 }
 0xd0a   :  { %v2106_v38 = vmul.f32 %v2090_v31, %v2090_v31  ;;  %v2110_v19 = vsub.f32 %v6558_v44, %v2090_v31  ;;  %v2111_v5 = vsub.f32 %v6555_v42, %v2090_v31 }
 0xd0b   :  { %v2099_v17 = vpop.xlane.xlu0 %2098  ;;  %v2089_v35 = vpop.xlane.xlu1 %2088 }
 0xd0c   :  { %v2104_v60 = vmul.f32 0.00625, %v2099_v17  ;;  %v2091_v62 = vmul.f32 0.00625, %v2089_v35 }
 0xd0e   :  { %v2108_v51 = vsub.f32 %v2104_v60, %v2106_v38  ;;  %v2107_v61 = vmul.f32 %v2091_v62, %v2091_v62  ;;  %v2112_v29 = vsub.f32 %v6572_v63, %v2091_v62  ;;  %v2113_v44 = vsub.f32 %v6567_v36, %v2091_v62 }
 0xd0f   :  { %v2103_v54 = vpop.xlane.xlu1 %2102 }
 0xd10   :  { %v2114_v53 = vadd.f32 1e-05, %v2108_v51  ;;  %v2105_v37 = vmul.f32 0.00625, %v2103_v54 }
 0xd12   :  { %5040 = vrsqrt.f32 %v2114_v53  ;;  %v2109_v7 = vsub.f32 %v2105_v37, %v2107_v61 }
 0xd14   :  { %v2115_v50 = vadd.f32 1e-05, %v2109_v7  ;;  %v2189_v7 = vld [vmem:[#allocation26 + $0x58] sm:$0xff] }
 0xd15   :  { %v4357_v59 = vpack.c.bf16 %v2193_v49, %v2189_v7  ;;  %v2256_v7 = vld [vmem:[#allocation26 + $0x270] sm:$0xff]  ;;  %v2439_v49 = vld [vmem:[#allocation29 + $0x18] sm:$0xff] }
 0xd16   :  { %5042 = vrsqrt.f32 %v2115_v50 }
 0xd1c   :  { %v5041_v3 = vpop.eup %5040 }
 0xd1d   :  { %v2118_v23 = vmul.f32 %v5041_v3, %v2110_v19  ;;  %v2119_v24 = vmul.f32 %v5041_v3, %v2111_v5  ;;  %v2197_v19 = vld [vmem:[#allocation26 + $0x98] sm:$0xff]  ;;  %v2196_v3 = vld [vmem:[#allocation26 + $0x90] sm:$0xff] }
 0xd1e   :  { %v2201_v5 = vld [vmem:[#allocation26 + $0xb8] sm:$0xff] }
 0xd1f   :  { %v2133_v27 = vmul.f32 %v2126_v20, %v2118_v23  ;;  %v2134_v28 = vmul.f32 %v2130_v21, %v2119_v24  ;;  %v2200_v23 = vld [vmem:[#allocation26 + $0xb0] sm:$0xff]  ;;  %v2205_v24 = vld [vmem:[#allocation26 + $0xd8] sm:$0xff] }
 0xd20   :  { %v5043_v15 = vpop.eup %5042 }
 0xd21   :  { %v2149_v42 = vadd.f32 %v2145_v25, %v2134_v28  ;;  %v2148_v30 = vadd.f32 %v2141_v26, %v2133_v27  ;;  %v2120_v22 = vmul.f32 %v5043_v15, %v2112_v29  ;;  %v2121_v31 = vmul.f32 %v5043_v15, %v2113_v44  ;;  %v2204_v28 = vld [vmem:[#allocation26 + $0xd0] sm:$0xff]  ;;  %v2213_v44 = vld [vmem:[#allocation26 + $0x118] sm:$0xff] }
 0xd22   :  { %v2208_v29 = vld [vmem:[#allocation26 + $0xf0] sm:$0xff]  ;;  %v2217_v15 = vld [vmem:[#allocation26 + $0x138] sm:$0xff] }
 0xd23   :  { %v2158_v1 = vsel %vm699_vm2, %v2149_v42, 0.0  ;;  %v2152_v2 = vrot.slane %v2148_v30, 4  ;;  %v2135_v32 = vmul.f32 %v2126_v20, %v2120_v22  ;;  %v2136_v39 = vmul.f32 %v2130_v21, %v2121_v31  ;;  %v2212_v22 = vld [vmem:[#allocation26 + $0x110] sm:$0xff] }
 0xd24   :  { %v2159_v33 = vrot.slane %v2158_v1, 4  ;;  %v4359_v20 = vpack.c.bf16 %v2192_v16, %v2188_v14  ;;  %v4361_v21 = vpack.c.bf16 %v2201_v5, %v2197_v19  ;;  %v4367_v42 = vpack.c.bf16 %v2208_v29, %v2204_v28  ;;  %v2216_v31 = vld [vmem:[#allocation26 + $0x130] sm:$0xff]  ;;  %v2451_v14 = vld [vmem:[#allocation29 + $0x78] sm:$0xff] }
 0xd25   :  { %v2153_v17 = vadd.f32 %v2152_v2, %v2148_v30  ;;  %v2151_v34 = vadd.f32 %v2145_v25, %v2136_v39  ;;  %v2150_v38 = vadd.f32 %v2141_v26, %v2135_v32  ;;  %v2209_v25 = vld [vmem:[#allocation26 + $0xf8] sm:$0xff]  ;;  %v4363_v26 = vpack.c.bf16 %v2200_v23, %v2196_v3 }
 0xd26   :  { %v2160_v35 = vadd.f32 %v2159_v33, %v2158_v1  ;;  %v4365_v27 = vpack.c.bf16 %v2209_v25, %v2205_v24  ;;  %v4369_v30 = vpack.c.bf16 %v2217_v15, %v2213_v44  ;;  %v2221_v1 = vld [vmem:[#allocation26 + $0x158] sm:$0xff]  ;;  %v4371_v32 = vpack.c.bf16 %v2216_v31, %v2212_v22  ;;  %v2220_v33 = vld [vmem:[#allocation26 + $0x150] sm:$0xff] }
 0xd27   :  { %v2171_v63 = vsel %vm699_vm2, %v2151_v34, 0.0  ;;  %v2154_v40 = vrot.slane %v2153_v17, 2  ;;  %v2165_v36 = vrot.slane %v2150_v38, 4  ;;  %v2225_v2 = vld [vmem:[#allocation26 + $0x178] sm:$0xff] }
 0xd28   :  { %v2161_v60 = vrot.slane %v2160_v35, 2  ;;  %v2172_v41 = vrot.slane %v2171_v63, 4  ;;  %v4373_v39 = vpack.c.bf16 %v2225_v2, %v2221_v1  ;;  %v2229_v34 = vld [vmem:[#allocation26 + $0x198] sm:$0xff] }
 0xd29   :  { %v2166_v62 = vadd.f32 %v2165_v36, %v2150_v38  ;;  %v2155_v47 = vadd.f32 %v2154_v40, %v2153_v17  ;;  %v2224_v17 = vld [vmem:[#allocation26 + $0x170] sm:$0xff]  ;;  %v2237_v36 = vld [vmem:[#allocation26 + $0x1d8] sm:$0xff] }
 0xd2a   :  { %v2162_v11 = vadd.f32 %v2161_v60, %v2160_v35  ;;  %v2173_v57 = vadd.f32 %v2172_v41, %v2171_v63  ;;  %v2233_v35 = vld [vmem:[#allocation26 + $0x1b8] sm:$0xff]  ;;  %v4375_v38 = vpack.c.bf16 %v2224_v17, %v2220_v33  ;;  %v2228_v63 = vld [vmem:[#allocation26 + $0x190] sm:$0xff] }
 0xd2b   :  { %v2167_v51 = vrot.slane %v2166_v62, 2  ;;  %v2156_v58 = vrot.slane %v2155_v47, 1  ;;  %v4377_v60 = vpack.c.bf16 %v2233_v35, %v2229_v34  ;;  %v2232_v40 = vld [vmem:[#allocation26 + $0x1b0] sm:$0xff]  ;;  %v2241_v41 = vld [vmem:[#allocation26 + $0x1f8] sm:$0xff] }
 0xd2c   :  { %v2174_v52 = vrot.slane %v2173_v57, 2  ;;  %v2163_v54 = vrot.slane %v2162_v11, 1  ;;  %v2446_v5 = vld [vmem:[#allocation29 + $0x50] sm:$0xff]  ;;  %v2459_v3 = vld [vmem:[#allocation29 + $0xb8] sm:$0xff] }
 0xd2d   :  { %v2168_v53 = vadd.f32 %v2167_v51, %v2166_v62  ;;  %v2157_v50 = vadd.f32 %v2156_v58, %v2155_v47  ;;  %v4379_v62 = vpack.c.bf16 %v2232_v40, %v2228_v63  ;;  %v2240_v47 = vld [vmem:[#allocation26 + $0x1f0] sm:$0xff]  ;;  %v2245_v51 = vld [vmem:[#allocation26 + $0x218] sm:$0xff] }
 0xd2e   :  { %v2175_v55 = vadd.f32 %v2174_v52, %v2173_v57  ;;  %v2164_v8 = vadd.f32 %v2163_v54, %v2162_v11  ;;  %v4381_v11 = vpack.c.bf16 %v2241_v41, %v2237_v36  ;;  %v2236_v57 = vld [vmem:[#allocation26 + $0x1d0] sm:$0xff]  ;;  %v2249_v52 = vld [vmem:[#allocation26 + $0x238] sm:$0xff] }
 0xd2f   :  { %v2169_v61 = vrot.slane %v2168_v53, 1  ;;  %v4385_v54 = vpack.c.bf16 %v2249_v52, %v2245_v51  ;;  %v2248_v58 = vld [vmem:[#allocation26 + $0x230] sm:$0xff]  ;;  %v2467_v28 = vld [vmem:[#allocation29 + $0xf8] sm:$0xff] }
 0xd30   :  { %v2176_v37 = vrot.slane %v2175_v55, 1  ;;  %v2454_v25 = vld [vmem:[#allocation29 + $0x90] sm:$0xff]  ;;  %v2475_v22 = vld [vmem:[#allocation29 + $0x138] sm:$0xff] }
 0xd31   :  { %v2170_v6 = vadd.f32 %v2169_v61, %v2168_v53  ;;  %v4383_v53 = vpack.c.bf16 %v2240_v47, %v2236_v57  ;;  %v2253_v61 = vld [vmem:[#allocation26 + $0x258] sm:$0xff] }
 0xd32   :  { %v2177_v9 = vadd.f32 %v2176_v37, %v2175_v55  ;;  %v2244_v55 = vld [vmem:[#allocation26 + $0x210] sm:$0xff]  ;;  %v2257_v37 = vld [vmem:[#allocation26 + $0x278] sm:$0xff] }
 0xd33   :  { %v6593_v18 = vsel %vm2284_vm5, %v2170_v6, %v2157_v50  ;;  %v4387_v0 = vpack.c.bf16 %v2248_v58, %v2244_v55  ;;  %v4389_v4 = vpack.c.bf16 %v2257_v37, %v2253_v61  ;;  %v2252_v6 = vld [vmem:[#allocation26 + $0x250] sm:$0xff] }
 0xd34   :  { %v2286_v13 = vsel %vm2284_vm5, %v2177_v9, %v2164_v8  ;;  %v2443_v8 = vld [vmem:[#allocation29 + $0x38] sm:$0xff]  ;;  %v4391_v9 = vpack.c.bf16 %v2256_v7, %v2252_v6  ;;  %v2462_v15 = vld [vmem:[#allocation29 + $0xd0] sm:$0xff] }
 0xd35   :  { %3848 = vmatprep.mubr.msk.f32.mxu0 %vm699_vm2, %v2286_v13  ;;  %v4521_v50 = vpack.c.bf16 %v2443_v8, %v2439_v49  ;;  %v2470_v1 = vld [vmem:[#allocation29 + $0x110] sm:$0xff] }
 0xd36   :  { %2355 = vmatmul.mubr.f32.vlgmr.msra.gmra.mrb[18].mxu0 %v6593_v18  ;;  %v2474_v2 = vld [vmem:[#allocation29 + $0x130] sm:$0xff] }
 0xd37   :  { %4356 = vmatpush1.bf16.msra.mxu0 %v4355_v10  ;;  %3849 = vmatprep.mubr.msk.f32.mxu0 %vm699_vm2, %v2286_v13  ;;  %v2438_v10 = vld [vmem:[#allocation29 + $0x10] sm:$0xff]  ;;  %v4539_v33 = vpack.c.bf16 %v2474_v2, %v2470_v1 }
 0xd38   :  { %4358 = vmatprep.subr.bf16.mxu0 %v4357_v59  ;;  %v2442_v13 = vld [vmem:[#allocation29 + $0x30] sm:$0xff]  ;;  %v2447_v59 = vld [vmem:[#allocation29 + $0x58] sm:$0xff] }
 0xd39   :  { %v4523_v16 = vpack.c.bf16 %v2442_v13, %v2438_v10  ;;  %v4525_v19 = vpack.c.bf16 %v2451_v14, %v2447_v59  ;;  %v2478_v34 = vld [vmem:[#allocation29 + $0x150] sm:$0xff] }
 0xd3a   :  { %v2482_v35 = vld [vmem:[#allocation29 + $0x170] sm:$0xff] }
 0xd3b   :  { %4360 = vmatpush1.bf16.msra.mxu0 %v4359_v20  ;;  %v2450_v20 = vld [vmem:[#allocation29 + $0x70] sm:$0xff]  ;;  %v4543_v63 = vpack.c.bf16 %v2482_v35, %v2478_v34  ;;  %v2565_v34 = vld [vmem:[#allocation29 + $0x408] sm:$0xff] }
 0xd3c   :  { %4362 = vmatprep.subr.bf16.mxu0 %v4361_v21  ;;  %v2455_v21 = vld [vmem:[#allocation29 + $0x98] sm:$0xff]  ;;  %v4527_v23 = vpack.c.bf16 %v2450_v20, %v2446_v5  ;;  %v2486_v36 = vld [vmem:[#allocation29 + $0x190] sm:$0xff]  ;;  %v2569_v35 = vld [vmem:[#allocation29 + $0x428] sm:$0xff] }
 0xd3d   :  { %v4529_v24 = vpack.c.bf16 %v2459_v3, %v2455_v21  ;;  %v2490_v41 = vld [vmem:[#allocation29 + $0x1b0] sm:$0xff] }
 0xd3e   :  { %v4547_v57 = vpack.c.bf16 %v2490_v41, %v2486_v36  ;;  %v2494_v51 = vld [vmem:[#allocation29 + $0x1d0] sm:$0xff]  ;;  %v2559_v41 = vld [vmem:[#allocation29 + $0x3d8] sm:$0xff] }
 0xd3f   :  { %4364 = vmatpush1.bf16.msra.mxu0 %v4363_v26  ;;  %v2458_v26 = vld [vmem:[#allocation29 + $0xb0] sm:$0xff] }
 0xd40   :  { %4366 = vmatprep.subr.bf16.mxu0 %v4365_v27  ;;  %v2463_v27 = vld [vmem:[#allocation29 + $0xd8] sm:$0xff]  ;;  %v4531_v29 = vpack.c.bf16 %v2458_v26, %v2454_v25  ;;  %v2498_v52 = vld [vmem:[#allocation29 + $0x1f0] sm:$0xff] }
 0xd41   :  { %v4533_v44 = vpack.c.bf16 %v2467_v28, %v2463_v27  ;;  %v4551_v55 = vpack.c.bf16 %v2498_v52, %v2494_v51  ;;  %v2502_v61 = vld [vmem:[#allocation29 + $0x210] sm:$0xff]  ;;  %v2567_v52 = vld [vmem:[#allocation29 + $0x418] sm:$0xff] }
 0xd42   :  { %v2506_v37 = vld [vmem:[#allocation29 + $0x230] sm:$0xff] }
 0xd43   :  { %4368 = vmatpush1.bf16.msra.mxu0 %v4367_v42  ;;  %v2466_v42 = vld [vmem:[#allocation29 + $0xf0] sm:$0xff]  ;;  %v4555_v6 = vpack.c.bf16 %v2506_v37, %v2502_v61 }
 0xd44   :  { %4370 = vmatprep.subr.bf16.mxu0 %v4369_v30  ;;  %v2471_v30 = vld [vmem:[#allocation29 + $0x118] sm:$0xff]  ;;  %v4535_v31 = vpack.c.bf16 %v2466_v42, %v2462_v15  ;;  %v2510_v49 = vld [vmem:[#allocation29 + $0x250] sm:$0xff]  ;;  %v2557_v15 = vld [vmem:[#allocation29 + $0x3c8] sm:$0xff] }
 0xd45   :  { %v2514_v8 = vld [vmem:[#allocation29 + $0x270] sm:$0xff]  ;;  %v2561_v42 = vld [vmem:[#allocation29 + $0x3e8] sm:$0xff] }
 0xd46   :  { %v4559_v10 = vpack.c.bf16 %v2514_v8, %v2510_v49  ;;  %v2518_v59 = vld [vmem:[#allocation29 + $0x290] sm:$0xff] }
 0xd47   :  { %4372 = vmatpush1.bf16.msra.mxu0 %v4371_v32  ;;  %v2479_v32 = vld [vmem:[#allocation29 + $0x158] sm:$0xff]  ;;  %v2522_v14 = vld [vmem:[#allocation29 + $0x2b0] sm:$0xff] }
 0xd48   :  { %4374 = vmatprep.subr.bf16.mxu0 %v4373_v39  ;;  %v2483_v39 = vld [vmem:[#allocation29 + $0x178] sm:$0xff]  ;;  %v4563_v5 = vpack.c.bf16 %v2522_v14, %v2518_v59  ;;  %v2526_v21 = vld [vmem:[#allocation29 + $0x2d0] sm:$0xff] }
 0xd49   :  { %v4541_v17 = vpack.c.bf16 %v2483_v39, %v2479_v32  ;;  %v2530_v3 = vld [vmem:[#allocation29 + $0x2f0] sm:$0xff]  ;;  %v2575_v59 = vld [vmem:[#allocation29 + $0x458] sm:$0xff] }
 0xd4a   :  { %v4567_v25 = vpack.c.bf16 %v2530_v3, %v2526_v21  ;;  %v2534_v27 = vld [vmem:[#allocation29 + $0x310] sm:$0xff]  ;;  %v2579_v14 = vld [vmem:[#allocation29 + $0x478] sm:$0xff]  ;;  %v2576_v21 = vld [vmem:[#allocation29 + $0x460] sm:$0xff] }
 0xd4b   :  { %4376 = vmatpush1.bf16.msra.mxu0 %v4375_v38  ;;  %v2487_v38 = vld [vmem:[#allocation29 + $0x198] sm:$0xff]  ;;  %v2538_v28 = vld [vmem:[#allocation29 + $0x330] sm:$0xff] }
 0xd4c   :  { %4378 = vmatprep.subr.bf16.mxu0 %v4377_v60  ;;  %v2491_v60 = vld [vmem:[#allocation29 + $0x1b8] sm:$0xff]  ;;  %v2542_v32 = vld [vmem:[#allocation29 + $0x350] sm:$0xff] }
 0xd4d   :  { %v4545_v40 = vpack.c.bf16 %v2491_v60, %v2487_v38  ;;  %v2546_v39 = vld [vmem:[#allocation29 + $0x370] sm:$0xff]  ;;  %v4457_v38 = vpack.c.bf16 %v2569_v35, %v2565_v34 }
 0xd4e   :  { %v4575_v60 = vpack.c.bf16 %v2546_v39, %v2542_v32  ;;  %v2554_v36 = vld [vmem:[#allocation29 + $0x3b0] sm:$0xff]  ;;  %v2589_v32 = vld [vmem:[#allocation29 + $0x4c8] sm:$0xff] }
 0xd4f   :  { %4380 = vmatpush1.bf16.msra.mxu0 %v4379_v62  ;;  %v2495_v62 = vld [vmem:[#allocation29 + $0x1d8] sm:$0xff]  ;;  %v2562_v51 = vld [vmem:[#allocation29 + $0x3f0] sm:$0xff]  ;;  %v2593_v39 = vld [vmem:[#allocation29 + $0x4e8] sm:$0xff] }
 0xd50   :  { %4382 = vmatprep.subr.bf16.mxu0 %v4381_v11  ;;  %v2499_v11 = vld [vmem:[#allocation29 + $0x1f8] sm:$0xff]  ;;  %v2566_v8 = vld [vmem:[#allocation29 + $0x410] sm:$0xff] }
 0xd51   :  { %v4549_v47 = vpack.c.bf16 %v2499_v11, %v2495_v62  ;;  %v2563_v62 = vld [vmem:[#allocation29 + $0x3f8] sm:$0xff] }
 0xd53   :  { %4384 = vmatpush1.bf16.msra.mxu0 %v4383_v53  ;;  %v2503_v53 = vld [vmem:[#allocation29 + $0x218] sm:$0xff] }
 0xd54   :  { %4386 = vmatprep.subr.bf16.mxu0 %v4385_v54  ;;  %v2507_v54 = vld [vmem:[#allocation29 + $0x238] sm:$0xff] }
 0xd55   :  { %v4553_v58 = vpack.c.bf16 %v2507_v54, %v2503_v53  ;;  %v2571_v53 = vld [vmem:[#allocation29 + $0x438] sm:$0xff] }
 0xd57   :  { %4388 = vmatpush1.bf16.msra.mxu0 %v4387_v0  ;;  %v2511_v0 = vld [vmem:[#allocation29 + $0x258] sm:$0xff] }
 0xd58   :  { %4390 = vmatprep.subr.bf16.mxu0 %v4389_v4  ;;  %v2515_v4 = vld [vmem:[#allocation29 + $0x278] sm:$0xff] }
 0xd59   :  { %v4557_v7 = vpack.c.bf16 %v2515_v4, %v2511_v0  ;;  %v2564_v4 = vld [vmem:[#allocation29 + $0x400] sm:$0xff] }
 0xd5b   :  { %4392 = vmatpush1.bf16.msra.mxu0 %v4391_v9  ;;  %v2519_v9 = vld [vmem:[#allocation29 + $0x298] sm:$0xff] }
 0xd5c   :  { %4522 = vmatprep.subr.bf16.mxu0 %v4521_v50  ;;  %v2523_v50 = vld [vmem:[#allocation29 + $0x2b8] sm:$0xff] }
 0xd5d   :  { %v4561_v13 = vpack.c.bf16 %v2523_v50, %v2519_v9  ;;  %v2570_v9 = vld [vmem:[#allocation29 + $0x430] sm:$0xff]  ;;  %v2573_v50 = vld [vmem:[#allocation29 + $0x448] sm:$0xff] }
 0xd5e   :  { %2426 = vmatmul.mubr.f32.vlgmr.msra.gmra.mrb[20].mxu0 %v6593_v18  ;;  %v4537_v18 = vpack.c.bf16 %v2475_v22, %v2471_v30  ;;  %v4453_v30 = vpack.c.bf16 %v2561_v42, %v2557_v15  ;;  %v2556_v22 = vld [vmem:[#allocation29 + $0x3c0] sm:$0xff] }
 0xd5f   :  { %4524 = vmatpush1.bf16.msra.mxu0 %v4523_v16  ;;  %v2527_v16 = vld [vmem:[#allocation29 + $0x2d8] sm:$0xff] }
 0xd60   :  { %4526 = vmatprep.subr.bf16.mxu0 %v4525_v19  ;;  %v2531_v19 = vld [vmem:[#allocation29 + $0x2f8] sm:$0xff]  ;;  %4454 = vmatprep.subr.bf16.mxu1 %v4453_v30  ;;  %v2580_v30 = vld [vmem:[#allocation29 + $0x480] sm:$0xff] }
 0xd61   :  { %v4565_v20 = vpack.c.bf16 %v2531_v19, %v2527_v16 }
 0xd63   :  { %4528 = vmatpush1.bf16.msra.mxu0 %v4527_v23  ;;  %v2535_v23 = vld [vmem:[#allocation29 + $0x318] sm:$0xff] }
 0xd64   :  { %4530 = vmatprep.subr.bf16.mxu0 %v4529_v24  ;;  %v2539_v24 = vld [vmem:[#allocation29 + $0x338] sm:$0xff] }
 0xd65   :  { %v4569_v26 = vpack.c.bf16 %v2539_v24, %v2535_v23  ;;  %v4589_v24 = vpack.c.bf16 %v2579_v14, %v2575_v59  ;;  %v2606_v14 = vld [vmem:[#allocation29 + $0x550] sm:$0xff] }
 0xd67   :  { %4532 = vmatpush1.bf16.msra.mxu0 %v4531_v29  ;;  %v2543_v29 = vld [vmem:[#allocation29 + $0x358] sm:$0xff] }
 0xd68   :  { %4534 = vmatprep.subr.bf16.mxu0 %v4533_v44  ;;  %v2547_v44 = vld [vmem:[#allocation29 + $0x378] sm:$0xff] }
 0xd69   :  { %v4573_v2 = vpack.c.bf16 %v2547_v44, %v2543_v29  ;;  %v2583_v29 = vld [vmem:[#allocation29 + $0x498] sm:$0xff] }
 0xd6a   :  { %v2587_v44 = vld [vmem:[#allocation29 + $0x4b8] sm:$0xff] }
 0xd6b   :  { %4536 = vmatpush1.bf16.msra.mxu0 %v4535_v31  ;;  %v2560_v31 = vld [vmem:[#allocation29 + $0x3e0] sm:$0xff] }
 0xd6c   :  { %4538 = vmatprep.subr.bf16.mxu0 %v4537_v18  ;;  %v4571_v18 = vpack.c.bf16 %v2538_v28, %v2534_v27  ;;  %v4455_v1 = vpack.c.bf16 %v2560_v31, %v2556_v22  ;;  %v2581_v27 = vld [vmem:[#allocation29 + $0x488] sm:$0xff]  ;;  %v2584_v22 = vld [vmem:[#allocation29 + $0x4a0] sm:$0xff] }
 0xd6d   :  { %v2585_v28 = vld [vmem:[#allocation29 + $0x4a8] sm:$0xff]  ;;  %v4467_v34 = vpack.c.bf16 %v2584_v22, %v2580_v30  ;;  %v2627_v30 = vld [vmem:[#allocation29 + $0x5f8] sm:$0xff] }
 0xd6e   :  { %4456 = vmatpush1.bf16.msra.mxu1 %v4455_v1  ;;  %v4465_v31 = vpack.c.bf16 %v2585_v28, %v2581_v27  ;;  %v2582_v1 = vld [vmem:[#allocation29 + $0x490] sm:$0xff] }
 0xd6f   :  { %4540 = vmatpush1.bf16.msra.mxu0 %v4539_v33  ;;  %v2551_v33 = vld [vmem:[#allocation29 + $0x398] sm:$0xff]  ;;  %4458 = vmatprep.subr.bf16.mxu1 %v4457_v38  ;;  %v2588_v38 = vld [vmem:[#allocation29 + $0x4c0] sm:$0xff]  ;;  %v2614_v28 = vld [vmem:[#allocation29 + $0x590] sm:$0xff] }
 0xd70   :  { %4542 = vmatprep.subr.bf16.mxu0 %v4541_v17  ;;  %v2555_v17 = vld [vmem:[#allocation29 + $0x3b8] sm:$0xff] }
 0xd73   :  { %4544 = vmatpush1.bf16.msra.mxu0 %v4543_v63  ;;  %v4577_v63 = vpack.c.bf16 %v2555_v17, %v2551_v33  ;;  %v2591_v33 = vld [vmem:[#allocation29 + $0x4d8] sm:$0xff] }
 0xd74   :  { %4546 = vmatprep.subr.bf16.mxu0 %v4545_v40  ;;  %v2550_v40 = vld [vmem:[#allocation29 + $0x390] sm:$0xff]  ;;  %v2595_v17 = vld [vmem:[#allocation29 + $0x4f8] sm:$0xff] }
 0xd75   :  { %v4579_v11 = vpack.c.bf16 %v2554_v36, %v2550_v40  ;;  %v4597_v40 = vpack.c.bf16 %v2595_v17, %v2591_v33  ;;  %v2590_v36 = vld [vmem:[#allocation29 + $0x4d0] sm:$0xff]  ;;  %v2629_v17 = vld [vmem:[#allocation29 + $0x608] sm:$0xff] }
 0xd76   :  { %v2626_v33 = vld [vmem:[#allocation29 + $0x5f0] sm:$0xff] }
 0xd77   :  { %4548 = vmatpush1.bf16.msra.mxu0 %v4547_v57  ;;  %v4581_v57 = vpack.c.bf16 %v2563_v62, %v2559_v41  ;;  %v2594_v41 = vld [vmem:[#allocation29 + $0x4f0] sm:$0xff]  ;;  %v2597_v62 = vld [vmem:[#allocation29 + $0x508] sm:$0xff] }
 0xd78   :  { %4550 = vmatprep.subr.bf16.mxu0 %v4549_v47  ;;  %v2558_v47 = vld [vmem:[#allocation29 + $0x3d0] sm:$0xff] }
 0xd79   :  { %v4583_v54 = vpack.c.bf16 %v2562_v51, %v2558_v47  ;;  %v2603_v47 = vld [vmem:[#allocation29 + $0x538] sm:$0xff] }
 0xd7b   :  { %4552 = vmatpush1.bf16.msra.mxu0 %v4551_v55  ;;  %v4585_v55 = vpack.c.bf16 %v2571_v53, %v2567_v52  ;;  %v4599_v52 = vpack.c.bf16 %v2594_v41, %v2590_v36  ;;  %v2596_v53 = vld [vmem:[#allocation29 + $0x500] sm:$0xff] }
 0xd7c   :  { %4554 = vmatprep.subr.bf16.mxu0 %v4553_v58  ;;  %v6598_v58 = vld [vmem:[#allocation28] sm:$0xf]  ;;  %v2632_v36 = vld [vmem:[#allocation29 + $0x620] sm:$0xff] }
 0xd7d   :  { %v2263_v61 = vrot.slane %v6598_v58, %v5998_v48  ;;  %v2267_v37 = vrot.slane %v6598_v58, %v5995_v46 }
 0xd7f   :  { %4556 = vmatpush1.bf16.msra.mxu0 %v4555_v6  ;;  %v2568_v6 = vld [vmem:[#allocation29 + $0x420] sm:$0xff] }
 0xd80   :  { %4558 = vmatprep.subr.bf16.mxu0 %v4557_v7  ;;  %v4459_v19 = vpack.c.bf16 %v2568_v6, %v2564_v4  ;;  %v2605_v4 = vld [vmem:[#allocation29 + $0x548] sm:$0xff] }
 0xd81   :  { %v2609_v6 = vld [vmem:[#allocation29 + $0x568] sm:$0xff] }
 0xd83   :  { %4560 = vmatpush1.bf16.msra.mxu0 %v4559_v10 }
 0xd84   :  { %4562 = vmatprep.subr.bf16.mxu0 %v4561_v13  ;;  %v2577_v13 = vld [vmem:[#allocation29 + $0x468] sm:$0xff] }
 0xd85   :  { %v4461_v23 = vpack.c.bf16 %v2577_v13, %v2573_v50  ;;  %v2604_v50 = vld [vmem:[#allocation29 + $0x540] sm:$0xff]  ;;  %v4477_v13 = vpack.c.bf16 %v2609_v6, %v2605_v4  ;;  %v2638_v6 = vld [vmem:[#allocation29 + $0x650] sm:$0xff] }
 0xd87   :  { %4564 = vmatpush1.bf16.msra.mxu0 %v4563_v5  ;;  %v4587_v5 = vpack.c.bf16 %v2570_v9, %v2566_v8 }
 0xd88   :  { %4566 = vmatprep.subr.bf16.mxu0 %v4565_v20  ;;  %v2572_v20 = vld [vmem:[#allocation29 + $0x440] sm:$0xff] }
 0xd89   :  { %v4463_v15 = vpack.c.bf16 %v2576_v21, %v2572_v20  ;;  %v2615_v20 = vld [vmem:[#allocation29 + $0x598] sm:$0xff] }
 0xd8a   :  { %v2619_v21 = vld [vmem:[#allocation29 + $0x5b8] sm:$0xff] }
 0xd8b   :  { %4568 = vmatpush1.bf16.msra.mxu0 %v4567_v25  ;;  %v2574_v25 = vld [vmem:[#allocation29 + $0x450] sm:$0xff]  ;;  %v4609_v27 = vpack.c.bf16 %v2619_v21, %v2615_v20 }
 0xd8c   :  { %4570 = vmatprep.subr.bf16.mxu0 %v4569_v26  ;;  %v2578_v26 = vld [vmem:[#allocation29 + $0x470] sm:$0xff] }
 0xd8d   :  { %v4591_v42 = vpack.c.bf16 %v2578_v26, %v2574_v25  ;;  %v2616_v25 = vld [vmem:[#allocation29 + $0x5a0] sm:$0xff] }
 0xd8f   :  { %4572 = vmatpush1.bf16.msra.mxu0 %v4571_v18  ;;  %v4593_v18 = vpack.c.bf16 %v2587_v44, %v2583_v29  ;;  %v2618_v29 = vld [vmem:[#allocation29 + $0x5b0] sm:$0xff]  ;;  %v2621_v44 = vld [vmem:[#allocation29 + $0x5c8] sm:$0xff] }
 0xd90   :  { %4574 = vmatprep.subr.bf16.mxu0 %v4573_v2  ;;  %v2586_v2 = vld [vmem:[#allocation29 + $0x4b0] sm:$0xff] }
 0xd91   :  { %v4595_v35 = vpack.c.bf16 %v2586_v2, %v2582_v1  ;;  %v2624_v1 = vld [vmem:[#allocation29 + $0x5e0] sm:$0xff] }
 0xd93   :  { %4576 = vmatpush1.bf16.msra.mxu0 %v4575_v60  ;;  %v2592_v60 = vld [vmem:[#allocation29 + $0x4e0] sm:$0xff] }
 0xd94   :  { %4578 = vmatprep.subr.bf16.mxu0 %v4577_v63  ;;  %v4469_v63 = vpack.c.bf16 %v2593_v39, %v2589_v32  ;;  %v4471_v51 = vpack.c.bf16 %v2592_v60, %v2588_v38  ;;  %v2622_v39 = vld [vmem:[#allocation29 + $0x5d0] sm:$0xff]  ;;  %v2635_v38 = vld [vmem:[#allocation29 + $0x638] sm:$0xff] }
 0xd97   :  { %4580 = vmatpush1.bf16.msra.mxu0 %v4579_v11  ;;  %v2601_v11 = vld [vmem:[#allocation29 + $0x528] sm:$0xff] }
 0xd98   :  { %4582 = vmatprep.subr.bf16.mxu0 %v4581_v57  ;;  %v2599_v57 = vld [vmem:[#allocation29 + $0x518] sm:$0xff] }
 0xd9b   :  { %4584 = vmatpush1.bf16.msra.mxu0 %v4583_v54  ;;  %v2600_v54 = vld [vmem:[#allocation29 + $0x520] sm:$0xff] }
 0xd9c   :  { %4586 = vmatprep.subr.bf16.mxu0 %v4585_v55  ;;  %v4473_v55 = vpack.c.bf16 %v2601_v11, %v2597_v62  ;;  %v4475_v8 = vpack.c.bf16 %v2600_v54, %v2596_v53  ;;  %v2630_v11 = vld [vmem:[#allocation29 + $0x610] sm:$0xff]  ;;  %v2643_v53 = vld [vmem:[#allocation29 + $0x678] sm:$0xff] }
 0xe09   :  { %v2356_v0 = vpop.f32.mrb[18].mxu0 }
 0xe0a   :  { %v2357_v7 = vadd.f32 %v2356_v0, %v2263_v61  ;;  %v2358_v49 = vpop.f32.mrb[19].mxu0  ;;  %v4601_v61 = vpack.c.bf16 %v2603_v47, %v2599_v57  ;;  %v2602_v0 = vld [vmem:[#allocation29 + $0x530] sm:$0xff]  ;;  %v2637_v47 = vld [vmem:[#allocation29 + $0x648] sm:$0xff] }
 0xe0b   :  { %v2359_v10 = vadd.f32 %v2358_v49, %v2267_v37  ;;  %v2598_v37 = vld [vmem:[#allocation29 + $0x510] sm:$0xff]  ;;  %v2611_v49 = vld [vmem:[#allocation29 + $0x578] sm:$0xff] }
 0xe0c   :  { %v2432_v3 = vmax.f32 %v2357_v7, 0.0  ;;  %v2607_v7 = vld [vmem:[#allocation29 + $0x558] sm:$0xff]  ;;  %v4603_v9 = vpack.c.bf16 %v2602_v0, %v2598_v37  ;;  %v2634_v57 = vld [vmem:[#allocation29 + $0x630] sm:$0xff]  ;;  %v2640_v37 = vld [vmem:[#allocation29 + $0x660] sm:$0xff] }
 0xe0d   :  { %v2433_v16 = vmax.f32 %v2359_v10, 0.0  ;;  %v2608_v10 = vld [vmem:[#allocation29 + $0x560] sm:$0xff]  ;;  %v4605_v59 = vpack.c.bf16 %v2611_v49, %v2607_v7  ;;  %v2642_v7 = vld [vmem:[#allocation29 + $0x670] sm:$0xff]  ;;  %v2645_v49 = vld [vmem:[#allocation29 + $0x688] sm:$0xff] }
 0xe0f   :  { %2778 = vmatprep.mubr.f32.mxu1 %v2433_v16  ;;  %2920 = vmatprep.mubr.f32.mxu0 %v2433_v16  ;;  %v2610_v16 = vld [vmem:[#allocation29 + $0x570] sm:$0xff] }
 0xe10   :  { %2779 = vmatmul.mubr.f32.vlgmr.msra.gmra.mrb[28].mxu1 %v2432_v3  ;;  %2921 = vmatmul.mubr.f32.vlgmr.msra.gmra.mrb[22].mxu0 %v2432_v3  ;;  %v4479_v3 = vpack.c.bf16 %v2608_v10, %v2604_v50  ;;  %v2647_v50 = vld [vmem:[#allocation29 + $0x698] sm:$0xff] }
 0xe11   :  { %4460 = vmatpush1.bf16.msra.mxu1 %v4459_v19  ;;  %4588 = vmatpush1.bf16.msra.mxu0 %v4587_v5  ;;  %v2613_v19 = vld [vmem:[#allocation29 + $0x588] sm:$0xff]  ;;  %v2651_v10 = vld [vmem:[#allocation29 + $0x6b8] sm:$0xff] }
 0xe12   :  { %4462 = vmatprep.subr.bf16.mxu1 %v4461_v23  ;;  %4590 = vmatprep.subr.bf16.mxu0 %v4589_v24  ;;  %v2617_v5 = vld [vmem:[#allocation29 + $0x5a8] sm:$0xff]  ;;  %v4607_v23 = vpack.c.bf16 %v2610_v16, %v2606_v14  ;;  %v2612_v24 = vld [vmem:[#allocation29 + $0x580] sm:$0xff]  ;;  %v4623_v14 = vpack.c.bf16 %v2642_v7, %v2638_v6  ;;  %v4625_v21 = vpack.c.bf16 %v2651_v10, %v2647_v50  ;;  %v2679_v6 = vld [vmem:[#allocation29 + $0x798] sm:$0xff] }
 0xe13   :  { %v4481_v26 = vpack.c.bf16 %v2617_v5, %v2613_v19  ;;  %v4483_v22 = vpack.c.bf16 %v2616_v25, %v2612_v24  ;;  %v2644_v16 = vld [vmem:[#allocation29 + $0x680] sm:$0xff]  ;;  %v2653_v24 = vld [vmem:[#allocation29 + $0x6c8] sm:$0xff]  ;;  %v2683_v7 = vld [vmem:[#allocation29 + $0x7b8] sm:$0xff] }
 0xe14   :  { %v2648_v19 = vld [vmem:[#allocation29 + $0x6a0] sm:$0xff] }
 0xe15   :  { %4464 = vmatpush1.bf16.msra.mxu1 %v4463_v15  ;;  %4592 = vmatpush1.bf16.msra.mxu0 %v4591_v42  ;;  %v2625_v15 = vld [vmem:[#allocation29 + $0x5e8] sm:$0xff]  ;;  %v2623_v42 = vld [vmem:[#allocation29 + $0x5d8] sm:$0xff]  ;;  %v2680_v50 = vld [vmem:[#allocation29 + $0x7a0] sm:$0xff] }
 0xe16   :  { %4466 = vmatprep.subr.bf16.mxu1 %v4465_v31  ;;  %4594 = vmatprep.subr.bf16.mxu0 %v4593_v18  ;;  %v4611_v31 = vpack.c.bf16 %v2618_v29, %v2614_v28  ;;  %v2620_v18 = vld [vmem:[#allocation29 + $0x5c0] sm:$0xff]  ;;  %v4485_v2 = vpack.c.bf16 %v2625_v15, %v2621_v44  ;;  %v4613_v32 = vpack.c.bf16 %v2627_v30, %v2623_v42  ;;  %v2659_v28 = vld [vmem:[#allocation29 + $0x6f8] sm:$0xff] }
 0xe17   :  { %v4487_v60 = vpack.c.bf16 %v2624_v1, %v2620_v18  ;;  %v4499_v44 = vpack.c.bf16 %v2648_v19, %v2644_v16  ;;  %v2652_v42 = vld [vmem:[#allocation29 + $0x6c0] sm:$0xff]  ;;  %v2654_v18 = vld [vmem:[#allocation29 + $0x6d0] sm:$0xff]  ;;  %v2685_v19 = vld [vmem:[#allocation29 + $0x7c8] sm:$0xff] }
 0xe18   :  { %v2656_v30 = vld [vmem:[#allocation29 + $0x6e0] sm:$0xff]  ;;  %v2658_v1 = vld [vmem:[#allocation29 + $0x6f0] sm:$0xff] }
 0xe19   :  { %4468 = vmatpush1.bf16.msra.mxu1 %v4467_v34  ;;  %4596 = vmatpush1.bf16.msra.mxu0 %v4595_v35  ;;  %v2633_v34 = vld [vmem:[#allocation29 + $0x628] sm:$0xff]  ;;  %v2631_v35 = vld [vmem:[#allocation29 + $0x618] sm:$0xff]  ;;  %v2682_v16 = vld [vmem:[#allocation29 + $0x7b0] sm:$0xff] }
 0xe1a   :  { %4470 = vmatprep.subr.bf16.mxu1 %v4469_v63  ;;  %4598 = vmatprep.subr.bf16.mxu0 %v4597_v40  ;;  %v4615_v63 = vpack.c.bf16 %v2626_v33, %v2622_v39  ;;  %v2628_v40 = vld [vmem:[#allocation29 + $0x600] sm:$0xff]  ;;  %v4489_v41 = vpack.c.bf16 %v2633_v34, %v2629_v17  ;;  %v4617_v62 = vpack.c.bf16 %v2635_v38, %v2631_v35  ;;  %v2663_v39 = vld [vmem:[#allocation29 + $0x718] sm:$0xff] }
 0xe1b   :  { %v4491_v54 = vpack.c.bf16 %v2632_v36, %v2628_v40  ;;  %v2667_v33 = vld [vmem:[#allocation29 + $0x738] sm:$0xff]  ;;  %v4503_v17 = vpack.c.bf16 %v2656_v30, %v2652_v42  ;;  %v4631_v34 = vpack.c.bf16 %v2658_v1, %v2654_v18  ;;  %v2660_v35 = vld [vmem:[#allocation29 + $0x700] sm:$0xff]  ;;  %v2662_v40 = vld [vmem:[#allocation29 + $0x710] sm:$0xff] }
 0xe1c   :  { %v2664_v38 = vld [vmem:[#allocation29 + $0x720] sm:$0xff]  ;;  %v2666_v36 = vld [vmem:[#allocation29 + $0x730] sm:$0xff] }
 0xe1d   :  { %4472 = vmatpush1.bf16.msra.mxu1 %v4471_v51  ;;  %4600 = vmatpush1.bf16.msra.mxu0 %v4599_v52  ;;  %v2641_v51 = vld [vmem:[#allocation29 + $0x668] sm:$0xff]  ;;  %v2639_v52 = vld [vmem:[#allocation29 + $0x658] sm:$0xff] }
 0xe1e   :  { %4474 = vmatprep.subr.bf16.mxu1 %v4473_v55  ;;  %4602 = vmatprep.subr.bf16.mxu0 %v4601_v61  ;;  %v4619_v55 = vpack.c.bf16 %v2634_v57, %v2630_v11  ;;  %v2636_v61 = vld [vmem:[#allocation29 + $0x640] sm:$0xff]  ;;  %v4493_v0 = vpack.c.bf16 %v2641_v51, %v2637_v47  ;;  %v4621_v4 = vpack.c.bf16 %v2643_v53, %v2639_v52  ;;  %v2671_v11 = vld [vmem:[#allocation29 + $0x758] sm:$0xff] }
 0xe1f   :  { %v2675_v57 = vld [vmem:[#allocation29 + $0x778] sm:$0xff]  ;;  %v4507_v47 = vpack.c.bf16 %v2664_v38, %v2660_v35  ;;  %v4635_v51 = vpack.c.bf16 %v2666_v36, %v2662_v40  ;;  %v2668_v52 = vld [vmem:[#allocation29 + $0x740] sm:$0xff]  ;;  %v3015_v38 = vld [vmem:[#allocation32 + $0x68] sm:$0xff] }
 0xe20   :  { %v2672_v53 = vld [vmem:[#allocation29 + $0x760] sm:$0xff]  ;;  %v3008_v42 = vld [vmem:[#allocation32 + $0x30] sm:$0xff] }
 0xe21   :  { %4476 = vmatpush1.bf16.msra.mxu1 %v4475_v8  ;;  %4604 = vmatpush1.bf16.msra.mxu0 %v4603_v9  ;;  %v2275_v8 = vrot.slane %v6598_v58, %v6067_v43  ;;  %v2649_v9 = vld [vmem:[#allocation29 + $0x6a8] sm:$0xff]  ;;  %v3005_v30 = vld [vmem:[#allocation32 + $0x18] sm:$0xff]  ;;  %v3012_v36 = vld [vmem:[#allocation32 + $0x50] sm:$0xff] }
 0xe22   :  { %4478 = vmatprep.subr.bf16.mxu1 %v4477_v13  ;;  %4606 = vmatprep.subr.bf16.mxu0 %v4605_v59  ;;  %v4495_v59 = vpack.c.bf16 %v2640_v37, %v2636_v61  ;;  %v4497_v20 = vpack.c.bf16 %v2649_v9, %v2645_v49  ;;  %v2670_v61 = vld [vmem:[#allocation29 + $0x750] sm:$0xff]  ;;  %v4511_v49 = vpack.c.bf16 %v2672_v53, %v2668_v52  ;;  %v2676_v9 = vld [vmem:[#allocation29 + $0x780] sm:$0xff] }
 0xe23   :  { %v2674_v37 = vld [vmem:[#allocation29 + $0x770] sm:$0xff]  ;;  %v3002_v1 = vld [vmem:[#allocation32] sm:$0xff]  ;;  %v3025_v53 = vld [vmem:[#allocation32 + $0xb8] sm:$0xff] }
 0xe24   :  { %v3018_v35 = vld [vmem:[#allocation32 + $0x80] sm:$0xff]  ;;  %v3028_v52 = vld [vmem:[#allocation32 + $0xd0] sm:$0xff] }
 0xe25   :  { %4480 = vmatpush1.bf16.msra.mxu1 %v4479_v3  ;;  %4608 = vmatpush1.bf16.msra.mxu0 %v4607_v23  ;;  %v2646_v3 = vld [vmem:[#allocation29 + $0x690] sm:$0xff] }
 0xe26   :  { %4482 = vmatprep.subr.bf16.mxu1 %v4481_v26  ;;  %4610 = vmatprep.subr.bf16.mxu0 %v4609_v27  ;;  %v2650_v23 = vld [vmem:[#allocation29 + $0x6b0] sm:$0xff]  ;;  %v2657_v26 = vld [vmem:[#allocation29 + $0x6e8] sm:$0xff]  ;;  %v2655_v27 = vld [vmem:[#allocation29 + $0x6d8] sm:$0xff] }
 0xe27   :  { %v4627_v15 = vpack.c.bf16 %v2650_v23, %v2646_v3  ;;  %v4515_v3 = vpack.c.bf16 %v2680_v50, %v2676_v9  ;;  %v3038_v9 = vld [vmem:[#allocation32 + $0x120] sm:$0xff]  ;;  %v3035_v50 = vld [vmem:[#allocation32 + $0x108] sm:$0xff] }
 0xe29   :  { %4484 = vmatpush1.bf16.msra.mxu1 %v4483_v22  ;;  %4612 = vmatpush1.bf16.msra.mxu0 %v4611_v31  ;;  %v4501_v22 = vpack.c.bf16 %v2657_v26, %v2653_v24  ;;  %v4629_v31 = vpack.c.bf16 %v2659_v28, %v2655_v27  ;;  %v2684_v24 = vld [vmem:[#allocation29 + $0x7c0] sm:$0xff]  ;;  %v2271_v26 = vrot.slane %v6598_v58, %v6031_v56 }
 0xe2a   :  { %4486 = vmatprep.subr.bf16.mxu1 %v4485_v2  ;;  %4614 = vmatprep.subr.bf16.mxu0 %v4613_v32  ;;  %v2661_v2 = vld [vmem:[#allocation29 + $0x708] sm:$0xff] }
 0xe2b   :  { %v2665_v32 = vld [vmem:[#allocation29 + $0x728] sm:$0xff] }
 0xe2d   :  { %4488 = vmatpush1.bf16.msra.mxu1 %v4487_v60  ;;  %4616 = vmatpush1.bf16.msra.mxu0 %v4615_v63  ;;  %v4505_v60 = vpack.c.bf16 %v2665_v32, %v2661_v2  ;;  %v4633_v63 = vpack.c.bf16 %v2667_v33, %v2663_v39  ;;  %v3007_v2 = vld [vmem:[#allocation32 + $0x28] sm:$0xff]  ;;  %v3004_v33 = vld [vmem:[#allocation32 + $0x10] sm:$0xff] }
 0xe2e   :  { %4490 = vmatprep.subr.bf16.mxu1 %v4489_v41  ;;  %4618 = vmatprep.subr.bf16.mxu0 %v4617_v62  ;;  %v2669_v41 = vld [vmem:[#allocation29 + $0x748] sm:$0xff] }
 0xe2f   :  { %v2673_v62 = vld [vmem:[#allocation29 + $0x768] sm:$0xff] }
 0xe31   :  { %v6606_v13 = vpop.f32.mrb[20].mxu0  ;;  %4492 = vmatpush1.bf16.msra.mxu1 %v4491_v54  ;;  %4620 = vmatpush1.bf16.msra.mxu0 %v4619_v55  ;;  %v4509_v54 = vpack.c.bf16 %v2673_v62, %v2669_v41  ;;  %v4637_v55 = vpack.c.bf16 %v2675_v57, %v2671_v11  ;;  %v3017_v41 = vld [vmem:[#allocation32 + $0x78] sm:$0xff]  ;;  %v3014_v57 = vld [vmem:[#allocation32 + $0x60] sm:$0xff] }
 0xe32   :  { %v2429_v5 = vpop.f32.mrb[21].mxu0  ;;  %4494 = vmatprep.subr.bf16.mxu1 %v4493_v0  ;;  %4622 = vmatprep.subr.bf16.mxu0 %v4621_v4  ;;  %v2677_v0 = vld [vmem:[#allocation29 + $0x788] sm:$0xff]  ;;  %v2428_v32 = vadd.f32 %v6606_v13, %v2271_v26 }
 0xe33   :  { %v2430_v25 = vadd.f32 %v2429_v5, %v2275_v8  ;;  %v2681_v4 = vld [vmem:[#allocation29 + $0x7a8] sm:$0xff]  ;;  %v4639_v8 = vpack.c.bf16 %v2674_v37, %v2670_v61 }
 0xe34   :  { %v4513_v10 = vpack.c.bf16 %v2681_v4, %v2677_v0  ;;  %v2689_v5 = vld [vmem:[#allocation29 + $0x7e8] sm:$0xff]  ;;  %v2434_v62 = vmax.f32 %v2428_v32, 0.0 }
 0xe35   :  { %v2435_v29 = vmax.f32 %v2430_v25, 0.0  ;;  %4496 = vmatpush1.bf16.msra.mxu1 %v4495_v59  ;;  %4624 = vmatpush1.bf16.msra.mxu0 %v4623_v14  ;;  %v4641_v59 = vpack.c.bf16 %v2683_v7, %v2679_v6  ;;  %v2678_v14 = vld [vmem:[#allocation29 + $0x790] sm:$0xff]  ;;  %v2688_v25 = vld [vmem:[#allocation29 + $0x7e0] sm:$0xff]  ;;  %v4517_v27 = vpack.c.bf16 %v2689_v5, %v2685_v19 }
 0xe36   :  { %4498 = vmatprep.subr.bf16.mxu1 %v4497_v20  ;;  %4626 = vmatprep.subr.bf16.mxu0 %v4625_v21  ;;  %v2687_v20 = vld [vmem:[#allocation29 + $0x7d8] sm:$0xff]  ;;  %v4643_v23 = vpack.c.bf16 %v2682_v16, %v2678_v14  ;;  %v3022_v37 = vld [vmem:[#allocation32 + $0xa0] sm:$0xff]  ;;  %v3027_v0 = vld [vmem:[#allocation32 + $0xc8] sm:$0xff] }
 0xe37   :  { %2849 = vmatprep.mubr.f32.mxu1 %v2435_v29  ;;  %2991 = vmatprep.mubr.f32.mxu0 %v2435_v29  ;;  %v2691_v21 = vld [vmem:[#allocation29 + $0x7f8] sm:$0xff]  ;;  %v2686_v29 = vld [vmem:[#allocation29 + $0x7d0] sm:$0xff]  ;;  %v3050_v26 = vld [vmem:[#allocation32 + $0x180] sm:$0xff] }
 0xe38   :  { %v4645_v28 = vpack.c.bf16 %v2691_v21, %v2687_v20  ;;  %v3024_v7 = vld [vmem:[#allocation32 + $0xb0] sm:$0xff]  ;;  %v3037_v19 = vld [vmem:[#allocation32 + $0x118] sm:$0xff]  ;;  %v3034_v21 = vld [vmem:[#allocation32 + $0x100] sm:$0xff] }
 0xe39   :  { %4500 = vmatpush1.bf16.msra.mxu1 %v4499_v44  ;;  %4628 = vmatpush1.bf16.msra.mxu0 %v4627_v15  ;;  %v2690_v44 = vld [vmem:[#allocation29 + $0x7f0] sm:$0xff] }
 0xe3a   :  { %4502 = vmatprep.subr.bf16.mxu1 %v4501_v22  ;;  %4630 = vmatprep.subr.bf16.mxu0 %v4629_v31  ;;  %v3003_v15 = vld [vmem:[#allocation32 + $0x8] sm:$0xff]  ;;  %v3010_v22 = vld [vmem:[#allocation32 + $0x40] sm:$0xff]  ;;  %v4519_v31 = vpack.c.bf16 %v2688_v25, %v2684_v24  ;;  %v4647_v18 = vpack.c.bf16 %v2690_v44, %v2686_v29  ;;  %v3032_v16 = vld [vmem:[#allocation32 + $0xf0] sm:$0xff] }
 0xe3b   :  { %v4649_v58 = vpack.c.bf16 %v3008_v42, %v3003_v15  ;;  %v4777_v39 = vpack.c.bf16 %v3010_v22, %v3005_v30  ;;  %v3048_v24 = vld [vmem:[#allocation32 + $0x170] sm:$0xff]  ;;  %v3045_v25 = vld [vmem:[#allocation32 + $0x158] sm:$0xff]  ;;  %v3042_v29 = vld [vmem:[#allocation32 + $0x140] sm:$0xff] }
 0xe3c   :  { %v3047_v44 = vld [vmem:[#allocation32 + $0x168] sm:$0xff]  ;;  %v4793_v42 = vpack.c.bf16 %v3050_v26, %v3045_v25  ;;  %v3044_v30 = vld [vmem:[#allocation32 + $0x150] sm:$0xff]  ;;  %v3049_v22 = vld [vmem:[#allocation32 + $0x178] sm:$0xff] }
 0xe3d   :  { %4504 = vmatpush1.bf16.msra.mxu1 %v4503_v17  ;;  %4632 = vmatpush1.bf16.msra.mxu0 %v4631_v34  ;;  %v3009_v17 = vld [vmem:[#allocation32 + $0x38] sm:$0xff]  ;;  %v4667_v32 = vpack.c.bf16 %v3047_v44, %v3042_v29  ;;  %v3098_v26 = vld [vmem:[#allocation32 + $0x300] sm:$0xff] }
 0xe3e   :  { %4506 = vmatprep.subr.bf16.mxu1 %v4505_v60  ;;  %4634 = vmatprep.subr.bf16.mxu0 %v4633_v63  ;;  %v3013_v34 = vld [vmem:[#allocation32 + $0x58] sm:$0xff]  ;;  %v3020_v60 = vld [vmem:[#allocation32 + $0x90] sm:$0xff]  ;;  %v4651_v63 = vpack.c.bf16 %v3007_v2, %v3002_v1  ;;  %v4779_v40 = vpack.c.bf16 %v3009_v17, %v3004_v33  ;;  %v3055_v1 = vld [vmem:[#allocation32 + $0x1a8] sm:$0xff] }
 0xe3f   :  { %v4653_v13 = vpack.c.bf16 %v3018_v35, %v3013_v34  ;;  %v4781_v11 = vpack.c.bf16 %v3020_v60, %v3015_v38  ;;  %v3060_v2 = vld [vmem:[#allocation32 + $0x1d0] sm:$0xff]  ;;  %v3057_v33 = vld [vmem:[#allocation32 + $0x1b8] sm:$0xff]  ;;  %v3054_v35 = vld [vmem:[#allocation32 + $0x1a0] sm:$0xff] }
 0xe40   :  { %v4797_v34 = vpack.c.bf16 %v3060_v2, %v3055_v1  ;;  %v3059_v38 = vld [vmem:[#allocation32 + $0x1c8] sm:$0xff]  ;;  %v3093_v25 = vld [vmem:[#allocation32 + $0x2d8] sm:$0xff]  ;;  %v3108_v2 = vld [vmem:[#allocation32 + $0x350] sm:$0xff] }
 0xe41   :  { %4508 = vmatpush1.bf16.msra.mxu1 %v4507_v47  ;;  %4636 = vmatpush1.bf16.msra.mxu0 %v4635_v51  ;;  %v3019_v47 = vld [vmem:[#allocation32 + $0x88] sm:$0xff] }
 0xe42   :  { %4510 = vmatprep.subr.bf16.mxu1 %v4509_v54  ;;  %4638 = vmatprep.subr.bf16.mxu0 %v4637_v55  ;;  %v3023_v51 = vld [vmem:[#allocation32 + $0xa8] sm:$0xff]  ;;  %v3030_v54 = vld [vmem:[#allocation32 + $0xe0] sm:$0xff]  ;;  %v4655_v55 = vpack.c.bf16 %v3017_v41, %v3012_v36  ;;  %v4783_v61 = vpack.c.bf16 %v3019_v47, %v3014_v57 }
 0xe43   :  { %v4657_v4 = vpack.c.bf16 %v3028_v52, %v3023_v51  ;;  %v4785_v6 = vpack.c.bf16 %v3030_v54, %v3025_v53  ;;  %v3063_v60 = vld [vmem:[#allocation32 + $0x1e8] sm:$0xff]  ;;  %v3070_v36 = vld [vmem:[#allocation32 + $0x220] sm:$0xff]  ;;  %v3064_v51 = vld [vmem:[#allocation32 + $0x1f0] sm:$0xff] }
 0xe44   :  { %v3069_v52 = vld [vmem:[#allocation32 + $0x218] sm:$0xff]  ;;  %v3078_v54 = vld [vmem:[#allocation32 + $0x260] sm:$0xff]  ;;  %v3103_v1 = vld [vmem:[#allocation32 + $0x328] sm:$0xff] }
 0xe45   :  { %4512 = vmatpush1.bf16.msra.mxu1 %v4511_v49  ;;  %4640 = vmatpush1.bf16.msra.mxu0 %v4639_v8  ;;  %v3029_v49 = vld [vmem:[#allocation32 + $0xd8] sm:$0xff] }
 0xe46   :  { %4514 = vmatprep.subr.bf16.mxu1 %v4513_v10  ;;  %4642 = vmatprep.subr.bf16.mxu0 %v4641_v59  ;;  %v3033_v8 = vld [vmem:[#allocation32 + $0xf8] sm:$0xff]  ;;  %v3040_v10 = vld [vmem:[#allocation32 + $0x130] sm:$0xff]  ;;  %v4659_v59 = vpack.c.bf16 %v3027_v0, %v3022_v37  ;;  %v4787_v14 = vpack.c.bf16 %v3029_v49, %v3024_v7  ;;  %v4803_v0 = vpack.c.bf16 %v3069_v52, %v3064_v51 }
 0xe47   :  { %v4661_v5 = vpack.c.bf16 %v3038_v9, %v3033_v8  ;;  %v4789_v20 = vpack.c.bf16 %v3040_v10, %v3035_v50  ;;  %v3073_v53 = vld [vmem:[#allocation32 + $0x238] sm:$0xff]  ;;  %v3074_v8 = vld [vmem:[#allocation32 + $0x240] sm:$0xff]  ;;  %v3079_v9 = vld [vmem:[#allocation32 + $0x268] sm:$0xff] }
 0xe48   :  { %v4677_v7 = vpack.c.bf16 %v3078_v54, %v3073_v53  ;;  %v3083_v50 = vld [vmem:[#allocation32 + $0x288] sm:$0xff]  ;;  %v3088_v10 = vld [vmem:[#allocation32 + $0x2b0] sm:$0xff]  ;;  %v3114_v53 = vld [vmem:[#allocation32 + $0x380] sm:$0xff] }
 0xe49   :  { %4516 = vmatpush1.bf16.msra.mxu1 %v4515_v3  ;;  %4644 = vmatpush1.bf16.msra.mxu0 %v4643_v23  ;;  %v3039_v3 = vld [vmem:[#allocation32 + $0x128] sm:$0xff] }
 0xe4a   :  { %4518 = vmatprep.subr.bf16.mxu1 %v4517_v27  ;;  %4646 = vmatprep.subr.bf16.mxu0 %v4645_v28  ;;  %v3043_v23 = vld [vmem:[#allocation32 + $0x148] sm:$0xff]  ;;  %v4663_v27 = vpack.c.bf16 %v3037_v19, %v3032_v16  ;;  %v4791_v28 = vpack.c.bf16 %v3039_v3, %v3034_v21  ;;  %v4807_v19 = vpack.c.bf16 %v3079_v9, %v3074_v8 }
 0xe4b   :  { %v4665_v15 = vpack.c.bf16 %v3048_v24, %v3043_v23  ;;  %v4681_v21 = vpack.c.bf16 %v3088_v10, %v3083_v50  ;;  %v3084_v23 = vld [vmem:[#allocation32 + $0x290] sm:$0xff]  ;;  %v3089_v24 = vld [vmem:[#allocation32 + $0x2b8] sm:$0xff]  ;;  %v3119_v54 = vld [vmem:[#allocation32 + $0x3a8] sm:$0xff] }
 0xe4c   :  { %v4811_v44 = vpack.c.bf16 %v3089_v24, %v3084_v23  ;;  %v3124_v50 = vld [vmem:[#allocation32 + $0x3d0] sm:$0xff]  ;;  %v3129_v10 = vld [vmem:[#allocation32 + $0x3f8] sm:$0xff] }
 0xe4d   :  { %4520 = vmatpush1.bf16.msra.mxu1 %v4519_v31  ;;  %4648 = vmatpush1.bf16.msra.mxu0 %v4647_v18  ;;  %v3053_v31 = vld [vmem:[#allocation32 + $0x198] sm:$0xff]  ;;  %v3058_v18 = vld [vmem:[#allocation32 + $0x1c0] sm:$0xff] }
 0xe4e   :  { %4650 = vmatprep.subr.bf16.mxu1 %v4649_v58  ;;  %4778 = vmatprep.subr.bf16.mxu0 %v4777_v39  ;;  %v4795_v58 = vpack.c.bf16 %v3049_v22, %v3044_v30  ;;  %v3052_v39 = vld [vmem:[#allocation32 + $0x190] sm:$0xff]  ;;  %v4669_v17 = vpack.c.bf16 %v3058_v18, %v3053_v31  ;;  %v4685_v30 = vpack.c.bf16 %v3098_v26, %v3093_v25  ;;  %v3094_v31 = vld [vmem:[#allocation32 + $0x2e0] sm:$0xff]  ;;  %v3099_v18 = vld [vmem:[#allocation32 + $0x308] sm:$0xff] }
 0xe4f   :  { %v4671_v41 = vpack.c.bf16 %v3057_v33, %v3052_v39  ;;  %v4815_v33 = vpack.c.bf16 %v3099_v18, %v3094_v31  ;;  %v3134_v25 = vld [vmem:[#allocation32 + $0x420] sm:$0xff]  ;;  %v3139_v26 = vld [vmem:[#allocation32 + $0x448] sm:$0xff] }
 0xe50   :  { %2850 = vmatmul.mubr.f32.vlgmr.msra.gmra.mrb[28].mxu1 %v2434_v62  ;;  %2992 = vmatmul.mubr.f32.vlgmr.msra.gmra.mrb[22].mxu0 %v2434_v62  ;;  %v4799_v62 = vpack.c.bf16 %v3059_v38, %v3054_v35  ;;  %v4689_v35 = vpack.c.bf16 %v3108_v2, %v3103_v1  ;;  %v3147_v18 = vld [vmem:[#allocation32 + $0x488] sm:$0xff]  ;;  %v3144_v1 = vld [vmem:[#allocation32 + $0x470] sm:$0xff]  ;;  %v3149_v2 = vld [vmem:[#allocation32 + $0x498] sm:$0xff] }
 0xe51   :  { %4652 = vmatpush1.bf16.msra.mxu1 %v4651_v63  ;;  %4780 = vmatpush1.bf16.msra.mxu0 %v4779_v40  ;;  %v3068_v63 = vld [vmem:[#allocation32 + $0x210] sm:$0xff]  ;;  %v3065_v40 = vld [vmem:[#allocation32 + $0x1f8] sm:$0xff] }
 0xe52   :  { %4654 = vmatprep.subr.bf16.mxu1 %v4653_v13  ;;  %4782 = vmatprep.subr.bf16.mxu0 %v4781_v11  ;;  %v3062_v13 = vld [vmem:[#allocation32 + $0x1e0] sm:$0xff]  ;;  %v3067_v11 = vld [vmem:[#allocation32 + $0x208] sm:$0xff]  ;;  %v4673_v57 = vpack.c.bf16 %v3068_v63, %v3063_v60  ;;  %v4801_v47 = vpack.c.bf16 %v3070_v36, %v3065_v40  ;;  %v3104_v60 = vld [vmem:[#allocation32 + $0x330] sm:$0xff] }
 0xe53   :  { %v4675_v37 = vpack.c.bf16 %v3067_v11, %v3062_v13  ;;  %v3109_v63 = vld [vmem:[#allocation32 + $0x358] sm:$0xff]  ;;  %v3118_v36 = vld [vmem:[#allocation32 + $0x3a0] sm:$0xff] }
 0xe54   :  { %v3113_v40 = vld [vmem:[#allocation32 + $0x378] sm:$0xff]  ;;  %v4819_v11 = vpack.c.bf16 %v3109_v63, %v3104_v60 }
 0xe55   :  { %4656 = vmatpush1.bf16.msra.mxu1 %v4655_v55  ;;  %4784 = vmatpush1.bf16.msra.mxu0 %v4783_v61  ;;  %v3075_v55 = vld [vmem:[#allocation32 + $0x248] sm:$0xff]  ;;  %v3080_v61 = vld [vmem:[#allocation32 + $0x270] sm:$0xff]  ;;  %v4693_v51 = vpack.c.bf16 %v3118_v36, %v3113_v40  ;;  %v3157_v60 = vld [vmem:[#allocation32 + $0x4d8] sm:$0xff] }
 0xe56   :  { %4658 = vmatprep.subr.bf16.mxu1 %v4657_v4  ;;  %4786 = vmatprep.subr.bf16.mxu0 %v4785_v6  ;;  %v3072_v4 = vld [vmem:[#allocation32 + $0x230] sm:$0xff]  ;;  %v3077_v6 = vld [vmem:[#allocation32 + $0x258] sm:$0xff]  ;;  %v4805_v49 = vpack.c.bf16 %v3080_v61, %v3075_v55  ;;  %v3123_v55 = vld [vmem:[#allocation32 + $0x3c8] sm:$0xff] }
 0xe57   :  { %v4679_v16 = vpack.c.bf16 %v3077_v6, %v3072_v4  ;;  %v3128_v61 = vld [vmem:[#allocation32 + $0x3f0] sm:$0xff]  ;;  %v4823_v6 = vpack.c.bf16 %v3119_v54, %v3114_v53  ;;  %v3154_v36 = vld [vmem:[#allocation32 + $0x4c0] sm:$0xff]  ;;  %v6611_v53 = vld [vmem:[#allocation31] sm:$0xf] }
 0xe58   :  { %v4697_v8 = vpack.c.bf16 %v3128_v61, %v3123_v55  ;;  %v2697_v54 = vrot.slane %v6611_v53, %v5998_v48  ;;  %v2701_v55 = vrot.slane %v6611_v53, %v5995_v46  ;;  %v2709_v61 = vrot.slane %v6611_v53, %v6067_v43 }
 0xe59   :  { %4660 = vmatpush1.bf16.msra.mxu1 %v4659_v59  ;;  %4788 = vmatpush1.bf16.msra.mxu0 %v4787_v14  ;;  %v3085_v59 = vld [vmem:[#allocation32 + $0x298] sm:$0xff]  ;;  %v3090_v14 = vld [vmem:[#allocation32 + $0x2c0] sm:$0xff] }
 0xe5a   :  { %4662 = vmatprep.subr.bf16.mxu1 %v4661_v5  ;;  %4790 = vmatprep.subr.bf16.mxu0 %v4789_v20  ;;  %v3082_v5 = vld [vmem:[#allocation32 + $0x280] sm:$0xff]  ;;  %v3087_v20 = vld [vmem:[#allocation32 + $0x2a8] sm:$0xff]  ;;  %v4809_v3 = vpack.c.bf16 %v3090_v14, %v3085_v59  ;;  %v3133_v59 = vld [vmem:[#allocation32 + $0x418] sm:$0xff] }
 0xe5b   :  { %v4683_v29 = vpack.c.bf16 %v3087_v20, %v3082_v5  ;;  %v3138_v14 = vld [vmem:[#allocation32 + $0x440] sm:$0xff]  ;;  %v4827_v20 = vpack.c.bf16 %v3129_v10, %v3124_v50  ;;  %v3169_v50 = vld [vmem:[#allocation32 + $0x538] sm:$0xff] }
 0xe5c   :  { %v4701_v23 = vpack.c.bf16 %v3138_v14, %v3133_v59  ;;  %v3173_v59 = vld [vmem:[#allocation32 + $0x558] sm:$0xff] }
 0xe5d   :  { %4664 = vmatpush1.bf16.msra.mxu1 %v4663_v27  ;;  %4792 = vmatpush1.bf16.msra.mxu0 %v4791_v28  ;;  %v3095_v27 = vld [vmem:[#allocation32 + $0x2e8] sm:$0xff]  ;;  %v3100_v28 = vld [vmem:[#allocation32 + $0x310] sm:$0xff] }
 0xe5e   :  { %4666 = vmatprep.subr.bf16.mxu1 %v4665_v15  ;;  %4794 = vmatprep.subr.bf16.mxu0 %v4793_v42  ;;  %v3092_v15 = vld [vmem:[#allocation32 + $0x2d0] sm:$0xff]  ;;  %v3097_v42 = vld [vmem:[#allocation32 + $0x2f8] sm:$0xff]  ;;  %v4813_v22 = vpack.c.bf16 %v3100_v28, %v3095_v27  ;;  %v3143_v27 = vld [vmem:[#allocation32 + $0x468] sm:$0xff] }
 0xe5f   :  { %v4687_v39 = vpack.c.bf16 %v3097_v42, %v3092_v15  ;;  %v3148_v28 = vld [vmem:[#allocation32 + $0x490] sm:$0xff]  ;;  %v4831_v42 = vpack.c.bf16 %v3139_v26, %v3134_v25  ;;  %v3174_v26 = vld [vmem:[#allocation32 + $0x560] sm:$0xff] }
 0xe61   :  { %4668 = vmatpush1.bf16.msra.mxu1 %v4667_v32  ;;  %4796 = vmatpush1.bf16.msra.mxu0 %v4795_v58  ;;  %v3105_v32 = vld [vmem:[#allocation32 + $0x338] sm:$0xff]  ;;  %v3110_v58 = vld [vmem:[#allocation32 + $0x360] sm:$0xff] }
 0xe62   :  { %4670 = vmatprep.subr.bf16.mxu1 %v4669_v17  ;;  %4798 = vmatprep.subr.bf16.mxu0 %v4797_v34  ;;  %v3102_v17 = vld [vmem:[#allocation32 + $0x320] sm:$0xff]  ;;  %v3107_v34 = vld [vmem:[#allocation32 + $0x348] sm:$0xff]  ;;  %v4817_v38 = vpack.c.bf16 %v3110_v58, %v3105_v32  ;;  %v4835_v58 = vpack.c.bf16 %v3149_v2, %v3144_v1 }
 0xe63   :  { %v4691_v13 = vpack.c.bf16 %v3107_v34, %v3102_v17  ;;  %v3155_v17 = vld [vmem:[#allocation32 + $0x4c8] sm:$0xff]  ;;  %v3182_v1 = vld [vmem:[#allocation32 + $0x5a0] sm:$0xff] }
 0xe64   :  { %v3187_v2 = vld [vmem:[#allocation32 + $0x5c8] sm:$0xff] }
 0xe65   :  { %4672 = vmatpush1.bf16.msra.mxu1 %v4671_v41  ;;  %4800 = vmatpush1.bf16.msra.mxu0 %v4799_v62  ;;  %v3115_v41 = vld [vmem:[#allocation32 + $0x388] sm:$0xff]  ;;  %v3120_v62 = vld [vmem:[#allocation32 + $0x3b0] sm:$0xff] }
 0xe66   :  { %4674 = vmatprep.subr.bf16.mxu1 %v4673_v57  ;;  %4802 = vmatprep.subr.bf16.mxu0 %v4801_v47  ;;  %v3112_v57 = vld [vmem:[#allocation32 + $0x370] sm:$0xff]  ;;  %v3117_v47 = vld [vmem:[#allocation32 + $0x398] sm:$0xff]  ;;  %v4821_v52 = vpack.c.bf16 %v3120_v62, %v3115_v41  ;;  %v3159_v41 = vld [vmem:[#allocation32 + $0x4e8] sm:$0xff] }
 0xe67   :  { %v4695_v4 = vpack.c.bf16 %v3117_v47, %v3112_v57  ;;  %v4839_v62 = vpack.c.bf16 %v3159_v41, %v3154_v36  ;;  %v3165_v57 = vld [vmem:[#allocation32 + $0x518] sm:$0xff] }
 0xe68   :  { %v3197_v36 = vld [vmem:[#allocation32 + $0x618] sm:$0xff] }
 0xe69   :  { %4676 = vmatpush1.bf16.msra.mxu1 %v4675_v37  ;;  %4804 = vmatpush1.bf16.msra.mxu0 %v4803_v0  ;;  %v3125_v37 = vld [vmem:[#allocation32 + $0x3d8] sm:$0xff]  ;;  %v3130_v0 = vld [vmem:[#allocation32 + $0x400] sm:$0xff] }
 0xe6a   :  { %4678 = vmatprep.subr.bf16.mxu1 %v4677_v7  ;;  %4806 = vmatprep.subr.bf16.mxu0 %v4805_v49  ;;  %v3122_v7 = vld [vmem:[#allocation32 + $0x3c0] sm:$0xff]  ;;  %v3127_v49 = vld [vmem:[#allocation32 + $0x3e8] sm:$0xff]  ;;  %v4825_v9 = vpack.c.bf16 %v3130_v0, %v3125_v37 }
 0xe6b   :  { %v4699_v5 = vpack.c.bf16 %v3127_v49, %v3122_v7 }
 0xe6d   :  { %4680 = vmatpush1.bf16.msra.mxu1 %v4679_v16  ;;  %4808 = vmatpush1.bf16.msra.mxu0 %v4807_v19  ;;  %v3135_v16 = vld [vmem:[#allocation32 + $0x428] sm:$0xff]  ;;  %v3140_v19 = vld [vmem:[#allocation32 + $0x450] sm:$0xff] }
 0xe6e   :  { %4682 = vmatprep.subr.bf16.mxu1 %v4681_v21  ;;  %4810 = vmatprep.subr.bf16.mxu0 %v4809_v3  ;;  %v3132_v21 = vld [vmem:[#allocation32 + $0x410] sm:$0xff]  ;;  %v3137_v3 = vld [vmem:[#allocation32 + $0x438] sm:$0xff]  ;;  %v4829_v24 = vpack.c.bf16 %v3140_v19, %v3135_v16  ;;  %v3178_v16 = vld [vmem:[#allocation32 + $0x580] sm:$0xff] }
 0xe6f   :  { %v4703_v15 = vpack.c.bf16 %v3137_v3, %v3132_v21  ;;  %v3175_v19 = vld [vmem:[#allocation32 + $0x568] sm:$0xff] }
 0xe71   :  { %4684 = vmatpush1.bf16.msra.mxu1 %v4683_v29  ;;  %4812 = vmatpush1.bf16.msra.mxu0 %v4811_v44  ;;  %v3145_v29 = vld [vmem:[#allocation32 + $0x478] sm:$0xff]  ;;  %v3150_v44 = vld [vmem:[#allocation32 + $0x4a0] sm:$0xff] }
 0xe72   :  { %4686 = vmatprep.subr.bf16.mxu1 %v4685_v30  ;;  %4814 = vmatprep.subr.bf16.mxu0 %v4813_v22  ;;  %v3142_v30 = vld [vmem:[#allocation32 + $0x460] sm:$0xff]  ;;  %v4705_v22 = vpack.c.bf16 %v3148_v28, %v3143_v27  ;;  %v4833_v31 = vpack.c.bf16 %v3150_v44, %v3145_v29  ;;  %v3179_v27 = vld [vmem:[#allocation32 + $0x588] sm:$0xff]  ;;  %v4717_v29 = vpack.c.bf16 %v3178_v16, %v3173_v59  ;;  %v3212_v16 = vld [vmem:[#allocation32 + $0x690] sm:$0xff] }
 0xe73   :  { %v4707_v32 = vpack.c.bf16 %v3147_v18, %v3142_v30  ;;  %v3183_v28 = vld [vmem:[#allocation32 + $0x5a8] sm:$0xff]  ;;  %v3190_v30 = vld [vmem:[#allocation32 + $0x5e0] sm:$0xff]  ;;  %v4847_v18 = vpack.c.bf16 %v3179_v27, %v3174_v26  ;;  %v3228_v26 = vld [vmem:[#allocation32 + $0x710] sm:$0xff] }
 0xe74   :  { %v3225_v27 = vld [vmem:[#allocation32 + $0x6f8] sm:$0xff] }
 0xe75   :  { %4688 = vmatpush1.bf16.msra.mxu1 %v4687_v39  ;;  %4816 = vmatpush1.bf16.msra.mxu0 %v4815_v33  ;;  %v3153_v39 = vld [vmem:[#allocation32 + $0x4b8] sm:$0xff]  ;;  %v3158_v33 = vld [vmem:[#allocation32 + $0x4e0] sm:$0xff] }
 0xe76   :  { %4690 = vmatprep.subr.bf16.mxu1 %v4689_v35  ;;  %4818 = vmatprep.subr.bf16.mxu0 %v4817_v38  ;;  %v4709_v34 = vpack.c.bf16 %v3158_v33, %v3153_v39  ;;  %v3160_v35 = vld [vmem:[#allocation32 + $0x4f0] sm:$0xff]  ;;  %v3189_v33 = vld [vmem:[#allocation32 + $0x5d8] sm:$0xff] }
 0xe77   :  { %v3152_v38 = vld [vmem:[#allocation32 + $0x4b0] sm:$0xff]  ;;  %v4837_v63 = vpack.c.bf16 %v3160_v35, %v3155_v17  ;;  %v3193_v17 = vld [vmem:[#allocation32 + $0x5f8] sm:$0xff]  ;;  %v3195_v35 = vld [vmem:[#allocation32 + $0x608] sm:$0xff] }
 0xe78   :  { %v4711_v40 = vpack.c.bf16 %v3157_v60, %v3152_v38  ;;  %v3184_v39 = vld [vmem:[#allocation32 + $0x5b0] sm:$0xff]  ;;  %v4723_v60 = vpack.c.bf16 %v3187_v2, %v3182_v1  ;;  %v3229_v1 = vld [vmem:[#allocation32 + $0x718] sm:$0xff] }
 0xe79   :  { %4692 = vmatpush1.bf16.msra.mxu1 %v4691_v13  ;;  %4820 = vmatpush1.bf16.msra.mxu0 %v4819_v11  ;;  %v3163_v13 = vld [vmem:[#allocation32 + $0x508] sm:$0xff]  ;;  %v3168_v11 = vld [vmem:[#allocation32 + $0x530] sm:$0xff]  ;;  %v3233_v2 = vld [vmem:[#allocation32 + $0x738] sm:$0xff] }
 0xe7a   :  { %4694 = vmatprep.subr.bf16.mxu1 %v4693_v51  ;;  %4822 = vmatprep.subr.bf16.mxu0 %v4821_v52  ;;  %v4713_v47 = vpack.c.bf16 %v3168_v11, %v3163_v13  ;;  %v3170_v51 = vld [vmem:[#allocation32 + $0x540] sm:$0xff]  ;;  %v3200_v38 = vld [vmem:[#allocation32 + $0x630] sm:$0xff]  ;;  %v3199_v11 = vld [vmem:[#allocation32 + $0x628] sm:$0xff] }
 0xe7b   :  { %v4841_v52 = vpack.c.bf16 %v3170_v51, %v3165_v57  ;;  %v3194_v13 = vld [vmem:[#allocation32 + $0x600] sm:$0xff]  ;;  %v3203_v57 = vld [vmem:[#allocation32 + $0x648] sm:$0xff]  ;;  %v3205_v51 = vld [vmem:[#allocation32 + $0x658] sm:$0xff] }
 0xe7d   :  { %4696 = vmatpush1.bf16.msra.mxu1 %v4695_v4  ;;  %4824 = vmatpush1.bf16.msra.mxu0 %v4823_v6  ;;  %v3162_v4 = vld [vmem:[#allocation32 + $0x500] sm:$0xff] }
 0xe7e   :  { %4698 = vmatprep.subr.bf16.mxu1 %v4697_v8  ;;  %4826 = vmatprep.subr.bf16.mxu0 %v4825_v9  ;;  %v3167_v8 = vld [vmem:[#allocation32 + $0x528] sm:$0xff]  ;;  %v3164_v9 = vld [vmem:[#allocation32 + $0x510] sm:$0xff] }
 0xe7f   :  { %v4715_v21 = vpack.c.bf16 %v3167_v8, %v3162_v4  ;;  %v4843_v3 = vpack.c.bf16 %v3169_v50, %v3164_v9  ;;  %v3213_v8 = vld [vmem:[#allocation32 + $0x698] sm:$0xff]  ;;  %v3218_v9 = vld [vmem:[#allocation32 + $0x6c0] sm:$0xff]  ;;  %v3215_v50 = vld [vmem:[#allocation32 + $0x6a8] sm:$0xff] }
 0xe81   :  { %4700 = vmatpush1.bf16.msra.mxu1 %v4699_v5  ;;  %4828 = vmatpush1.bf16.msra.mxu0 %v4827_v20  ;;  %v3180_v5 = vld [vmem:[#allocation32 + $0x590] sm:$0xff] }
 0xe82   :  { %4702 = vmatprep.subr.bf16.mxu1 %v4701_v23  ;;  %4830 = vmatprep.subr.bf16.mxu0 %v4829_v24  ;;  %v3172_v23 = vld [vmem:[#allocation32 + $0x550] sm:$0xff]  ;;  %v3177_v24 = vld [vmem:[#allocation32 + $0x578] sm:$0xff]  ;;  %v4845_v44 = vpack.c.bf16 %v3180_v5, %v3175_v19  ;;  %v4733_v5 = vpack.c.bf16 %v3218_v9, %v3213_v8 }
 0xe83   :  { %v3217_v19 = vld [vmem:[#allocation32 + $0x6b8] sm:$0xff]  ;;  %v3252_v9 = vld [vmem:[#allocation32 + $0x7d0] sm:$0xff] }
 0xe85   :  { %4704 = vmatpush1.bf16.msra.mxu1 %v4703_v15  ;;  %4832 = vmatpush1.bf16.msra.mxu0 %v4831_v42  ;;  %v3188_v15 = vld [vmem:[#allocation32 + $0x5d0] sm:$0xff]  ;;  %v3185_v42 = vld [vmem:[#allocation32 + $0x5b8] sm:$0xff] }
 0xe86   :  { %4706 = vmatprep.subr.bf16.mxu1 %v4705_v22  ;;  %4834 = vmatprep.subr.bf16.mxu0 %v4833_v31  ;;  %v4719_v31 = vpack.c.bf16 %v3177_v24, %v3172_v23  ;;  %v3219_v23 = vld [vmem:[#allocation32 + $0x6c8] sm:$0xff] }
 0xe87   :  { %v3223_v24 = vld [vmem:[#allocation32 + $0x6e8] sm:$0xff] }
 0xe89   :  { %4708 = vmatpush1.bf16.msra.mxu1 %v4707_v32  ;;  %4836 = vmatpush1.bf16.msra.mxu0 %v4835_v58  ;;  %v4721_v32 = vpack.c.bf16 %v3188_v15, %v3183_v28  ;;  %v4849_v58 = vpack.c.bf16 %v3190_v30, %v3185_v42  ;;  %v3230_v28 = vld [vmem:[#allocation32 + $0x720] sm:$0xff]  ;;  %v3227_v42 = vld [vmem:[#allocation32 + $0x708] sm:$0xff]  ;;  %v4737_v30 = vpack.c.bf16 %v3228_v26, %v3223_v24 }
 0xe8a   :  { %4710 = vmatprep.subr.bf16.mxu1 %v4709_v34  ;;  %4838 = vmatprep.subr.bf16.mxu0 %v4837_v63  ;;  %v3198_v34 = vld [vmem:[#allocation32 + $0x620] sm:$0xff]  ;;  %v4851_v63 = vpack.c.bf16 %v3189_v33, %v3184_v39  ;;  %v3240_v39 = vld [vmem:[#allocation32 + $0x770] sm:$0xff] }
 0xe8b   :  { %v4725_v41 = vpack.c.bf16 %v3198_v34, %v3193_v17  ;;  %v3222_v15 = vld [vmem:[#allocation32 + $0x6e0] sm:$0xff]  ;;  %v3232_v34 = vld [vmem:[#allocation32 + $0x730] sm:$0xff] }
 0xe8c   :  { %v4739_v33 = vpack.c.bf16 %v3227_v42, %v3222_v15  ;;  %v3262_v26 = vld [vmem:[#allocation32 + $0x820] sm:$0xff]  ;;  %v3269_v15 = vld [vmem:[#allocation32 + $0x858] sm:$0xff] }
 0xe8d   :  { %4712 = vmatpush1.bf16.msra.mxu1 %v4711_v40  ;;  %4840 = vmatpush1.bf16.msra.mxu0 %v4839_v62  ;;  %v3192_v40 = vld [vmem:[#allocation32 + $0x5f0] sm:$0xff]  ;;  %v4853_v62 = vpack.c.bf16 %v3200_v38, %v3195_v35  ;;  %v3237_v35 = vld [vmem:[#allocation32 + $0x758] sm:$0xff] }
 0xe8e   :  { %4714 = vmatprep.subr.bf16.mxu1 %v4713_v47  ;;  %4842 = vmatprep.subr.bf16.mxu0 %v4841_v52  ;;  %v3208_v47 = vld [vmem:[#allocation32 + $0x670] sm:$0xff]  ;;  %v3210_v52 = vld [vmem:[#allocation32 + $0x680] sm:$0xff]  ;;  %v3273_v42 = vld [vmem:[#allocation32 + $0x878] sm:$0xff] }
 0xe8f   :  { %v4729_v4 = vpack.c.bf16 %v3208_v47, %v3203_v57  ;;  %v3242_v47 = vld [vmem:[#allocation32 + $0x780] sm:$0xff] }
 0xf23   :  { %v2851_v37 = vpop.f32.mrb[28].mxu1  ;;  %v6619_v0 = vpop.f32.mrb[22].mxu0 }
 0xf24   :  { %v4969_v6 = vadd.f32 %v2851_v37, %v2697_v54  ;;  %v2853_v7 = vpop.f32.mrb[29].mxu1  ;;  %v2995_v49 = vpop.f32.mrb[23].mxu0  ;;  %v4727_v54 = vpack.c.bf16 %v3197_v36, %v3192_v40  ;;  %v3207_v37 = vld [vmem:[#allocation32 + $0x668] sm:$0xff] }
 0xf25   :  { %v4970_v10 = vadd.f32 %v2853_v7, %v2701_v55  ;;  %v4972_v14 = vadd.f32 %v2995_v49, %v2709_v61  ;;  %v4855_v55 = vpack.c.bf16 %v3199_v11, %v3194_v13  ;;  %v3202_v61 = vld [vmem:[#allocation32 + $0x640] sm:$0xff]  ;;  %v3204_v7 = vld [vmem:[#allocation32 + $0x650] sm:$0xff]  ;;  %v3209_v49 = vld [vmem:[#allocation32 + $0x678] sm:$0xff]  ;;  %v4743_v11 = vpack.c.bf16 %v3237_v35, %v3232_v34 }
 0xf26   :  { %v6623_v25 = vmax.f32 %v4969_v6, 0.0  ;;  %v4857_v6 = vpack.c.bf16 %v3210_v52, %v3205_v51  ;;  %v4731_v59 = vpack.c.bf16 %v3207_v37, %v3202_v61  ;;  %v3239_v40 = vld [vmem:[#allocation32 + $0x768] sm:$0xff]  ;;  %v3250_v13 = vld [vmem:[#allocation32 + $0x7c0] sm:$0xff]  ;;  %v3249_v61 = vld [vmem:[#allocation32 + $0x7b8] sm:$0xff] }
 0xf27   :  { %v6621_v20 = vmax.f32 %v4970_v10, 0.0  ;;  %v6627_v22 = vmax.f32 %v4972_v14, 0.0  ;;  %v3220_v10 = vld [vmem:[#allocation32 + $0x6d0] sm:$0xff]  ;;  %v4859_v14 = vpack.c.bf16 %v3209_v49, %v3204_v7  ;;  %v3243_v36 = vld [vmem:[#allocation32 + $0x788] sm:$0xff]  ;;  %v3253_v37 = vld [vmem:[#allocation32 + $0x7d8] sm:$0xff] }
 0xf28   :  { %v3247_v51 = vld [vmem:[#allocation32 + $0x7a8] sm:$0xff]  ;;  %v3260_v7 = vld [vmem:[#allocation32 + $0x810] sm:$0xff] }
 0xf29   :  { %3413 = vmatprep.mubr.f32.mxu1 %v6621_v20  ;;  %3555 = vmatprep.mubr.f32.mxu0 %v6621_v20  ;;  %v4747_v49 = vpack.c.bf16 %v3247_v51, %v3242_v47  ;;  %v3279_v34 = vld [vmem:[#allocation32 + $0x8a8] sm:$0xff]  ;;  %v3289_v47 = vld [vmem:[#allocation32 + $0x8f8] sm:$0xff] }
 0xf2a   :  { %3414 = vmatmul.mubr.f32.vlgmr.msra.gmra.mrb[30].mxu1 %v6623_v25  ;;  %3556 = vmatmul.mubr.f32.vlgmr.msra.gmra.mrb[24].mxu0 %v6623_v25  ;;  %v3283_v35 = vld [vmem:[#allocation32 + $0x8c8] sm:$0xff]  ;;  %v3293_v51 = vld [vmem:[#allocation32 + $0x918] sm:$0xff] }
 0xf2b   :  { %4716 = vmatpush1.bf16.msra.mxu1 %v4715_v21  ;;  %4844 = vmatpush1.bf16.msra.mxu0 %v4843_v3  ;;  %v4861_v21 = vpack.c.bf16 %v3220_v10, %v3215_v50  ;;  %v3214_v3 = vld [vmem:[#allocation32 + $0x6a0] sm:$0xff]  ;;  %v3257_v50 = vld [vmem:[#allocation32 + $0x7f8] sm:$0xff] }
 0xf2c   :  { %3484 = vmatprep.mubr.f32.mxu1 %v6627_v22  ;;  %3626 = vmatprep.mubr.f32.mxu0 %v6627_v22 }
 0xf2d   :  { %4718 = vmatprep.subr.bf16.mxu1 %v4717_v29  ;;  %4846 = vmatprep.subr.bf16.mxu0 %v4845_v44  ;;  %v4735_v29 = vpack.c.bf16 %v3217_v19, %v3212_v16  ;;  %v4863_v44 = vpack.c.bf16 %v3219_v23, %v3214_v3  ;;  %v3259_v16 = vld [vmem:[#allocation32 + $0x808] sm:$0xff]  ;;  %v3270_v3 = vld [vmem:[#allocation32 + $0x860] sm:$0xff]  ;;  %v4751_v23 = vpack.c.bf16 %v3257_v50, %v3252_v9 }
 0xf2e   :  { %v3263_v19 = vld [vmem:[#allocation32 + $0x828] sm:$0xff] }
 0xf2f   :  { %4720 = vmatpush1.bf16.msra.mxu1 %v4719_v31  ;;  %4848 = vmatpush1.bf16.msra.mxu0 %v4847_v18  ;;  %v4865_v31 = vpack.c.bf16 %v3230_v28, %v3225_v27  ;;  %v3224_v18 = vld [vmem:[#allocation32 + $0x6f0] sm:$0xff]  ;;  %v3267_v27 = vld [vmem:[#allocation32 + $0x848] sm:$0xff] }
 0xf30   :  { %4722 = vmatprep.subr.bf16.mxu1 %v4721_v32  ;;  %4850 = vmatprep.subr.bf16.mxu0 %v4849_v58  ;;  %v3238_v32 = vld [vmem:[#allocation32 + $0x760] sm:$0xff]  ;;  %v3235_v58 = vld [vmem:[#allocation32 + $0x748] sm:$0xff]  ;;  %v4867_v17 = vpack.c.bf16 %v3229_v1, %v3224_v18  ;;  %v3280_v18 = vld [vmem:[#allocation32 + $0x8b0] sm:$0xff]  ;;  %v4755_v1 = vpack.c.bf16 %v3267_v27, %v3262_v26 }
 0xf31   :  { %v4741_v38 = vpack.c.bf16 %v3238_v32, %v3233_v2  ;;  %v3272_v32 = vld [vmem:[#allocation32 + $0x870] sm:$0xff]  ;;  %v3299_v9 = vld [vmem:[#allocation32 + $0x948] sm:$0xff]  ;;  %v3309_v26 = vld [vmem:[#allocation32 + $0x998] sm:$0xff] }
 0xf32   :  { %v3303_v50 = vld [vmem:[#allocation32 + $0x968] sm:$0xff]  ;;  %v3313_v27 = vld [vmem:[#allocation32 + $0x9b8] sm:$0xff] }
 0xf33   :  { %4724 = vmatpush1.bf16.msra.mxu1 %v4723_v60  ;;  %4852 = vmatpush1.bf16.msra.mxu0 %v4851_v63  ;;  %v4869_v60 = vpack.c.bf16 %v3240_v39, %v3235_v58  ;;  %v3234_v63 = vld [vmem:[#allocation32 + $0x740] sm:$0xff]  ;;  %v3277_v58 = vld [vmem:[#allocation32 + $0x898] sm:$0xff] }
 0xf34   :  { %4726 = vmatprep.subr.bf16.mxu1 %v4725_v41  ;;  %4854 = vmatprep.subr.bf16.mxu0 %v4853_v62  ;;  %v3248_v41 = vld [vmem:[#allocation32 + $0x7b0] sm:$0xff]  ;;  %v3245_v62 = vld [vmem:[#allocation32 + $0x798] sm:$0xff]  ;;  %v4871_v57 = vpack.c.bf16 %v3239_v40, %v3234_v63  ;;  %v3290_v63 = vld [vmem:[#allocation32 + $0x900] sm:$0xff]  ;;  %v4759_v40 = vpack.c.bf16 %v3277_v58, %v3272_v32 }
 0xf35   :  { %v4745_v52 = vpack.c.bf16 %v3248_v41, %v3243_v36  ;;  %v3282_v41 = vld [vmem:[#allocation32 + $0x8c0] sm:$0xff]  ;;  %v3319_v58 = vld [vmem:[#allocation32 + $0x9e8] sm:$0xff] }
 0xf36   :  { %v3314_v32 = vld [vmem:[#allocation32 + $0x9c0] sm:$0xff] }
 0xf37   :  { %4728 = vmatpush1.bf16.msra.mxu1 %v4727_v54  ;;  %4856 = vmatpush1.bf16.msra.mxu0 %v4855_v55  ;;  %v4873_v54 = vpack.c.bf16 %v3250_v13, %v3245_v62  ;;  %v3244_v55 = vld [vmem:[#allocation32 + $0x790] sm:$0xff]  ;;  %v3287_v62 = vld [vmem:[#allocation32 + $0x8e8] sm:$0xff] }
 0xf38   :  { %4730 = vmatprep.subr.bf16.mxu1 %v4729_v4  ;;  %4858 = vmatprep.subr.bf16.mxu0 %v4857_v6  ;;  %v3258_v4 = vld [vmem:[#allocation32 + $0x800] sm:$0xff]  ;;  %v3255_v6 = vld [vmem:[#allocation32 + $0x7e8] sm:$0xff]  ;;  %v4875_v8 = vpack.c.bf16 %v3249_v61, %v3244_v55  ;;  %v3300_v55 = vld [vmem:[#allocation32 + $0x950] sm:$0xff]  ;;  %v4763_v61 = vpack.c.bf16 %v3287_v62, %v3282_v41 }
 0xf39   :  { %v4749_v10 = vpack.c.bf16 %v3258_v4, %v3253_v37  ;;  %v3292_v4 = vld [vmem:[#allocation32 + $0x910] sm:$0xff] }
 0xf3b   :  { %4732 = vmatpush1.bf16.msra.mxu1 %v4731_v59  ;;  %4860 = vmatpush1.bf16.msra.mxu0 %v4859_v14  ;;  %v4877_v59 = vpack.c.bf16 %v3260_v7, %v3255_v6  ;;  %v3254_v14 = vld [vmem:[#allocation32 + $0x7e0] sm:$0xff]  ;;  %v3297_v6 = vld [vmem:[#allocation32 + $0x938] sm:$0xff] }
 0xf3c   :  { %4734 = vmatprep.subr.bf16.mxu1 %v4733_v5  ;;  %4862 = vmatprep.subr.bf16.mxu0 %v4861_v21  ;;  %v3268_v5 = vld [vmem:[#allocation32 + $0x850] sm:$0xff]  ;;  %v3265_v21 = vld [vmem:[#allocation32 + $0x838] sm:$0xff]  ;;  %v4879_v24 = vpack.c.bf16 %v3259_v16, %v3254_v14  ;;  %v3310_v14 = vld [vmem:[#allocation32 + $0x9a0] sm:$0xff]  ;;  %v4767_v16 = vpack.c.bf16 %v3297_v6, %v3292_v4 }
 0xf3d   :  { %v4753_v28 = vpack.c.bf16 %v3268_v5, %v3263_v19  ;;  %v3302_v5 = vld [vmem:[#allocation32 + $0x960] sm:$0xff]  ;;  %v3036_v6 = vld [vmem:[#allocation32 + $0x110] sm:$0xff] }
 0xf3f   :  { %4736 = vmatpush1.bf16.msra.mxu1 %v4735_v29  ;;  %4864 = vmatpush1.bf16.msra.mxu0 %v4863_v44  ;;  %v4881_v29 = vpack.c.bf16 %v3270_v3, %v3265_v21  ;;  %v3264_v44 = vld [vmem:[#allocation32 + $0x830] sm:$0xff]  ;;  %v3307_v21 = vld [vmem:[#allocation32 + $0x988] sm:$0xff] }
 0xf40   :  { %4738 = vmatprep.subr.bf16.mxu1 %v4737_v30  ;;  %4866 = vmatprep.subr.bf16.mxu0 %v4865_v31  ;;  %v3278_v30 = vld [vmem:[#allocation32 + $0x8a0] sm:$0xff]  ;;  %v3275_v31 = vld [vmem:[#allocation32 + $0x888] sm:$0xff]  ;;  %v4883_v2 = vpack.c.bf16 %v3269_v15, %v3264_v44  ;;  %v3320_v44 = vld [vmem:[#allocation32 + $0x9f0] sm:$0xff]  ;;  %v4771_v15 = vpack.c.bf16 %v3307_v21, %v3302_v5 }
 0xf41   :  { %v4757_v39 = vpack.c.bf16 %v3278_v30, %v3273_v42  ;;  %v3312_v30 = vld [vmem:[#allocation32 + $0x9b0] sm:$0xff]  ;;  %v3061_v21 = vld [vmem:[#allocation32 + $0x1d8] sm:$0xff] }
 0xf42   :  { %v3056_v5 = vld [vmem:[#allocation32 + $0x1b0] sm:$0xff] }
 0xf43   :  { %4740 = vmatpush1.bf16.msra.mxu1 %v4739_v33  ;;  %4868 = vmatpush1.bf16.msra.mxu0 %v4867_v17  ;;  %v4885_v33 = vpack.c.bf16 %v3280_v18, %v3275_v31  ;;  %v3274_v17 = vld [vmem:[#allocation32 + $0x880] sm:$0xff]  ;;  %v2705_v31 = vrot.slane %v6611_v53, %v6031_v56  ;;  %v3011_v53 = vld [vmem:[#allocation32 + $0x48] sm:$0xff] }
 0xf44   :  { %4742 = vmatprep.subr.bf16.mxu1 %v4741_v38  ;;  %4870 = vmatprep.subr.bf16.mxu0 %v4869_v60  ;;  %v3288_v38 = vld [vmem:[#allocation32 + $0x8f0] sm:$0xff]  ;;  %v3285_v60 = vld [vmem:[#allocation32 + $0x8d8] sm:$0xff]  ;;  %v4887_v36 = vpack.c.bf16 %v3279_v34, %v3274_v17  ;;  %v4903_v34 = vpack.c.bf16 %v3319_v58, %v3314_v32  ;;  %v3166_v58 = vld [vmem:[#allocation32 + $0x520] sm:$0xff] }
 0xf45   :  { %v4761_v13 = vpack.c.bf16 %v3288_v38, %v3283_v35  ;;  %v4971_v35 = vadd.f32 %v6619_v0, %v2705_v31  ;;  %v3081_v31 = vld [vmem:[#allocation32 + $0x278] sm:$0xff] }
 0xf47   :  { %4744 = vmatpush1.bf16.msra.mxu1 %v4743_v11  ;;  %4872 = vmatpush1.bf16.msra.mxu0 %v4871_v57  ;;  %v4889_v11 = vpack.c.bf16 %v3290_v63, %v3285_v60  ;;  %v3284_v57 = vld [vmem:[#allocation32 + $0x8d0] sm:$0xff]  ;;  %v3006_v60 = vld [vmem:[#allocation32 + $0x20] sm:$0xff]  ;;  %v6636_v41 = vmax.f32 %v4971_v35, 0.0 }
 0xf48   :  { %4746 = vmatprep.subr.bf16.mxu1 %v4745_v52  ;;  %4874 = vmatprep.subr.bf16.mxu0 %v4873_v54  ;;  %v3298_v52 = vld [vmem:[#allocation32 + $0x940] sm:$0xff]  ;;  %v3295_v54 = vld [vmem:[#allocation32 + $0x928] sm:$0xff]  ;;  %v4891_v37 = vpack.c.bf16 %v3289_v47, %v3284_v57  ;;  %v3096_v63 = vld [vmem:[#allocation32 + $0x2f0] sm:$0xff] }
 0xf49   :  { %v4765_v7 = vpack.c.bf16 %v3298_v52, %v3293_v51  ;;  %v3106_v57 = vld [vmem:[#allocation32 + $0x340] sm:$0xff]  ;;  %v3111_v47 = vld [vmem:[#allocation32 + $0x368] sm:$0xff] }
 0xf4a   :  { %v4913_v51 = vpack.c.bf16 %v3111_v47, %v3106_v57  ;;  %v3026_v52 = vld [vmem:[#allocation32 + $0xc0] sm:$0xff]  ;;  %v3281_v57 = vld [vmem:[#allocation32 + $0x8b8] sm:$0xff] }
 0xf4b   :  { %4748 = vmatpush1.bf16.msra.mxu1 %v4747_v49  ;;  %4876 = vmatpush1.bf16.msra.mxu0 %v4875_v8  ;;  %v4893_v49 = vpack.c.bf16 %v3300_v55, %v3295_v54  ;;  %v3294_v8 = vld [vmem:[#allocation32 + $0x920] sm:$0xff]  ;;  %v3031_v54 = vld [vmem:[#allocation32 + $0xe8] sm:$0xff]  ;;  %v3116_v55 = vld [vmem:[#allocation32 + $0x390] sm:$0xff] }
 0xf4c   :  { %4750 = vmatprep.subr.bf16.mxu1 %v4749_v10  ;;  %4878 = vmatprep.subr.bf16.mxu0 %v4877_v59  ;;  %v3308_v10 = vld [vmem:[#allocation32 + $0x990] sm:$0xff]  ;;  %v3305_v59 = vld [vmem:[#allocation32 + $0x978] sm:$0xff]  ;;  %v4895_v19 = vpack.c.bf16 %v3299_v9, %v3294_v8  ;;  %v3131_v8 = vld [vmem:[#allocation32 + $0x408] sm:$0xff] }
 0xf4d   :  { %v4769_v3 = vpack.c.bf16 %v3308_v10, %v3303_v50  ;;  %v3051_v10 = vld [vmem:[#allocation32 + $0x188] sm:$0xff] }
 0xf4f   :  { %4752 = vmatpush1.bf16.msra.mxu1 %v4751_v23  ;;  %4880 = vmatpush1.bf16.msra.mxu0 %v4879_v24  ;;  %v4897_v23 = vpack.c.bf16 %v3310_v14, %v3305_v59  ;;  %v3304_v24 = vld [vmem:[#allocation32 + $0x970] sm:$0xff]  ;;  %v3141_v14 = vld [vmem:[#allocation32 + $0x458] sm:$0xff] }
 0xf50   :  { %4754 = vmatprep.subr.bf16.mxu1 %v4753_v28  ;;  %4882 = vmatprep.subr.bf16.mxu0 %v4881_v29  ;;  %v3318_v28 = vld [vmem:[#allocation32 + $0x9e0] sm:$0xff]  ;;  %v3315_v29 = vld [vmem:[#allocation32 + $0x9c8] sm:$0xff]  ;;  %v4899_v42 = vpack.c.bf16 %v3309_v26, %v3304_v24  ;;  %v3136_v59 = vld [vmem:[#allocation32 + $0x430] sm:$0xff]  ;;  %v4927_v24 = vpack.c.bf16 %v3061_v21, %v3056_v5 }
 0xf51   :  { %v4773_v18 = vpack.c.bf16 %v3318_v28, %v3313_v27  ;;  %v3066_v27 = vld [vmem:[#allocation32 + $0x200] sm:$0xff]  ;;  %v3071_v28 = vld [vmem:[#allocation32 + $0x228] sm:$0xff]  ;;  %v3321_v5 = vld [vmem:[#allocation32 + $0x9f8] sm:$0xff] }
 0xf53   :  { %4756 = vmatpush1.bf16.msra.mxu1 %v4755_v1  ;;  %4884 = vmatpush1.bf16.msra.mxu0 %v4883_v2  ;;  %v4901_v1 = vpack.c.bf16 %v3320_v44, %v3315_v29  ;;  %v3317_v2 = vld [vmem:[#allocation32 + $0x9d8] sm:$0xff]  ;;  %v3156_v29 = vld [vmem:[#allocation32 + $0x4d0] sm:$0xff] }
 0xf54   :  { %4758 = vmatprep.subr.bf16.mxu1 %v4757_v39  ;;  %4886 = vmatprep.subr.bf16.mxu0 %v4885_v33  ;;  %v3086_v39 = vld [vmem:[#allocation32 + $0x2a0] sm:$0xff]  ;;  %v3091_v33 = vld [vmem:[#allocation32 + $0x2c8] sm:$0xff]  ;;  %v4775_v17 = vpack.c.bf16 %v3317_v2, %v3312_v30  ;;  %v3161_v44 = vld [vmem:[#allocation32 + $0x4f8] sm:$0xff] }
 0xf55   :  { %v4905_v38 = vpack.c.bf16 %v3091_v33, %v3086_v39  ;;  %v3076_v30 = vld [vmem:[#allocation32 + $0x250] sm:$0xff]  ;;  %v3171_v39 = vld [vmem:[#allocation32 + $0x548] sm:$0xff] }
 0xf56   :  { %v4935_v2 = vpack.c.bf16 %v3081_v31, %v3076_v30  ;;  %v3256_v33 = vld [vmem:[#allocation32 + $0x7f0] sm:$0xff] }
 0xf57   :  { %4760 = vmatpush1.bf16.msra.mxu1 %v4759_v40  ;;  %4888 = vmatpush1.bf16.msra.mxu0 %v4887_v36  ;;  %v3101_v40 = vld [vmem:[#allocation32 + $0x318] sm:$0xff]  ;;  %v4907_v36 = vpack.c.bf16 %v3011_v53, %v3006_v60  ;;  %v3266_v53 = vld [vmem:[#allocation32 + $0x840] sm:$0xff] }
 0xf58   :  { %4762 = vmatprep.subr.bf16.mxu1 %v4761_v13  ;;  %4890 = vmatprep.subr.bf16.mxu0 %v4889_v11  ;;  %v4909_v62 = vpack.c.bf16 %v3101_v40, %v3096_v63  ;;  %v3016_v13 = vld [vmem:[#allocation32 + $0x70] sm:$0xff]  ;;  %v3021_v11 = vld [vmem:[#allocation32 + $0x98] sm:$0xff]  ;;  %v3271_v63 = vld [vmem:[#allocation32 + $0x868] sm:$0xff] }
 0xf59   :  { %v4911_v0 = vpack.c.bf16 %v3021_v11, %v3016_v13  ;;  %v3181_v60 = vld [vmem:[#allocation32 + $0x598] sm:$0xff]  ;;  %v3191_v13 = vld [vmem:[#allocation32 + $0x5e8] sm:$0xff]  ;;  %v3276_v11 = vld [vmem:[#allocation32 + $0x890] sm:$0xff] }
 0xf5b   :  { %4764 = vmatpush1.bf16.msra.mxu1 %v4763_v61  ;;  %4892 = vmatpush1.bf16.msra.mxu0 %v4891_v37  ;;  %v3121_v61 = vld [vmem:[#allocation32 + $0x3b8] sm:$0xff]  ;;  %v4915_v37 = vpack.c.bf16 %v3031_v54, %v3026_v52  ;;  %v3286_v54 = vld [vmem:[#allocation32 + $0x8e0] sm:$0xff] }
 0xf5c   :  { %4766 = vmatprep.subr.bf16.mxu1 %v4765_v7  ;;  %4894 = vmatprep.subr.bf16.mxu0 %v4893_v49  ;;  %v4917_v4 = vpack.c.bf16 %v3121_v61, %v3116_v55  ;;  %v3041_v7 = vld [vmem:[#allocation32 + $0x138] sm:$0xff]  ;;  %v3126_v49 = vld [vmem:[#allocation32 + $0x3e0] sm:$0xff]  ;;  %v3291_v55 = vld [vmem:[#allocation32 + $0x908] sm:$0xff] }
 0xf5d   :  { %v4919_v9 = vpack.c.bf16 %v3041_v7, %v3036_v6  ;;  %v4921_v50 = vpack.c.bf16 %v3131_v8, %v3126_v49  ;;  %v3201_v52 = vld [vmem:[#allocation32 + $0x638] sm:$0xff]  ;;  %v4953_v61 = vpack.c.bf16 %v3291_v55, %v3286_v54  ;;  %v3216_v8 = vld [vmem:[#allocation32 + $0x6b0] sm:$0xff] }
 0xf5e   :  { %v3301_v6 = vld [vmem:[#allocation32 + $0x958] sm:$0xff] }
 0xf5f   :  { %4768 = vmatpush1.bf16.msra.mxu1 %v4767_v16  ;;  %4896 = vmatpush1.bf16.msra.mxu0 %v4895_v19  ;;  %v4925_v19 = vpack.c.bf16 %v3141_v14, %v3136_v59  ;;  %v3226_v14 = vld [vmem:[#allocation32 + $0x700] sm:$0xff] }
 0xf60   :  { %4770 = vmatprep.subr.bf16.mxu1 %v4769_v3  ;;  %4898 = vmatprep.subr.bf16.mxu0 %v4897_v23  ;;  %v3146_v3 = vld [vmem:[#allocation32 + $0x480] sm:$0xff]  ;;  %v3151_v23 = vld [vmem:[#allocation32 + $0x4a8] sm:$0xff] }
 0xf61   :  { %v4929_v26 = vpack.c.bf16 %v3151_v23, %v3146_v3  ;;  %v3236_v23 = vld [vmem:[#allocation32 + $0x750] sm:$0xff] }
 0xf63   :  { %4772 = vmatpush1.bf16.msra.mxu1 %v4771_v15  ;;  %4900 = vmatpush1.bf16.msra.mxu0 %v4899_v42  ;;  %v4931_v15 = vpack.c.bf16 %v3071_v28, %v3066_v27  ;;  %v4933_v42 = vpack.c.bf16 %v3161_v44, %v3156_v29  ;;  %v3322_v27 = vld [vmem:[#allocation34] sm:$0x1f]  ;;  %v5585_v28 = vmov 1983009808  }
 0xf64   :  { %4774 = vmatprep.subr.bf16.mxu1 %v4773_v18  ;;  %4902 = vmatprep.subr.bf16.mxu0 %v4901_v1  ;;  %v3246_v18 = vld [vmem:[#allocation32 + $0x7a0] sm:$0xff]  ;;  %v3251_v1 = vld [vmem:[#allocation32 + $0x7c8] sm:$0xff]  ;;  %v3781_v29 = vunpack.c.l.s4 %v5585_v28  ;;  %v3327_v44 = vrot.slane %v3322_v27, %v5998_v48  ;;  %v3339_v31 = vrot.slane %v3322_v27, %v6067_v43  ;;  %v3343_v43 = vrot.slane %v3322_v27, %v687_v12 }
 0xf65   :  { %v4937_v32 = vpack.c.bf16 %v3251_v1, %v3246_v18 }
 0xf66   :  { %v3782_v30 = vunpack.c.0.s8 %v3781_v29 }
 0xf67   :  { %4776 = vmatpush1.bf16.msra.mxu1 %v4775_v17  ;;  %4904 = vmatpush1.bf16.msra.mxu0 %v4903_v34  ;;  %v3261_v17 = vld [vmem:[#allocation32 + $0x818] sm:$0xff]  ;;  %v4939_v34 = vpack.c.bf16 %v3171_v39, %v3166_v58 }
 0xf68   :  { %4906 = vmatprep.subr.bf16.mxu1 %v4905_v38  ;;  %v4941_v35 = vpack.c.bf16 %v3261_v17, %v3256_v33  ;;  %v3176_v38 = vld [vmem:[#allocation32 + $0x570] sm:$0xff] }
 0xf69   :  { %v4943_v40 = vpack.c.bf16 %v3181_v60, %v3176_v38 }
 0xf6a   :  { %3485 = vmatmul.mubr.f32.vlgmr.msra.gmra.mrb[30].mxu1 %v6636_v41  ;;  %3627 = vmatmul.mubr.f32.vlgmr.msra.gmra.mrb[24].mxu0 %v6636_v41 }
 0xf6b   :  { %4908 = vmatpush3.bf16.msra.mxu1 %v4907_v36  ;;  %3697 = vmatprep.mubr.f32.mxu1 %v6621_v20  ;;  %v3046_v20 = vld [vmem:[#allocation32 + $0x160] sm:$0xff]  ;;  %v4945_v36 = vpack.c.bf16 %v3271_v63, %v3266_v53 }
 0xf6c   :  { %4910 = vmatprep.subr.bf16.mxu1 %v4909_v62  ;;  %v4923_v16 = vpack.c.bf16 %v3051_v10, %v3046_v20  ;;  %v3186_v62 = vld [vmem:[#allocation32 + $0x5c0] sm:$0xff]  ;;  %v3311_v20 = vld [vmem:[#allocation32 + $0x9a8] sm:$0xff] }
 0xf6d   :  { %v4947_v47 = vpack.c.bf16 %v3191_v13, %v3186_v62 }
 0xf6f   :  { %4912 = vmatpush3.bf16.msra.mxu1 %v4911_v0  ;;  %v4949_v0 = vpack.c.bf16 %v3281_v57, %v3276_v11 }
 0xf70   :  { %4914 = vmatprep.subr.bf16.mxu1 %v4913_v51  ;;  %v3196_v51 = vld [vmem:[#allocation32 + $0x610] sm:$0xff] }
 0xf73   :  { %4916 = vmatpush3.bf16.msra.mxu1 %v4915_v37  ;;  %v3211_v37 = vld [vmem:[#allocation32 + $0x688] sm:$0xff] }
 0xf74   :  { %4918 = vmatprep.subr.bf16.mxu1 %v4917_v4  ;;  %v3296_v4 = vld [vmem:[#allocation32 + $0x930] sm:$0xff] }
 0xf75   :  { %v4957_v49 = vpack.c.bf16 %v3301_v6, %v3296_v4 }
 0xf77   :  { %4920 = vmatpush3.bf16.msra.mxu1 %v4919_v9  ;;  %v3221_v9 = vld [vmem:[#allocation32 + $0x6d8] sm:$0xff] }
 0xf78   :  { %4922 = vmatprep.subr.bf16.mxu1 %v4921_v50  ;;  %v3306_v50 = vld [vmem:[#allocation32 + $0x980] sm:$0xff]  ;;  %v4959_v10 = vpack.c.bf16 %v3221_v9, %v3216_v8 }
 0xf79   :  { %v4961_v59 = vpack.c.bf16 %v3311_v20, %v3306_v50 }
 0xf7b   :  { %4924 = vmatpush3.bf16.msra.mxu1 %v4923_v16  ;;  %v3231_v16 = vld [vmem:[#allocation32 + $0x728] sm:$0xff] }
 0xf7c   :  { %4926 = vmatprep.subr.bf16.mxu1 %v4925_v19  ;;  %v3316_v19 = vld [vmem:[#allocation32 + $0x9d0] sm:$0xff]  ;;  %v4963_v21 = vpack.c.bf16 %v3231_v16, %v3226_v14 }
 0xf7d   :  { %v4965_v3 = vpack.c.bf16 %v3321_v5, %v3316_v19 }
 0xf7f   :  { %4928 = vmatpush3.bf16.msra.mxu1 %v4927_v24  ;;  %v3241_v24 = vld [vmem:[#allocation32 + $0x778] sm:$0xff] }
 0xf80   :  { %4930 = vmatprep.subr.bf16.mxu1 %v4929_v26  ;;  %v4967_v26 = vpack.c.bf16 %v3241_v24, %v3236_v23 }
 0xf83   :  { %4932 = vmatpush3.bf16.msra.mxu1 %v4931_v15  ;;  %v3335_v15 = vrot.slane %v3322_v27, %v6031_v56 }
 0xf84   :  { %4934 = vmatprep.subr.bf16.mxu1 %v4933_v42  ;;  %v3331_v42 = vrot.slane %v3322_v27, %v5995_v46 }
 0xf87   :  { %4936 = vmatpush3.bf16.msra.mxu1 %v4935_v2 }
 0xf88   :  { %4938 = vmatprep.subr.bf16.mxu1 %v4937_v32 }
 0xf8a   :  { %3698 = vmatmul.mubr.f32.vlgmr.msra.gmra.mrb[32].mxu1 %v6623_v25  ;;  %v4951_v25 = vpack.c.bf16 %v3201_v52, %v3196_v51 }
 0xf8b   :  { %4940 = vmatpush3.bf16.msra.mxu1 %v4939_v34  ;;  %3767 = vmatprep.mubr.f32.mxu1 %v6627_v22  ;;  %v3206_v22 = vld [vmem:[#allocation32 + $0x660] sm:$0xff] }
 0xf8c   :  { %4942 = vmatprep.subr.bf16.mxu1 %v4941_v35  ;;  %v4955_v7 = vpack.c.bf16 %v3211_v37, %v3206_v22 }
 0xf8f   :  { %4944 = vmatpush3.bf16.msra.mxu1 %v4943_v40 }
 0xf90   :  { %4946 = vmatprep.subr.bf16.mxu1 %v4945_v36 }
 0xf93   :  { %4948 = vmatpush3.bf16.msra.mxu1 %v4947_v47 }
 0xf94   :  { %4950 = vmatprep.subr.bf16.mxu1 %v4949_v0 }
 0xf97   :  { %4952 = vmatpush3.bf16.msra.mxu1 %v4951_v25 }
 0xf98   :  { %4954 = vmatprep.subr.bf16.mxu1 %v4953_v61 }
 0xf9b   :  { %4956 = vmatpush3.bf16.msra.mxu1 %v4955_v7 }
 0xf9c   :  { %4958 = vmatprep.subr.bf16.mxu1 %v4957_v49 }
 0xf9f   :  { %4960 = vmatpush3.bf16.msra.mxu1 %v4959_v10 }
 0xfa0   :  { %4962 = vmatprep.subr.bf16.mxu1 %v4961_v59 }
 0xfa3   :  { %4964 = vmatpush3.bf16.msra.mxu1 %v4963_v21 }
 0xfa4   :  { %4966 = vmatprep.subr.bf16.mxu1 %v4965_v3 }
 0xfa7   :  { %4968 = vmatpush3.bf16.msra.mxu1 %v4967_v26 }
 0xfaa   :  { %3768 = vmatmul.mubr.f32.vlgmr.msra.gmra.mrb[34].mxu1 %v6636_v41  ;;  %v3785_v41 = vsub.s32 %v3782_v30, %v5992_v45 }
0x103d   :  { %v3486_v18 = vpop.f32.mrb[30].mxu1  ;;  %v3628_v1 = vpop.f32.mrb[24].mxu0 }
0x103e   :  { %v4973_v2 = vadd.f32 %v3486_v18, %v3327_v44  ;;  %v4975_v32 = vadd.f32 %v3628_v1, %v3335_v15  ;;  %v3488_v58 = vpop.f32.mrb[31].mxu1  ;;  %v3630_v39 = vpop.f32.mrb[25].mxu0 }
0x103f   :  { %v4974_v33 = vadd.f32 %v3488_v58, %v3331_v42  ;;  %v4976_v17 = vadd.f32 %v3630_v39, %v3339_v31 }
0x1041   :  { %v3778_v34 = vcombine.low %v4973_v2, %v4974_v33  ;;  %v3779_v35 = vcombine.low %v4975_v32, %v4976_v17 }
0x1043   :  { %v3786_v48 = vrot.slane %v3778_v34, %v3785_v41  ;;  %v3793_v38 = vrot.slane %v3779_v35, %v3785_v41 }
0x1045   :  { %v3794_v56 = vcombine.low %v3786_v48, %v3793_v38 }
0x1047   :  { %3804 = vst [vmem:[#allocation35] sm:$0xff] %v3794_v56 }
0x105d   :  { %v3906_v46 = vpop.f32.mrb[32].mxu1 }
0x105e   :  { %v3907_v60 = vpop.f32.mrb[33].mxu1 }
0x105f   :  { %v3908_v53 = vadd.f32 %v3907_v60, %v3906_v46 }
0x1061   :  { %v3700_v63 = vadd.f32 %v3908_v53, %v3343_v43 }
0x107d   :  { %v3941_v40 = vpop.f32.mrb[34].mxu1 }
0x107e   :  { %v3942_v36 = vpop.f32.mrb[35].mxu1 }
0x107f   :  { %v3943_v62 = vadd.f32 %v3942_v36, %v3941_v40 }
0x1081   :  { %v3770_v13 = vadd.f32 %v3943_v62, %v3700_v63 }
0x1083   :  { %3850 = vst.sshfl [vmem:[#allocation35 + $0x8] sm:$0x3 pattern:$0x76325410] %v3770_v13 }
0x1084   :  { %5517 = shalt.err (!%p5514_p4)
}
0x1085   :  { %s6724_s13 = sld [smem:[#allocation57_spill]] }
0x108b   :  { %s5518_s9 = scalar_lea.hbm %s6724_s13, 160 }
0x108c   :  { %p5519_p5 = scmp.ne.s32.totalorder %s6724_s13, %s5518_s9  ;;  %p5522_p6 = scmp.lt.u32.totalorder %s5518_s9, %s6724_s13 }
0x108e   :  { %p5524_p7 = pnand %p5522_p6, %p5519_p5 }
0x1090   :  { %5527 = shalt.err (!%p5524_p7)
}
0x1091   :  { %3815 = dma.vmem_to_hbm [thread:$0]  %s3813_s28, 160, %s6724_s13, [#allocation4]  }
0x1092   :  { %5550 = dma.done.wait [#allocation4], 160  }
0x1093   :  { %5551 = vsyncadd [#allocation4], 4294967136 }
0x1094   :  { %3819 = vsyncpa [#allocation3], 1 }
0x1095   :  { %3820 = vsyncpa [#allocation6], 1 }
0x1096   :  { %3821 = vsyncpa [#allocation9], 1 }
0x1097   :  { %3822 = vsyncpa [#allocation12], 1 }
0x1098   :  { %3823 = vsyncpa [#allocation15], 1 }
0x1099   :  { %3824 = vsyncpa [#allocation18], 1 }
0x109a   :  { %3825 = vsyncpa [#allocation21], 1 }
0x109b   :  { %3826 = vsyncpa [#allocation24], 1 }
0x109c   :  { %3827 = vsyncpa [#allocation27], 1 }
0x109d   :  { %3828 = vsyncpa [#allocation30], 1 }
0x109e   :  { %3829 = vsyncpa [#allocation33], 1 }
0x109f   :  { %3830 = vsyncpa [#allocation4], 1 }

</bundles_post_ra>
